<compile_context>
chip_gen: v7x
topology: tpu7x:2x2x1
jax: 0.10.0
libtpu: 0.0.40
codegen_flags: <defaults>
</compile_context>

<pallas_src>
import numpy as np

import jax
import jax.numpy as jnp
from jax.experimental import pallas as pl
from jax.experimental.pallas import tpu as pltpu


# ----------------------------- fused kernel ---------------------------------

def cnn_fused_kernel(x_ref, m1_ref, b1_ref, m2_ref, b2_ref, wfc_ref, bfc_ref,
                     out_ref, xpad_ref, s1p_ref):
    f32 = jnp.float32
    bf16 = jnp.bfloat16

    # ---- conv1 (5x5, pad 2, 1 -> 16 ch) as 5 banded matmuls ---------------
    # Padded 28x28 -> 32x32 image lives in a VMEM scratch.  Re-initialised on
    # every grid step so each TensorCore owns a valid buffer under "parallel".
    xpad_ref[...] = jnp.zeros((32, 32), f32)
    xpad_ref[pl.ds(2, 28), pl.ds(2, 28)] = x_ref[...]

    acc1 = jnp.zeros((28, 512), f32)
    for di in range(5):
        lhs = xpad_ref[pl.ds(di, 28), :].astype(bf16)            # (28, 32)
        acc1 = acc1 + jnp.dot(lhs, m1_ref[di], preferred_element_type=f32)
    r1 = jnp.maximum(acc1 + b1_ref[...], 0.0)                    # (28, 512)

    # ---- maxpool #1: W-pairs = the two aligned 256-col halves,  -----------
    # ---- H-pairs via exact 0/1 even/odd row-selection matmuls   -----------
    pw1 = jnp.maximum(r1[:, :256], r1[:, 256:])                  # (28, 256)
    ri = jax.lax.broadcasted_iota(jnp.int32, (14, 28), 0)
    ci = jax.lax.broadcasted_iota(jnp.int32, (14, 28), 1)
    sel_e = (ci == 2 * ri).astype(f32)
    sel_o = (ci == 2 * ri + 1).astype(f32)
    p1 = jnp.maximum(jnp.dot(sel_e, pw1, preferred_element_type=f32),
                     jnp.dot(sel_o, pw1, preferred_element_type=f32))  # (14,256)

    # ---- conv2 input: zero-padded (18 rows, 18*16 cols) in VMEM scratch ----
    # p1 columns 224..255 are exactly zero (padding lanes), so storing the
    # full 256-wide slab lands them on the right-edge padding columns.
    s1p_ref[...] = jnp.zeros((18, 288), f32)
    s1p_ref[pl.ds(2, 14), pl.ds(32, 256)] = p1

    # ---- conv2 (5x5, pad 2, 16 -> 32 ch) -----------------------------------
    acc2 = jnp.zeros((14, 512), f32)
    for di in range(5):
        lhs = s1p_ref[pl.ds(di, 14), :].astype(bf16)             # (14, 288)
        acc2 = acc2 + jnp.dot(lhs, m2_ref[di], preferred_element_type=f32)
    r2 = jnp.maximum(acc2 + b2_ref[...], 0.0)                    # (14, 512)

    # ---- maxpool #2 ---------------------------------------------------------
    pw2 = jnp.maximum(r2[:, :256], r2[:, 256:])                  # (14, 256)
    ri2 = jax.lax.broadcasted_iota(jnp.int32, (7, 14), 0)
    ci2 = jax.lax.broadcasted_iota(jnp.int32, (7, 14), 1)
    sel2_e = (ci2 == 2 * ri2).astype(f32)
    sel2_o = (ci2 == 2 * ri2 + 1).astype(f32)
    p2 = jnp.maximum(jnp.dot(sel2_e, pw2, preferred_element_type=f32),
                     jnp.dot(sel2_o, pw2, preferred_element_type=f32))  # (7, 256)

    # ---- fc1 (PyTorch NCHW flatten folded into the weight layout) ----------
    fc = jnp.zeros((1, 10), f32)
    for h in range(7):
        fc = fc + jnp.dot(p2[h:h + 1, :].astype(bf16), wfc_ref[h],
                          preferred_element_type=f32)
    out_ref[...] = fc + bfc_ref[...]


# ------------------------- host-side weight prep ----------------------------
# Column layout used everywhere for a conv output row:
#   col(w, co) = (w % 2) * 256 + (w // 2) * Cout + co     (pad lanes are zero)
# Input-row (matmul K) layout for a padded feature-map row:
#   row(w_in_padded, ci) = w_in_padded * Cin + ci

def _conv_band_matrices(w, wout, half_cols=256, pad=2):
    """w: (Cout, Cin, 5, 5) -> (5, (wout+2*pad)*Cin, 2*half_cols) f32."""
    cout, cin, kh, kw = w.shape
    wp = wout + 2 * pad
    m = np.zeros((kh, wp * cin, 2 * half_cols), dtype=np.float32)
    for di in range(kh):
        for wo in range(wout):
            col0 = (wo % 2) * half_cols + (wo // 2) * cout
            for dj in range(kw):
                win = wo + dj                      # padded input column
                for ch in range(cin):
                    m[di, win * cin + ch, col0:col0 + cout] = w[:, ch, di, dj]
    return m


def _bias_row(b, wout, half_cols=256):
    cout = b.shape[0]
    half = np.zeros((half_cols,), dtype=np.float32)
    half[: (wout // 2) * cout] = np.tile(b, wout // 2)
    return np.concatenate([half, half])[None, :]   # (1, 2*half_cols)


def _fc_matrix(wf, h=7, w=7, c=32, row_cols=256):
    """wf: (10, c*h*w) PyTorch layout -> (h, row_cols, 10); pad rows are 0."""
    n = wf.shape[0]
    m = np.zeros((h, row_cols, n), dtype=np.float32)
    for co in range(c):
        for hh in range(h):
            for ww in range(w):
                m[hh, ww * c + co, :] = wf[:, co * h * w + hh * w + ww]
    return m


def prepare_params(w1, b1, w2, b2, wf, bf):
    w1 = np.asarray(w1, np.float32); b1 = np.asarray(b1, np.float32)
    w2 = np.asarray(w2, np.float32); b2 = np.asarray(b2, np.float32)
    wf = np.asarray(wf, np.float32); bf = np.asarray(bf, np.float32)
    m1 = _conv_band_matrices(w1, wout=28)          # (5, 32, 512)
    m2 = _conv_band_matrices(w2, wout=14)          # (5, 288, 512)
    wfc = _fc_matrix(wf)                           # (7, 256, 10)
    return (jnp.asarray(m1, jnp.bfloat16),
            jnp.asarray(_bias_row(b1, 28), jnp.float32),     # (1, 512)
            jnp.asarray(m2, jnp.bfloat16),
            jnp.asarray(_bias_row(b2, 14), jnp.float32),     # (1, 512)
            jnp.asarray(wfc, jnp.bfloat16),
            jnp.asarray(bf[None, :], jnp.float32))           # (1, 10)


# ------------------------------ forward pass ---------------------------------

@jax.jit
def cnn_forward(x_nchw, m1, b1r, m2, b2r, wfc, bfr):
    batch = x_nchw.shape[0]
    out = pl.pallas_call(
        cnn_fused_kernel,
        out_shape=jax.ShapeDtypeStruct((batch, 1, 10), jnp.float32),
        grid=(batch,),
        in_specs=[
            pl.BlockSpec((None, None, 28, 28), lambda b: (b, 0, 0, 0)),  # image
            pl.BlockSpec((5, 32, 512), lambda b: (0, 0, 0)),             # conv1 band
            pl.BlockSpec((1, 512), lambda b: (0, 0)),                    # conv1 bias
            pl.BlockSpec((5, 288, 512), lambda b: (0, 0, 0)),            # conv2 band
            pl.BlockSpec((1, 512), lambda b: (0, 0)),                    # conv2 bias
            pl.BlockSpec((7, 256, 10), lambda b: (0, 0, 0)),             # fc weight
            pl.BlockSpec((1, 10), lambda b: (0, 0)),                     # fc bias
        ],
        out_specs=pl.BlockSpec((None, 1, 10), lambda b: (b, 0, 0)),
        scratch_shapes=[
            pltpu.VMEM((32, 32), jnp.float32),    # zero-padded conv1 input
            pltpu.VMEM((18, 288), jnp.float32),   # zero-padded pooled conv1 out
        ],
        compiler_params=pltpu.CompilerParams(
            dimension_semantics=("parallel",)),
    )(x_nchw, m1, b1r, m2, b2r, wfc, bfr)
    return out.reshape(batch, 10)


# ------------------------------ reference ------------------------------------

def reference_forward(x, w1, b1, w2, b2, wf, bf):
    def conv(z, w, b):
        y = jax.lax.conv_general_dilated(
            z, w, window_strides=(1, 1), padding=((2, 2), (2, 2)),
            dimension_numbers=("NCHW", "OIHW", "NCHW"))
        return y + b[None, :, None, None]

    def pool(z):
        return jax.lax.reduce_window(z, -jnp.inf, jax.lax.max,
                                     (1, 1, 2, 2), (1, 1, 2, 2), "VALID")

    o = pool(jnp.maximum(conv(x, w1, b1), 0.0))
    o = pool(jnp.maximum(conv(o, w2, b2), 0.0))
    o = o.reshape(o.shape[0], -1)
    return o @ wf.T + bf


# --------------------------------- main ---------------------------------------

if __name__ == "__main__":
    key = jax.random.PRNGKey(0)
    kx, k1, kb1, k2, kb2, kf, kbf = jax.random.split(key, 7)

    # input implied by fc1 = 32*7*7: 28x28 single-channel images
    x = jax.random.normal(kx, (2, 1, 28, 28), dtype=jnp.float32)

    # deterministic parameter init (PyTorch parameter shapes)
    w1 = 0.05 * jax.random.normal(k1, (16, 1, 5, 5), dtype=jnp.float32)
    b1 = 0.05 * jax.random.normal(kb1, (16,), dtype=jnp.float32)
    w2 = 0.05 * jax.random.normal(k2, (32, 16, 5, 5), dtype=jnp.float32)
    b2 = 0.05 * jax.random.normal(kb2, (32,), dtype=jnp.float32)
    wf = 0.05 * jax.random.normal(kf, (10, 32 * 7 * 7), dtype=jnp.float32)
    bf = 0.05 * jax.random.normal(kbf, (10,), dtype=jnp.float32)

    params = prepare_params(w1, b1, w2, b2, wf, bf)
    out = jax.block_until_ready(cnn_forward(x, *params))
    assert out.shape == (2, 10) and out.dtype == jnp.float32

    # sanity check against a plain-JAX reference (bf16 weights -> loose tol)
    ref = jax.block_until_ready(reference_forward(x, w1, b1, w2, b2, wf, bf))
    assert np.allclose(np.asarray(out), np.asarray(ref), rtol=3e-2, atol=3e-2), (
        float(np.max(np.abs(np.asarray(out) - np.asarray(ref)))))

    print("KERNEL_OK")
</pallas_src>

<mosaic_0001>
module attributes {stable_mosaic.version = 11 : i64} {
  func.func @cnn_fused_kernel(%arg0: i32, %arg1: memref<1x1x28x28xf32, #tpu.memory_space<vmem>>, %arg2: memref<5x32x512xbf16, #tpu.memory_space<vmem>>, %arg3: memref<1x512xf32, #tpu.memory_space<vmem>>, %arg4: memref<5x288x512xbf16, #tpu.memory_space<vmem>>, %arg5: memref<1x512xf32, #tpu.memory_space<vmem>>, %arg6: memref<7x256x10xbf16, #tpu.memory_space<vmem>>, %arg7: memref<1x10xf32, #tpu.memory_space<vmem>>, %arg8: memref<1x1x10xf32, #tpu.memory_space<vmem>>, %arg9: memref<32x32xf32, #tpu.memory_space<vmem>>, %arg10: memref<18x288xf32, #tpu.memory_space<vmem>>) attributes {dimension_semantics = [#tpu.dimension_semantics<parallel>], iteration_bounds = array<i64: 2>, scalar_prefetch = 0 : i64, scratch_operands = 2 : i64, tpu.core_type = #tpu.core_type<tc>, window_params = [{transform_indices = @transform_0, window_bounds = array<i64: 1, 1, 28, 28>}, {pipeline_mode = #tpu.pipeline_mode<synchronous>, transform_indices = @transform_1, window_bounds = array<i64: 5, 32, 512>}, {pipeline_mode = #tpu.pipeline_mode<synchronous>, transform_indices = @transform_2, window_bounds = array<i64: 1, 512>}, {pipeline_mode = #tpu.pipeline_mode<synchronous>, transform_indices = @transform_3, window_bounds = array<i64: 5, 288, 512>}, {pipeline_mode = #tpu.pipeline_mode<synchronous>, transform_indices = @transform_4, window_bounds = array<i64: 1, 512>}, {pipeline_mode = #tpu.pipeline_mode<synchronous>, transform_indices = @transform_5, window_bounds = array<i64: 7, 256, 10>}, {pipeline_mode = #tpu.pipeline_mode<synchronous>, transform_indices = @transform_6, window_bounds = array<i64: 1, 10>}, {transform_indices = @transform_7, window_bounds = array<i64: 1, 1, 10>}]} {
    %cst = arith.constant 0.000000e+00 : f32
    %0 = vector.broadcast %cst : f32 to vector<32x32xf32>
    %c0 = arith.constant 0 : index
    %c0_0 = arith.constant 0 : index
    %1 = vector.load %arg9[%c0, %c0_0] : memref<32x32xf32, #tpu.memory_space<vmem>>, vector<32x32xf32>
    tpu.vector_store %arg9[%c0, %c0_0], %0 {strides = array<i32>} : memref<32x32xf32, #tpu.memory_space<vmem>>, vector<32x32xf32>,
    %c0_1 = arith.constant 0 : index
    %c0_2 = arith.constant 0 : index
    %c0_3 = arith.constant 0 : index
    %c0_4 = arith.constant 0 : index
    %2 = vector.load %arg1[%c0_1, %c0_2, %c0_3, %c0_4] : memref<1x1x28x28xf32, #tpu.memory_space<vmem>>, vector<1x1x28x28xf32>
    %3 = vector.shape_cast %2 : vector<1x1x28x28xf32> to vector<28x28xf32>
    %c2 = arith.constant 2 : index
    %c2_5 = arith.constant 2 : index
    %4 = vector.load %arg9[%c2, %c2_5] : memref<32x32xf32, #tpu.memory_space<vmem>>, vector<28x28xf32>
    tpu.vector_store %arg9[%c2, %c2_5], %3 {strides = array<i32>} : memref<32x32xf32, #tpu.memory_space<vmem>>, vector<28x28xf32>,
    %cst_6 = arith.constant 0.000000e+00 : f32
    %5 = vector.broadcast %cst_6 : f32 to vector<28x512xf32>
    %c0_7 = arith.constant 0 : index
    %c0_8 = arith.constant 0 : index
    %6 = vector.load %arg9[%c0_7, %c0_8] : memref<32x32xf32, #tpu.memory_space<vmem>>, vector<28x32xf32>
    %7 = arith.truncf %6 : vector<28x32xf32> to vector<28x32xbf16>
    %c0_9 = arith.constant 0 : index
    %c0_10 = arith.constant 0 : index
    %c0_11 = arith.constant 0 : index
    %8 = vector.load %arg2[%c0_9, %c0_10, %c0_11] : memref<5x32x512xbf16, #tpu.memory_space<vmem>>, vector<1x32x512xbf16>
    %9 = vector.shape_cast %8 : vector<1x32x512xbf16> to vector<32x512xbf16>
    %cst_12 = arith.constant dense<0.000000e+00> : vector<28x512xf32>
    %10 = tpu.matmul %7, %9, %cst_12 {dimension_numbers = #tpu.dot_dimension_numbers<[1], [0], [0], [1], [0, 0, 1, 1], [], []>} : vector<28x32xbf16>, vector<32x512xbf16>, vector<28x512xf32> -> vector<28x512xf32>
    %11 = arith.addf %5, %10 : vector<28x512xf32>
    %c1 = arith.constant 1 : index
    %c0_13 = arith.constant 0 : index
    %12 = vector.load %arg9[%c1, %c0_13] : memref<32x32xf32, #tpu.memory_space<vmem>>, vector<28x32xf32>
    %13 = arith.truncf %12 : vector<28x32xf32> to vector<28x32xbf16>
    %c1_14 = arith.constant 1 : index
    %c0_15 = arith.constant 0 : index
    %c0_16 = arith.constant 0 : index
    %14 = vector.load %arg2[%c1_14, %c0_15, %c0_16] : memref<5x32x512xbf16, #tpu.memory_space<vmem>>, vector<1x32x512xbf16>
    %15 = vector.shape_cast %14 : vector<1x32x512xbf16> to vector<32x512xbf16>
    %cst_17 = arith.constant dense<0.000000e+00> : vector<28x512xf32>
    %16 = tpu.matmul %13, %15, %cst_17 {dimension_numbers = #tpu.dot_dimension_numbers<[1], [0], [0], [1], [0, 0, 1, 1], [], []>} : vector<28x32xbf16>, vector<32x512xbf16>, vector<28x512xf32> -> vector<28x512xf32>
    %17 = arith.addf %11, %16 : vector<28x512xf32>
    %c2_18 = arith.constant 2 : index
    %c0_19 = arith.constant 0 : index
    %18 = vector.load %arg9[%c2_18, %c0_19] : memref<32x32xf32, #tpu.memory_space<vmem>>, vector<28x32xf32>
    %19 = arith.truncf %18 : vector<28x32xf32> to vector<28x32xbf16>
    %c2_20 = arith.constant 2 : index
    %c0_21 = arith.constant 0 : index
    %c0_22 = arith.constant 0 : index
    %20 = vector.load %arg2[%c2_20, %c0_21, %c0_22] : memref<5x32x512xbf16, #tpu.memory_space<vmem>>, vector<1x32x512xbf16>
    %21 = vector.shape_cast %20 : vector<1x32x512xbf16> to vector<32x512xbf16>
    %cst_23 = arith.constant dense<0.000000e+00> : vector<28x512xf32>
    %22 = tpu.matmul %19, %21, %cst_23 {dimension_numbers = #tpu.dot_dimension_numbers<[1], [0], [0], [1], [0, 0, 1, 1], [], []>} : vector<28x32xbf16>, vector<32x512xbf16>, vector<28x512xf32> -> vector<28x512xf32>
    %23 = arith.addf %17, %22 : vector<28x512xf32>
    %c3 = arith.constant 3 : index
    %c0_24 = arith.constant 0 : index
    %24 = vector.load %arg9[%c3, %c0_24] : memref<32x32xf32, #tpu.memory_space<vmem>>, vector<28x32xf32>
    %25 = arith.truncf %24 : vector<28x32xf32> to vector<28x32xbf16>
    %c3_25 = arith.constant 3 : index
    %c0_26 = arith.constant 0 : index
    %c0_27 = arith.constant 0 : index
    %26 = vector.load %arg2[%c3_25, %c0_26, %c0_27] : memref<5x32x512xbf16, #tpu.memory_space<vmem>>, vector<1x32x512xbf16>
    %27 = vector.shape_cast %26 : vector<1x32x512xbf16> to vector<32x512xbf16>
    %cst_28 = arith.constant dense<0.000000e+00> : vector<28x512xf32>
    %28 = tpu.matmul %25, %27, %cst_28 {dimension_numbers = #tpu.dot_dimension_numbers<[1], [0], [0], [1], [0, 0, 1, 1], [], []>} : vector<28x32xbf16>, vector<32x512xbf16>, vector<28x512xf32> -> vector<28x512xf32>
    %29 = arith.addf %23, %28 : vector<28x512xf32>
    %c4 = arith.constant 4 : index
    %c0_29 = arith.constant 0 : index
    %30 = vector.load %arg9[%c4, %c0_29] : memref<32x32xf32, #tpu.memory_space<vmem>>, vector<28x32xf32>
    %31 = arith.truncf %30 : vector<28x32xf32> to vector<28x32xbf16>
    %c4_30 = arith.constant 4 : index
    %c0_31 = arith.constant 0 : index
    %c0_32 = arith.constant 0 : index
    %32 = vector.load %arg2[%c4_30, %c0_31, %c0_32] : memref<5x32x512xbf16, #tpu.memory_space<vmem>>, vector<1x32x512xbf16>
    %33 = vector.shape_cast %32 : vector<1x32x512xbf16> to vector<32x512xbf16>
    %cst_33 = arith.constant dense<0.000000e+00> : vector<28x512xf32>
    %34 = tpu.matmul %31, %33, %cst_33 {dimension_numbers = #tpu.dot_dimension_numbers<[1], [0], [0], [1], [0, 0, 1, 1], [], []>} : vector<28x32xbf16>, vector<32x512xbf16>, vector<28x512xf32> -> vector<28x512xf32>
    %35 = arith.addf %29, %34 : vector<28x512xf32>
    %c0_34 = arith.constant 0 : index
    %c0_35 = arith.constant 0 : index
    %36 = vector.load %arg3[%c0_34, %c0_35] : memref<1x512xf32, #tpu.memory_space<vmem>>, vector<1x512xf32>
    %37 = vector.broadcast %36 : vector<1x512xf32> to vector<28x512xf32>
    %38 = arith.addf %35, %37 : vector<28x512xf32>
    %cst_36 = arith.constant 0.000000e+00 : f32
    %39 = vector.broadcast %cst_36 : f32 to vector<28x512xf32>
    %40 = arith.maximumf %38, %39 : vector<28x512xf32>
    %41 = vector.extract_strided_slice %40 {offsets = [0, 0], sizes = [28, 256], strides = [1, 1]} : vector<28x512xf32> to vector<28x256xf32>
    %42 = vector.extract_strided_slice %40 {offsets = [0, 256], sizes = [28, 256], strides = [1, 1]} : vector<28x512xf32> to vector<28x256xf32>
    %43 = arith.maximumf %41, %42 : vector<28x256xf32>
    %44 = tpu.iota {dimensions = array<i32: 0>} : vector<14x28xi32>
    %45 = tpu.iota {dimensions = array<i32: 1>} : vector<14x28xi32>
    %c2_i32 = arith.constant 2 : i32
    %46 = vector.broadcast %c2_i32 : i32 to vector<14x28xi32>
    %47 = arith.muli %46, %44 : vector<14x28xi32>
    %48 = arith.cmpi eq, %45, %47 : vector<14x28xi32>
    %49 = arith.extui %48 : vector<14x28xi1> to vector<14x28xi32>
    %50 = arith.sitofp %49 : vector<14x28xi32> to vector<14x28xf32>
    %c2_i32_37 = arith.constant 2 : i32
    %51 = vector.broadcast %c2_i32_37 : i32 to vector<14x28xi32>
    %52 = arith.muli %51, %44 : vector<14x28xi32>
    %c1_i32 = arith.constant 1 : i32
    %53 = vector.broadcast %c1_i32 : i32 to vector<14x28xi32>
    %54 = arith.addi %52, %53 : vector<14x28xi32>
    %55 = arith.cmpi eq, %45, %54 : vector<14x28xi32>
    %56 = arith.extui %55 : vector<14x28xi1> to vector<14x28xi32>
    %57 = arith.sitofp %56 : vector<14x28xi32> to vector<14x28xf32>
    %cst_38 = arith.constant dense<0.000000e+00> : vector<14x256xf32>
    %58 = tpu.matmul %50, %43, %cst_38 {dimension_numbers = #tpu.dot_dimension_numbers<[1], [0], [0], [1], [0, 0, 1, 1], [], []>} : vector<14x28xf32>, vector<28x256xf32>, vector<14x256xf32> -> vector<14x256xf32>
    %cst_39 = arith.constant dense<0.000000e+00> : vector<14x256xf32>
    %59 = tpu.matmul %57, %43, %cst_39 {dimension_numbers = #tpu.dot_dimension_numbers<[1], [0], [0], [1], [0, 0, 1, 1], [], []>} : vector<14x28xf32>, vector<28x256xf32>, vector<14x256xf32> -> vector<14x256xf32>
    %60 = arith.maximumf %58, %59 : vector<14x256xf32>
    %cst_40 = arith.constant 0.000000e+00 : f32
    %61 = vector.broadcast %cst_40 : f32 to vector<18x288xf32>
    %c0_41 = arith.constant 0 : index
    %c0_42 = arith.constant 0 : index
    %62 = vector.load %arg10[%c0_41, %c0_42] : memref<18x288xf32, #tpu.memory_space<vmem>>, vector<18x288xf32>
    tpu.vector_store %arg10[%c0_41, %c0_42], %61 {strides = array<i32>} : memref<18x288xf32, #tpu.memory_space<vmem>>, vector<18x288xf32>,
    %c2_43 = arith.constant 2 : index
    %c32 = arith.constant 32 : index
    %63 = vector.load %arg10[%c2_43, %c32] : memref<18x288xf32, #tpu.memory_space<vmem>>, vector<14x256xf32>
    tpu.vector_store %arg10[%c2_43, %c32], %60 {strides = array<i32>} : memref<18x288xf32, #tpu.memory_space<vmem>>, vector<14x256xf32>,
    %cst_44 = arith.constant 0.000000e+00 : f32
    %64 = vector.broadcast %cst_44 : f32 to vector<14x512xf32>
    %c0_45 = arith.constant 0 : index
    %c0_46 = arith.constant 0 : index
    %65 = vector.load %arg10[%c0_45, %c0_46] : memref<18x288xf32, #tpu.memory_space<vmem>>, vector<14x288xf32>
    %66 = arith.truncf %65 : vector<14x288xf32> to vector<14x288xbf16>
    %c0_47 = arith.constant 0 : index
    %c0_48 = arith.constant 0 : index
    %c0_49 = arith.constant 0 : index
    %67 = vector.load %arg4[%c0_47, %c0_48, %c0_49] : memref<5x288x512xbf16, #tpu.memory_space<vmem>>, vector<1x288x512xbf16>
    %68 = vector.shape_cast %67 : vector<1x288x512xbf16> to vector<288x512xbf16>
    %cst_50 = arith.constant dense<0.000000e+00> : vector<14x512xf32>
    %69 = tpu.matmul %66, %68, %cst_50 {dimension_numbers = #tpu.dot_dimension_numbers<[1], [0], [0], [1], [0, 0, 1, 1], [], []>} : vector<14x288xbf16>, vector<288x512xbf16>, vector<14x512xf32> -> vector<14x512xf32>
    %70 = arith.addf %64, %69 : vector<14x512xf32>
    %c1_51 = arith.constant 1 : index
    %c0_52 = arith.constant 0 : index
    %71 = vector.load %arg10[%c1_51, %c0_52] : memref<18x288xf32, #tpu.memory_space<vmem>>, vector<14x288xf32>
    %72 = arith.truncf %71 : vector<14x288xf32> to vector<14x288xbf16>
    %c1_53 = arith.constant 1 : index
    %c0_54 = arith.constant 0 : index
    %c0_55 = arith.constant 0 : index
    %73 = vector.load %arg4[%c1_53, %c0_54, %c0_55] : memref<5x288x512xbf16, #tpu.memory_space<vmem>>, vector<1x288x512xbf16>
    %74 = vector.shape_cast %73 : vector<1x288x512xbf16> to vector<288x512xbf16>
    %cst_56 = arith.constant dense<0.000000e+00> : vector<14x512xf32>
    %75 = tpu.matmul %72, %74, %cst_56 {dimension_numbers = #tpu.dot_dimension_numbers<[1], [0], [0], [1], [0, 0, 1, 1], [], []>} : vector<14x288xbf16>, vector<288x512xbf16>, vector<14x512xf32> -> vector<14x512xf32>
    %76 = arith.addf %70, %75 : vector<14x512xf32>
    %c2_57 = arith.constant 2 : index
    %c0_58 = arith.constant 0 : index
    %77 = vector.load %arg10[%c2_57, %c0_58] : memref<18x288xf32, #tpu.memory_space<vmem>>, vector<14x288xf32>
    %78 = arith.truncf %77 : vector<14x288xf32> to vector<14x288xbf16>
    %c2_59 = arith.constant 2 : index
    %c0_60 = arith.constant 0 : index
    %c0_61 = arith.constant 0 : index
    %79 = vector.load %arg4[%c2_59, %c0_60, %c0_61] : memref<5x288x512xbf16, #tpu.memory_space<vmem>>, vector<1x288x512xbf16>
    %80 = vector.shape_cast %79 : vector<1x288x512xbf16> to vector<288x512xbf16>
    %cst_62 = arith.constant dense<0.000000e+00> : vector<14x512xf32>
    %81 = tpu.matmul %78, %80, %cst_62 {dimension_numbers = #tpu.dot_dimension_numbers<[1], [0], [0], [1], [0, 0, 1, 1], [], []>} : vector<14x288xbf16>, vector<288x512xbf16>, vector<14x512xf32> -> vector<14x512xf32>
    %82 = arith.addf %76, %81 : vector<14x512xf32>
    %c3_63 = arith.constant 3 : index
    %c0_64 = arith.constant 0 : index
    %83 = vector.load %arg10[%c3_63, %c0_64] : memref<18x288xf32, #tpu.memory_space<vmem>>, vector<14x288xf32>
    %84 = arith.truncf %83 : vector<14x288xf32> to vector<14x288xbf16>
    %c3_65 = arith.constant 3 : index
    %c0_66 = arith.constant 0 : index
    %c0_67 = arith.constant 0 : index
    %85 = vector.load %arg4[%c3_65, %c0_66, %c0_67] : memref<5x288x512xbf16, #tpu.memory_space<vmem>>, vector<1x288x512xbf16>
    %86 = vector.shape_cast %85 : vector<1x288x512xbf16> to vector<288x512xbf16>
    %cst_68 = arith.constant dense<0.000000e+00> : vector<14x512xf32>
    %87 = tpu.matmul %84, %86, %cst_68 {dimension_numbers = #tpu.dot_dimension_numbers<[1], [0], [0], [1], [0, 0, 1, 1], [], []>} : vector<14x288xbf16>, vector<288x512xbf16>, vector<14x512xf32> -> vector<14x512xf32>
    %88 = arith.addf %82, %87 : vector<14x512xf32>
    %c4_69 = arith.constant 4 : index
    %c0_70 = arith.constant 0 : index
    %89 = vector.load %arg10[%c4_69, %c0_70] : memref<18x288xf32, #tpu.memory_space<vmem>>, vector<14x288xf32>
    %90 = arith.truncf %89 : vector<14x288xf32> to vector<14x288xbf16>
    %c4_71 = arith.constant 4 : index
    %c0_72 = arith.constant 0 : index
    %c0_73 = arith.constant 0 : index
    %91 = vector.load %arg4[%c4_71, %c0_72, %c0_73] : memref<5x288x512xbf16, #tpu.memory_space<vmem>>, vector<1x288x512xbf16>
    %92 = vector.shape_cast %91 : vector<1x288x512xbf16> to vector<288x512xbf16>
    %cst_74 = arith.constant dense<0.000000e+00> : vector<14x512xf32>
    %93 = tpu.matmul %90, %92, %cst_74 {dimension_numbers = #tpu.dot_dimension_numbers<[1], [0], [0], [1], [0, 0, 1, 1], [], []>} : vector<14x288xbf16>, vector<288x512xbf16>, vector<14x512xf32> -> vector<14x512xf32>
    %94 = arith.addf %88, %93 : vector<14x512xf32>
    %c0_75 = arith.constant 0 : index
    %c0_76 = arith.constant 0 : index
    %95 = vector.load %arg5[%c0_75, %c0_76] : memref<1x512xf32, #tpu.memory_space<vmem>>, vector<1x512xf32>
    %96 = vector.broadcast %95 : vector<1x512xf32> to vector<14x512xf32>
    %97 = arith.addf %94, %96 : vector<14x512xf32>
    %cst_77 = arith.constant 0.000000e+00 : f32
    %98 = vector.broadcast %cst_77 : f32 to vector<14x512xf32>
    %99 = arith.maximumf %97, %98 : vector<14x512xf32>
    %100 = vector.extract_strided_slice %99 {offsets = [0, 0], sizes = [14, 256], strides = [1, 1]} : vector<14x512xf32> to vector<14x256xf32>
    %101 = vector.extract_strided_slice %99 {offsets = [0, 256], sizes = [14, 256], strides = [1, 1]} : vector<14x512xf32> to vector<14x256xf32>
    %102 = arith.maximumf %100, %101 : vector<14x256xf32>
    %103 = tpu.iota {dimensions = array<i32: 0>} : vector<7x14xi32>
    %104 = tpu.iota {dimensions = array<i32: 1>} : vector<7x14xi32>
    %c2_i32_78 = arith.constant 2 : i32
    %105 = vector.broadcast %c2_i32_78 : i32 to vector<7x14xi32>
    %106 = arith.muli %105, %103 : vector<7x14xi32>
    %107 = arith.cmpi eq, %104, %106 : vector<7x14xi32>
    %108 = arith.extui %107 : vector<7x14xi1> to vector<7x14xi32>
    %109 = arith.sitofp %108 : vector<7x14xi32> to vector<7x14xf32>
    %c2_i32_79 = arith.constant 2 : i32
    %110 = vector.broadcast %c2_i32_79 : i32 to vector<7x14xi32>
    %111 = arith.muli %110, %103 : vector<7x14xi32>
    %c1_i32_80 = arith.constant 1 : i32
    %112 = vector.broadcast %c1_i32_80 : i32 to vector<7x14xi32>
    %113 = arith.addi %111, %112 : vector<7x14xi32>
    %114 = arith.cmpi eq, %104, %113 : vector<7x14xi32>
    %115 = arith.extui %114 : vector<7x14xi1> to vector<7x14xi32>
    %116 = arith.sitofp %115 : vector<7x14xi32> to vector<7x14xf32>
    %cst_81 = arith.constant dense<0.000000e+00> : vector<7x256xf32>
    %117 = tpu.matmul %109, %102, %cst_81 {dimension_numbers = #tpu.dot_dimension_numbers<[1], [0], [0], [1], [0, 0, 1, 1], [], []>} : vector<7x14xf32>, vector<14x256xf32>, vector<7x256xf32> -> vector<7x256xf32>
    %cst_82 = arith.constant dense<0.000000e+00> : vector<7x256xf32>
    %118 = tpu.matmul %116, %102, %cst_82 {dimension_numbers = #tpu.dot_dimension_numbers<[1], [0], [0], [1], [0, 0, 1, 1], [], []>} : vector<7x14xf32>, vector<14x256xf32>, vector<7x256xf32> -> vector<7x256xf32>
    %119 = arith.maximumf %117, %118 : vector<7x256xf32>
    %cst_83 = arith.constant 0.000000e+00 : f32
    %120 = vector.broadcast %cst_83 : f32 to vector<1x10xf32>
    %121 = vector.extract_strided_slice %119 {offsets = [0, 0], sizes = [1, 256], strides = [1, 1]} : vector<7x256xf32> to vector<1x256xf32>
    %122 = arith.truncf %121 : vector<1x256xf32> to vector<1x256xbf16>
    %c0_84 = arith.constant 0 : index
    %c0_85 = arith.constant 0 : index
    %c0_86 = arith.constant 0 : index
    %123 = vector.load %arg6[%c0_84, %c0_85, %c0_86] : memref<7x256x10xbf16, #tpu.memory_space<vmem>>, vector<1x256x10xbf16>
    %124 = vector.shape_cast %123 : vector<1x256x10xbf16> to vector<256x10xbf16>
    %cst_87 = arith.constant dense<0.000000e+00> : vector<1x10xf32>
    %125 = tpu.matmul %122, %124, %cst_87 {dimension_numbers = #tpu.dot_dimension_numbers<[1], [0], [0], [1], [0, 0, 1, 1], [], []>} : vector<1x256xbf16>, vector<256x10xbf16>, vector<1x10xf32> -> vector<1x10xf32>
    %126 = arith.addf %120, %125 : vector<1x10xf32>
    %127 = vector.extract_strided_slice %119 {offsets = [1, 0], sizes = [1, 256], strides = [1, 1]} : vector<7x256xf32> to vector<1x256xf32>
    %128 = arith.truncf %127 : vector<1x256xf32> to vector<1x256xbf16>
    %c1_88 = arith.constant 1 : index
    %c0_89 = arith.constant 0 : index
    %c0_90 = arith.constant 0 : index
    %129 = vector.load %arg6[%c1_88, %c0_89, %c0_90] : memref<7x256x10xbf16, #tpu.memory_space<vmem>>, vector<1x256x10xbf16>
    %130 = vector.shape_cast %129 : vector<1x256x10xbf16> to vector<256x10xbf16>
    %cst_91 = arith.constant dense<0.000000e+00> : vector<1x10xf32>
    %131 = tpu.matmul %128, %130, %cst_91 {dimension_numbers = #tpu.dot_dimension_numbers<[1], [0], [0], [1], [0, 0, 1, 1], [], []>} : vector<1x256xbf16>, vector<256x10xbf16>, vector<1x10xf32> -> vector<1x10xf32>
    %132 = arith.addf %126, %131 : vector<1x10xf32>
    %133 = vector.extract_strided_slice %119 {offsets = [2, 0], sizes = [1, 256], strides = [1, 1]} : vector<7x256xf32> to vector<1x256xf32>
    %134 = arith.truncf %133 : vector<1x256xf32> to vector<1x256xbf16>
    %c2_92 = arith.constant 2 : index
    %c0_93 = arith.constant 0 : index
    %c0_94 = arith.constant 0 : index
    %135 = vector.load %arg6[%c2_92, %c0_93, %c0_94] : memref<7x256x10xbf16, #tpu.memory_space<vmem>>, vector<1x256x10xbf16>
    %136 = vector.shape_cast %135 : vector<1x256x10xbf16> to vector<256x10xbf16>
    %cst_95 = arith.constant dense<0.000000e+00> : vector<1x10xf32>
    %137 = tpu.matmul %134, %136, %cst_95 {dimension_numbers = #tpu.dot_dimension_numbers<[1], [0], [0], [1], [0, 0, 1, 1], [], []>} : vector<1x256xbf16>, vector<256x10xbf16>, vector<1x10xf32> -> vector<1x10xf32>
    %138 = arith.addf %132, %137 : vector<1x10xf32>
    %139 = vector.extract_strided_slice %119 {offsets = [3, 0], sizes = [1, 256], strides = [1, 1]} : vector<7x256xf32> to vector<1x256xf32>
    %140 = arith.truncf %139 : vector<1x256xf32> to vector<1x256xbf16>
    %c3_96 = arith.constant 3 : index
    %c0_97 = arith.constant 0 : index
    %c0_98 = arith.constant 0 : index
    %141 = vector.load %arg6[%c3_96, %c0_97, %c0_98] : memref<7x256x10xbf16, #tpu.memory_space<vmem>>, vector<1x256x10xbf16>
    %142 = vector.shape_cast %141 : vector<1x256x10xbf16> to vector<256x10xbf16>
    %cst_99 = arith.constant dense<0.000000e+00> : vector<1x10xf32>
    %143 = tpu.matmul %140, %142, %cst_99 {dimension_numbers = #tpu.dot_dimension_numbers<[1], [0], [0], [1], [0, 0, 1, 1], [], []>} : vector<1x256xbf16>, vector<256x10xbf16>, vector<1x10xf32> -> vector<1x10xf32>
    %144 = arith.addf %138, %143 : vector<1x10xf32>
    %145 = vector.extract_strided_slice %119 {offsets = [4, 0], sizes = [1, 256], strides = [1, 1]} : vector<7x256xf32> to vector<1x256xf32>
    %146 = arith.truncf %145 : vector<1x256xf32> to vector<1x256xbf16>
    %c4_100 = arith.constant 4 : index
    %c0_101 = arith.constant 0 : index
    %c0_102 = arith.constant 0 : index
    %147 = vector.load %arg6[%c4_100, %c0_101, %c0_102] : memref<7x256x10xbf16, #tpu.memory_space<vmem>>, vector<1x256x10xbf16>
    %148 = vector.shape_cast %147 : vector<1x256x10xbf16> to vector<256x10xbf16>
    %cst_103 = arith.constant dense<0.000000e+00> : vector<1x10xf32>
    %149 = tpu.matmul %146, %148, %cst_103 {dimension_numbers = #tpu.dot_dimension_numbers<[1], [0], [0], [1], [0, 0, 1, 1], [], []>} : vector<1x256xbf16>, vector<256x10xbf16>, vector<1x10xf32> -> vector<1x10xf32>
    %150 = arith.addf %144, %149 : vector<1x10xf32>
    %151 = vector.extract_strided_slice %119 {offsets = [5, 0], sizes = [1, 256], strides = [1, 1]} : vector<7x256xf32> to vector<1x256xf32>
    %152 = arith.truncf %151 : vector<1x256xf32> to vector<1x256xbf16>
    %c5 = arith.constant 5 : index
    %c0_104 = arith.constant 0 : index
    %c0_105 = arith.constant 0 : index
    %153 = vector.load %arg6[%c5, %c0_104, %c0_105] : memref<7x256x10xbf16, #tpu.memory_space<vmem>>, vector<1x256x10xbf16>
    %154 = vector.shape_cast %153 : vector<1x256x10xbf16> to vector<256x10xbf16>
    %cst_106 = arith.constant dense<0.000000e+00> : vector<1x10xf32>
    %155 = tpu.matmul %152, %154, %cst_106 {dimension_numbers = #tpu.dot_dimension_numbers<[1], [0], [0], [1], [0, 0, 1, 1], [], []>} : vector<1x256xbf16>, vector<256x10xbf16>, vector<1x10xf32> -> vector<1x10xf32>
    %156 = arith.addf %150, %155 : vector<1x10xf32>
    %157 = vector.extract_strided_slice %119 {offsets = [6, 0], sizes = [1, 256], strides = [1, 1]} : vector<7x256xf32> to vector<1x256xf32>
    %158 = arith.truncf %157 : vector<1x256xf32> to vector<1x256xbf16>
    %c6 = arith.constant 6 : index
    %c0_107 = arith.constant 0 : index
    %c0_108 = arith.constant 0 : index
    %159 = vector.load %arg6[%c6, %c0_107, %c0_108] : memref<7x256x10xbf16, #tpu.memory_space<vmem>>, vector<1x256x10xbf16>
    %160 = vector.shape_cast %159 : vector<1x256x10xbf16> to vector<256x10xbf16>
    %cst_109 = arith.constant dense<0.000000e+00> : vector<1x10xf32>
    %161 = tpu.matmul %158, %160, %cst_109 {dimension_numbers = #tpu.dot_dimension_numbers<[1], [0], [0], [1], [0, 0, 1, 1], [], []>} : vector<1x256xbf16>, vector<256x10xbf16>, vector<1x10xf32> -> vector<1x10xf32>
    %162 = arith.addf %156, %161 : vector<1x10xf32>
    %c0_110 = arith.constant 0 : index
    %c0_111 = arith.constant 0 : index
    %163 = vector.load %arg7[%c0_110, %c0_111] : memref<1x10xf32, #tpu.memory_space<vmem>>, vector<1x10xf32>
    %164 = arith.addf %162, %163 : vector<1x10xf32>
    %c0_112 = arith.constant 0 : index
    %c0_113 = arith.constant 0 : index
    %c0_114 = arith.constant 0 : index
    %165 = vector.load %arg8[%c0_112, %c0_113, %c0_114] : memref<1x1x10xf32, #tpu.memory_space<vmem>>, vector<1x1x10xf32>
    %166 = vector.shape_cast %165 : vector<1x1x10xf32> to vector<1x10xf32>
    %167 = vector.shape_cast %164 : vector<1x10xf32> to vector<1x1x10xf32>
    tpu.vector_store %arg8[%c0_112, %c0_113, %c0_114], %167 {strides = array<i32>} : memref<1x1x10xf32, #tpu.memory_space<vmem>>, vector<1x1x10xf32>,
    return
  }
  func.func @transform_0(%arg0: i32) -> (i32, i32, i32, i32) {
    %c0_i32 = arith.constant 0 : i32
    %c0_i32_0 = arith.constant 0 : i32
    %c0_i32_1 = arith.constant 0 : i32
    %c0_i32_2 = arith.constant 0 : i32
    return %arg0, %c0_i32, %c0_i32_0, %c0_i32_1 : i32, i32, i32, i32
  }
  func.func @transform_1(%arg0: i32) -> (i32, i32, i32) {
    %c0_i32 = arith.constant 0 : i32
    %c0_i32_0 = arith.constant 0 : i32
    %c0_i32_1 = arith.constant 0 : i32
    %c0_i32_2 = arith.constant 0 : i32
    return %c0_i32, %c0_i32_0, %c0_i32_1 : i32, i32, i32
  }
  func.func @transform_2(%arg0: i32) -> (i32, i32) {
    %c0_i32 = arith.constant 0 : i32
    %c0_i32_0 = arith.constant 0 : i32
    %c0_i32_1 = arith.constant 0 : i32
    return %c0_i32, %c0_i32_0 : i32, i32
  }
  func.func @transform_3(%arg0: i32) -> (i32, i32, i32) {
    %c0_i32 = arith.constant 0 : i32
    %c0_i32_0 = arith.constant 0 : i32
    %c0_i32_1 = arith.constant 0 : i32
    %c0_i32_2 = arith.constant 0 : i32
    return %c0_i32, %c0_i32_0, %c0_i32_1 : i32, i32, i32
  }
  func.func @transform_4(%arg0: i32) -> (i32, i32) {
    %c0_i32 = arith.constant 0 : i32
    %c0_i32_0 = arith.constant 0 : i32
    %c0_i32_1 = arith.constant 0 : i32
    return %c0_i32, %c0_i32_0 : i32, i32
  }
  func.func @transform_5(%arg0: i32) -> (i32, i32, i32) {
    %c0_i32 = arith.constant 0 : i32
    %c0_i32_0 = arith.constant 0 : i32
    %c0_i32_1 = arith.constant 0 : i32
    %c0_i32_2 = arith.constant 0 : i32
    return %c0_i32, %c0_i32_0, %c0_i32_1 : i32, i32, i32
  }
  func.func @transform_6(%arg0: i32) -> (i32, i32) {
    %c0_i32 = arith.constant 0 : i32
    %c0_i32_0 = arith.constant 0 : i32
    %c0_i32_1 = arith.constant 0 : i32
    return %c0_i32, %c0_i32_0 : i32, i32
  }
  func.func @transform_7(%arg0: i32) -> (i32, i32, i32) {
    %c0_i32 = arith.constant 0 : i32
    %c0_i32_0 = arith.constant 0 : i32
    %c0_i32_1 = arith.constant 0 : i32
    return %arg0, %c0_i32, %c0_i32_0 : i32, i32, i32
  }
}

</mosaic_0001>

<bundles_post_ra>
// kernel: cnn_forward.1
= control target key start
LH: loop header
LB: loop body
LE: loop exit
PB: predicated region body
PF: predicated region fallthrough
CT: control target
= control target key end

     0   :  { %s9233_s0 = inlined_call_operand.vmem [shape: f32[2,1,28,28], index: 0, kind: input, shape index: {}]   ;;  %s9234_s1 = inlined_call_operand.hbm [shape: bf16[5,32,512], index: 1, kind: input, shape index: {}]   ;;  %s9235_s2 = inlined_call_operand.hbm [shape: f32[1,512], index: 2, kind: input, shape index: {}]   ;;  %s9236_s3 = inlined_call_operand.hbm [shape: bf16[5,288,512], index: 3, kind: input, shape index: {}]   ;;  %s9237_s4 = inlined_call_operand.hbm [shape: f32[1,512], index: 4, kind: input, shape index: {}]   ;;  %s9238_s5 = inlined_call_operand.vmem [shape: bf16[7,256,10], index: 5, kind: input, shape index: {}]   ;;  %s9239_s6 = inlined_call_operand.hbm [shape: f32[1,10], index: 6, kind: input, shape index: {}]   ;;  %s9240_s7 = inlined_call_operand.hbm [shape: f32[2,1,10], index: 7, kind: output, shape index: {}]  }
   0x1   :  { %9247 = sst [smem:[#allocation21_spill]] %s9235_s2 }
   0x2   :  { %9248 = sst [smem:[#allocation22_spill]] %s9237_s4 }
   0x3   :  { %12 = vsyncpa [#allocation5], 0 }
   0x4   :  { %13 = vsyncpa [#allocation8], 0 }
   0x5   :  { %14 = vsyncpa [#allocation11], 0 }
   0x6   :  { %15 = vsyncpa [#allocation6], 0 }
   0x7   :  { %17 = vsyncpa [#allocation6 + $0x1], 0  ;;  %s8485_s24 = smov 0   ;;  %s8487_s25 = smov 0  }
   0x8   :  { %s8489_s26 = smov 0   ;;  %s8491_s27 = smov 0  }
   0x9 LB: > { %9249 = sst [smem:[#allocation18_spill]] %s8426_s26  ;;  %s8506_s28 = sadd.s32 4294967295, %s8430_s27   ;;  %s8430_s27 = sphi %s8491_s27, %s9268_s27   ;;  %s8426_s26 = sphi %s8489_s26, %s9270_s26   ;;  %s8422_s25 = sphi %s8487_s25, %s9272_s25   ;;  %s8418_s24 = sphi %s8485_s24, %s9271_s24  }
   0xa   : > { %s6311_s29 = sadd.s32 4294967294, %s8430_s27   ;;  %s8510_s30 = sadd.s32 1, %s8430_s27  }
   0xb   : > { %9250 = sst [smem:[#allocation19_spill]] %s8510_s30  ;;  %s182_s8 = sadd.s32 1, %s8426_s26 }
   0xc   : > { %s179_s9 = ssub.s32 %s8430_s27, %s8510_s30  ;;  %p192_p0 = scmp.ne.s32.totalorder %s8426_s26, %s8422_s25 }
   0xd   : > { %p180_p1 = scmp.eq.s32.totalorder %s179_s9, 0  ;;  %p193_p2 = scmp.eq.s32.totalorder %s8506_s28, 1 }
   0xe   : > { %p198_p3 = scmp.ne.s32.totalorder %s8422_s25, %s8418_s24  ;;  %p199_p4 = scmp.eq.s32.totalorder %s6311_s29, 1 }
   0xf   : > { %s8521_s10 = scalar_select %p180_p1, %s8426_s26, %s182_s8  }
  0x10   : > { %p8523_p5 = por %p193_p2, %p192_p0  ;;  %p8527_p6 = por %p199_p4, %p198_p3 }
  0x11   : > { %9251 = sst [smem:[#allocation20_spill]] %s8521_s10  ;;  %p6312_p7 = scmp.ge.s32.totalorder %s8430_s27, 1 }
  0x12   : > { %s9252_s11 = scalar_select %p8523_p5, 1, 0 }
  0x13   : > { %s9253_s12 = scalar_select %p8527_p6, 1, 0 }
  0x14   : > { %p206_p8 = scmp.lt.s32.totalorder %s8430_s27, 3  ;;  %p9241_p9 = scmp.eq.s32.totalorder %s8506_s28, 0 }
  0x15   : > { %s8432_s14 = smov [#allocation7]   ;;  %s8433_s16 = smov [#allocation10]  }
  0x16   : > { %p8534_p10 = pnand %p6312_p7, %p206_p8  ;;  %s232_s15 = sshll.u32 %s8432_s14, 4  ;;  %s233_s15 = int_to_ptr.vmem [resolvable:$true] %s232_s15 }
  0x17   : > { %s256_s17 = sshll.u32 %s8433_s16, 4  ;;  %s8434_s19 = smov [#allocation4]   ;;  %s8546_s17 = int_to_ptr.vmem [resolvable:$true] %s256_s17 }
  0x18   : > { %s9254_s13 = scalar_select %p8534_p10, 1, 0 }
  0x19   : > { %p7427_p11 = pneg %p8534_p10  ;;  %s218_s20 = sshll.u32 %s8434_s19, 4  ;;  %s8548_s20 = int_to_ptr.vmem [resolvable:$true] %s218_s20 }
  0x1a   : > { %s9256_s2 = sld [smem:[#allocation21_spill]] }
  0x1b   : > { %p8542_p12 = pnand %p9241_p9, %p7427_p11 }
  0x1d   : > { %p8558_p0 = pneg %p8542_p12 }
  0x20   : > { %s8216_s23 = scalar_lea.hbm %s9256_s2, 64 }
  0x21   : > { %p8217_p13 = scmp.ne.s32.totalorder %s9256_s2, %s8216_s23  ;;  %p8223_p3 = scmp.lt.u32.totalorder %s8216_s23, %s9256_s2 }
  0x23   : > { %p8219_p1 = pnand %p8558_p0, %p8217_p13 }
  0x25   : > { %p8220_p2 = pneg %p8219_p1 }
  0x27   : > { %p8225_p4 = pnand %p8223_p3, %p8220_p2 }
  0x29   : > { %8228 = shalt.err (!%p8225_p4)
}
  0x2a   : > { %s8229_s19 = scalar_lea.vmem %s233_s15, 64  ;;  %p8237_p9 = scmp.lt.s32.totalorder %s233_s15, %s233_s15 }
  0x2b   : > { %p8230_p7 = scmp.ne.s32.totalorder %s233_s15, %s8229_s19  ;;  %p8238_p6 = scmp.lt.s32.totalorder %s8229_s19, %s8229_s19 }
  0x2d   : > { %p8232_p8 = pnand %p8230_p7, %p8558_p0  ;;  %p8239_p5 = por %p8238_p6, %p8237_p9 }
  0x2f   : > { %p8233_p11 = pneg %p8232_p8 }
  0x31   : > { %p8240_p10 = pnand %p8239_p5, %p8233_p11 }
  0x33   : > { %8243 = shalt.err (!%p8240_p10)
}
  0x34   : > { %7433 = dma.hbm_to_vmem [thread:$0]  (!%p8542_p12), %s9256_s2, 64, %s233_s15, [#allocation8]  }
  0x35   : > { %s9258_s4 = sld [smem:[#allocation22_spill]] }
  0x3b   : > { %s8244_s8 = scalar_lea.hbm %s9258_s4, 64 }
  0x3c   : > { %p8245_p13 = scmp.ne.s32.totalorder %s9258_s4, %s8244_s8  ;;  %p8251_p5 = scmp.lt.u32.totalorder %s8244_s8, %s9258_s4 }
  0x3e   : > { %p8247_p1 = pnand %p8245_p13, %p8558_p0 }
  0x40   : > { %p8248_p6 = pneg %p8247_p1 }
  0x42   : > { %p8253_p9 = pnand %p8251_p5, %p8248_p6 }
  0x44   : > { %8256 = shalt.err (!%p8253_p9)
}
  0x45   : > { %s8257_s15 = scalar_lea.vmem %s8546_s17, 64  ;;  %p8265_p4 = scmp.lt.s32.totalorder %s8546_s17, %s8546_s17 }
  0x46   : > { %p8258_p10 = scmp.ne.s32.totalorder %s8546_s17, %s8257_s15  ;;  %p8266_p7 = scmp.lt.s32.totalorder %s8257_s15, %s8257_s15 }
  0x48   : > { %p8260_p2 = pnand %p8258_p10, %p8558_p0  ;;  %p8267_p8 = por %p8266_p7, %p8265_p4 }
  0x4a   : > { %p8261_p3 = pneg %p8260_p2 }
  0x4c   : > { %p8268_p11 = pnand %p8267_p8, %p8261_p3 }
  0x4e   : > { %8271 = shalt.err (!%p8268_p11)
}
  0x4f   : > { %7439 = dma.hbm_to_vmem [thread:$0]  (!%p8542_p12), %s9258_s4, 64, %s8546_s17, [#allocation11]  }
  0x50   : > { %s8272_s29 = scalar_lea.hbm %s9234_s1, 5120 }
  0x51   : > { %p8273_p13 = scmp.ne.s32.totalorder %s9234_s1, %s8272_s29  ;;  %p8279_p5 = scmp.lt.u32.totalorder %s8272_s29, %s9234_s1 }
  0x53   : > { %p8275_p1 = pnand %p8273_p13, %p8558_p0 }
  0x55   : > { %p8276_p6 = pneg %p8275_p1 }
  0x57   : > { %p8281_p9 = pnand %p8279_p5, %p8276_p6 }
  0x59   : > { %8284 = shalt.err (!%p8281_p9)
}
  0x5a   : > { %s8285_s17 = scalar_lea.vmem %s8548_s20, 5120  ;;  %p8293_p4 = scmp.lt.s32.totalorder %s8548_s20, %s8548_s20 }
  0x5b   : > { %p8286_p10 = scmp.ne.s32.totalorder %s8548_s20, %s8285_s17  ;;  %p8294_p7 = scmp.lt.s32.totalorder %s8285_s17, %s8285_s17 }
  0x5d   : > { %p8288_p2 = pnand %p8286_p10, %p8558_p0  ;;  %p8295_p8 = por %p8294_p7, %p8293_p4 }
  0x5f   : > { %p8289_p3 = pneg %p8288_p2 }
  0x61   : > { %p8296_p11 = pnand %p8295_p8, %p8289_p3 }
  0x63   : > { %8299 = shalt.err (!%p8296_p11)
}
  0x64   : > { %s8435_s15 = smov 256   ;;  %s8436_s10 = smov 16  }
  0x65   : > { %7430 = dma.hbm_to_vmem [thread:$0]  (!%p8542_p12), %s9234_s1, 5120, %s8548_s20, [#allocation5], %s8435_s15, %s8435_s15, %s8436_s10  }
  0x66   : > { %s8437_s23 = smov [#allocation9]   ;;  %s8438_s8 = smov [#allocation12]  }
  0x67   : > { %s242_s29 = sshll.u32 %s8437_s23, 4  ;;  %s270_s14 = sshll.u32 %s8438_s8, 4  ;;  %s243_s29 = int_to_ptr.vmem [resolvable:$true] %s242_s29  ;;  %s271_s14 = int_to_ptr.vmem [resolvable:$true] %s270_s14 }
  0x68   : > { %s8300_s17 = scalar_lea.hbm %s9236_s3, 46080 }
  0x69   : > { %p8301_p13 = scmp.ne.s32.totalorder %s9236_s3, %s8300_s17  ;;  %p8307_p5 = scmp.lt.u32.totalorder %s8300_s17, %s9236_s3 }
  0x6b   : > { %p8303_p1 = pnand %p8301_p13, %p8558_p0 }
  0x6d   : > { %p8304_p6 = pneg %p8303_p1 }
  0x6f   : > { %p8309_p9 = pnand %p8307_p5, %p8304_p6 }
  0x71   : > { %8312 = shalt.err (!%p8309_p9)
}
  0x72   : > { %s8313_s20 = scalar_lea.vmem %s243_s29, 46080  ;;  %p8321_p4 = scmp.lt.s32.totalorder %s243_s29, %s243_s29 }
  0x73   : > { %p8314_p10 = scmp.ne.s32.totalorder %s243_s29, %s8313_s20  ;;  %p8322_p7 = scmp.lt.s32.totalorder %s8313_s20, %s8313_s20 }
  0x75   : > { %p8316_p2 = pnand %p8314_p10, %p8558_p0  ;;  %p8323_p8 = por %p8322_p7, %p8321_p4 }
  0x77   : > { %p8317_p3 = pneg %p8316_p2 }
  0x79   : > { %p8324_p11 = pnand %p8323_p8, %p8317_p3 }
  0x7b   : > { %8327 = shalt.err (!%p8324_p11)
}
  0x7c   : > { %7436 = dma.hbm_to_vmem [thread:$0]  (!%p8542_p12), %s9236_s3, 46080, %s243_s29, [#allocation8], %s8435_s15, %s8435_s15, %s8436_s10  }
  0x7d   : > { %s8328_s21 = scalar_lea.hbm %s9239_s6, 16 }
  0x7e   : > { %p8329_p13 = scmp.ne.s32.totalorder %s9239_s6, %s8328_s21  ;;  %p8335_p5 = scmp.lt.u32.totalorder %s8328_s21, %s9239_s6 }
  0x80   : > { %p8331_p1 = pnand %p8329_p13, %p8558_p0 }
  0x82   : > { %p8332_p6 = pneg %p8331_p1 }
  0x84   : > { %p8337_p9 = pnand %p8335_p5, %p8332_p6 }
  0x86   : > { %8340 = shalt.err (!%p8337_p9)
}
  0x87   : > { %s8341_s19 = scalar_lea.vmem %s271_s14, 16  ;;  %s8348_s15 = scalar_lea.vmem %s271_s14, 32 }
  0x88   : > { %p8342_p10 = scmp.ne.s32.totalorder %s271_s14, %s8341_s19  ;;  %p8349_p4 = scmp.lt.s32.totalorder %s271_s14, %s271_s14 }
  0x89   : > { %p8350_p7 = scmp.lt.s32.totalorder %s8348_s15, %s8341_s19 }
  0x8a   : > { %p8344_p2 = pnand %p8342_p10, %p8558_p0 }
  0x8b   : > { %p8351_p8 = por %p8350_p7, %p8349_p4 }
  0x8c   : > { %p8345_p3 = pneg %p8344_p2 }
  0x8e   : > { %p8352_p11 = pnand %p8351_p8, %p8345_p3 }
  0x90   : > { %8355 = shalt.err (!%p8352_p11)
}
  0x91   : > { %7442 = dma.hbm_to_vmem [thread:$0]  (!%p8542_p12), %s9239_s6, 16, %s271_s14, [#allocation11]  }
  0x92   : > { %p9259_p13 = scmp.ne.s32.totalorder %s9254_s13, 0 }
  0x93   : > { %p9260_p1 = scmp.eq.s32.totalorder (!%p9259_p13), %s8506_s28, 0 }
  0x94   : > { %291 = sbr.rel (%p9259_p13) target bundleno = 2062 (0x80e), region = 48 }
  0x9b   : > { %8401 = dma.done.wait (%p9260_p1), [#allocation5], 5120   ;;  %p9261_p0 = pmov %p9260_p1 }
  0x9d   : > { %8403 = vsyncadd (%p9261_p0), [#allocation5], 4294962176  ;;  %p9262_p6 = pmov %p9261_p0 }
  0x9e   : > { %p9263_p5 = pmov %p9261_p0 }
  0x9f   : > { %8405 = dma.done.wait (%p9262_p6), [#allocation8], 46144  }
  0xa0   : > { %8407 = vsyncadd (%p9263_p5), [#allocation8], 4294921152  ;;  %p9264_p9 = pmov %p9261_p0 }
  0xa1   : > { %p9265_p12 = pmov %p9261_p0 }
  0xa2   : > { %8409 = dma.done.wait (%p9264_p9), [#allocation11], 80  }
  0xa3   : > { %8411 = vsyncadd (%p9265_p12), [#allocation11], 4294967216  ;;  %p338_p10 = scmp.lt.s32.totalorder %s8506_s28, 1  ;;  %vm344_vm0 = vcmask 261120   ;;  %v8439_v0 = vmov 0.0   ;;  %v8440_v1 = vmov 0  }
  0xa4   : > { %347 = vst.msk [vmem:[#allocation2 + $0x10] sm:$0xff] %vm344_vm0, %v8439_v0  ;;  %348 = vst.msk [vmem:[#allocation2 + $0x18] sm:$0xff] %vm344_vm0, %v8439_v0  ;;  %482 = vmatprep.mubr.bf16.mxu1 %v8440_v1  ;;  %634 = vmatprep.mubr.bf16.mxu0 %v8440_v1  ;;  %s8441_s20 = smov 2   ;;  %v7502_v6 = vld [vmem:[#allocation4 + $0x44] ss:$16 sps:$4 sm:$0xff]   ;;  %vm369_vm1 = vcmask 244752  }
  0xa5   : > { %345 = vst.msk [vmem:[#allocation2] sm:$0xff] %vm344_vm0, %v8439_v0  ;;  %346 = vst.msk [vmem:[#allocation2 + $0x8] sm:$0xff] %vm344_vm0, %v8439_v0  ;;  %s339_s13 = scalar_select %p338_p10, %s8506_s28, 1  ;;  %v7504_v7 = vld [vmem:[#allocation4 + $0x4] ss:$16 sps:$4 sm:$0xff]   ;;  %450 = vmatprep.subr.bf16.mxu1 %v7502_v6  ;;  %vm373_vm2 = vcmask 240656  }
  0xa6   : > { %1518 = vst [vmem:[#allocation3] sm:$0xff] %v8439_v0  ;;  %1519 = vst [vmem:[#allocation3 + $0x8] sm:$0xff] %v8439_v0  ;;  %v7506_v8 = vld [vmem:[#allocation4 + $0x40] ss:$16 sps:$4 sm:$0xff]   ;;  %v7508_v10 = vld [vmem:[#allocation4 + $0x64] ss:$16 sps:$4 sm:$0xff]   ;;  %602 = vmatprep.subr.bf16.mxu0 %v7504_v7 }
  0xa7   : > { %1520 = vst.msk [vmem:[#allocation3 + $0x10] sm:$0xff] %vm344_vm0, %v8439_v0  ;;  %1521 = vst [vmem:[#allocation3 + $0x18] sm:$0xff] %v8439_v0  ;;  %s7082_s18 = sshll.u32 %s339_s13, 5  ;;  %v7507_v9 = vld [vmem:[#allocation4] ss:$16 sps:$4 sm:$0xff]   ;;  %451 = vmatpush1.bf16.msra.mxu1 %v7506_v8  ;;  %vm1347_vm3 = vcmask 1043456  }
  0xa8   : > { %1523 = vst.msk [vmem:[#allocation3 + $0x28] sm:$0xff] %vm344_vm0, %v8439_v0  ;;  %1524 = vst [vmem:[#allocation3 + $0x30] sm:$0x3] %v8439_v0  ;;  %s342_s17 = scalar_lea.vmem %s9233_s0, %s7082_s18  ;;  %v7510_v11 = vld [vmem:[#allocation4 + $0x24] ss:$16 sps:$4 sm:$0xff]   ;;  %603 = vmatpush1.bf16.msra.mxu0 %v7507_v9  ;;  %452 = vmatprep.subr.bf16.mxu1 %v7508_v10  ;;  %vm8442_vm4 = vmmov 1  }
  0xa9   : > { %1525 = vst [vmem:[#allocation3 + $0x38] sm:$0x3] %v8439_v0  ;;  %v351_v2 = vld [vmem:[%s342_s17 + $0x10] sm:$0xff]  ;;  %v349_v3 = vld [vmem:[%s342_s17] sm:$0xff]  ;;  %v352_v4 = vld [vmem:[%s342_s17 + $0x18] sm:$0xf]  ;;  %604 = vmatprep.subr.bf16.mxu0 %v7510_v11 }
  0xaa   : > { %361 = vrot.lane.b32.xlu1 %v351_v2, %s8441_s20  ;;  %357 = vrot.lane.b32.xlu0 %v349_v3, %s8441_s20  ;;  %v350_v5 = vld [vmem:[%s342_s17 + $0x8] sm:$0xff]  ;;  %v7516_v14 = vld [vmem:[#allocation4 + $0x4c] ss:$16 sps:$4 sm:$0xff]   ;;  %v7514_v21 = vld [vmem:[#allocation4 + $0x48] ss:$16 sps:$4 sm:$0xff]   ;;  %vm1340_vm8 = vcmask 228352  }
  0xab   : > { %v7512_v12 = vld [vmem:[#allocation4 + $0x60] ss:$16 sps:$4 sm:$0xff]   ;;  %v7519_v15 = vld [vmem:[#allocation4 + $0x84] ss:$16 sps:$4 sm:$0xff]   ;;  %v7522_v28 = vld [vmem:[#allocation4 + $0x6c] ss:$16 sps:$4 sm:$0xff]  }
  0xac   : > { %v7513_v13 = vld [vmem:[#allocation4 + $0x20] ss:$16 sps:$4 sm:$0xff]   ;;  %453 = vmatpush1.bf16.msra.mxu1 %v7512_v12  ;;  %v7525_v29 = vld [vmem:[#allocation4 + $0xa4] ss:$16 sps:$4 sm:$0xff]   ;;  %v7520_v30 = vld [vmem:[#allocation4 + $0x68] ss:$16 sps:$4 sm:$0xff]  }
  0xad   : > { %605 = vmatpush1.bf16.msra.mxu0 %v7513_v13  ;;  %503 = vmatprep.subr.bf16.mxu1 %v7516_v14  ;;  %v7517_v27 = vld [vmem:[#allocation4 + $0x80] ss:$16 sps:$4 sm:$0xff]   ;;  %v7528_v32 = vld [vmem:[#allocation4 + $0xc] ss:$16 sps:$4 sm:$0xff]   ;;  %v7531_v36 = vld [vmem:[#allocation4 + $0xc4] ss:$16 sps:$4 sm:$0xff]  }
  0xae   : > { %363 = vrot.lane.b32.xlu1 %v352_v4, %s8441_s20  ;;  %359 = vrot.lane.b32.xlu0 %v350_v5, %s8441_s20  ;;  %v7523_v31 = vld [vmem:[#allocation4 + $0xa0] ss:$16 sps:$4 sm:$0xff]   ;;  %v7526_v42 = vld [vmem:[#allocation4 + $0x8] ss:$16 sps:$4 sm:$0xff]   ;;  %v7534_v44 = vld [vmem:[#allocation4 + $0x2c] ss:$16 sps:$4 sm:$0xff]  }
  0xaf   : > { %769 = vmatprep.subr.bf16.mxu0 %v7519_v15  ;;  %v7529_v43 = vld [vmem:[#allocation4 + $0xc0] ss:$16 sps:$4 sm:$0xff]   ;;  %v7537_v45 = vld [vmem:[#allocation4 + $0xe4] ss:$16 sps:$4 sm:$0xff]   ;;  %v7532_v47 = vld [vmem:[#allocation4 + $0x28] ss:$16 sps:$4 sm:$0xff]  }
  0xb0   : > { %v7535_v48 = vld [vmem:[#allocation4 + $0xe0] ss:$16 sps:$4 sm:$0xff]   ;;  %v7540_v49 = vld [vmem:[#allocation4 + $0x8c] ss:$16 sps:$4 sm:$0xff]   ;;  %v7543_v52 = vld [vmem:[#allocation4 + $0x104] ss:$16 sps:$4 sm:$0xff]  }
  0xb1   : > { %v7538_v56 = vld [vmem:[#allocation4 + $0x88] ss:$16 sps:$4 sm:$0xff]   ;;  %v7541_v57 = vld [vmem:[#allocation4 + $0x100] ss:$16 sps:$4 sm:$0xff]   ;;  %v7546_v58 = vld [vmem:[#allocation4 + $0xac] ss:$16 sps:$4 sm:$0xff]  }
  0xb2   : > { %v7549_v59 = vld [vmem:[#allocation4 + $0x124] ss:$16 sps:$4 sm:$0xff]   ;;  %v7544_v61 = vld [vmem:[#allocation4 + $0xa8] ss:$16 sps:$4 sm:$0xff]   ;;  %v7547_v62 = vld [vmem:[#allocation4 + $0x120] ss:$16 sps:$4 sm:$0xff]  }
  0xb3   : > { %v7552_v63 = vld [vmem:[#allocation4 + $0xcc] ss:$16 sps:$4 sm:$0xff]   ;;  %v7550_v6 = vld [vmem:[#allocation4 + $0xc8] ss:$16 sps:$4 sm:$0xff]   ;;  %vm7242_vm5 = vmpackc.low %vm1347_vm3, %vm8442_vm4  ;;  %vm1526_vm11 = vcmask 254976   ;;  %s8443_s2 = smov 32  }
  0xb4   : > { %v7555_v7 = vld [vmem:[#allocation4 + $0xec] ss:$16 sps:$4 sm:$0xff]   ;;  %v7553_v9 = vld [vmem:[#allocation4 + $0xe8] ss:$16 sps:$4 sm:$0xff]   ;;  %vm1532_vm12 = vcmask 1041408   ;;  %vm1555_vm13 = vcmask 1047810  }
  0xb5   : > { %v7558_v10 = vld [vmem:[#allocation4 + $0x10c] ss:$16 sps:$4 sm:$0xff]   ;;  %v7556_v15 = vld [vmem:[#allocation4 + $0x108] ss:$16 sps:$4 sm:$0xff]   ;;  %vm1558_vm14 = vcmask 261122   ;;  %vm1560_vm15 = vcmask 1047808  }
  0xb6   : > { %v8720_v14 = vld [vmem:[#allocation3] sm:$0xff]  ;;  %vm4814_vm3 = vcmask 113664   ;;  %s336_s14 = sand.u32 1, %s8422_s25   ;;  %s7079_s17 = sshll.u32 %s8506_s28, 4 }
  0xb7   : > { %1527 = vst.msk [vmem:[#allocation3 + $0x40] sm:$0x3] %vm1526_vm11, %v8720_v14  ;;  %s337_s20 = scalar_lea.vmem [#allocation13], %s336_s14  ;;  %s9191_s30 = scalar_lea.hbm %s9240_s7, %s7079_s17 }
  0xb8   : > { %s6194_s21 = scalar_lea.sflag [#allocation6], %s336_s14  ;;  %p9266_p3 = scmp.ne.s32.totalorder %s9252_s11, 0 }
  0xb9   : > { %s8444_s28 = smov [#allocation13]  }
  0xba   : > { %s8360_s23 = sshll.u32 %s8444_s28, 4  ;;  %s8361_s23 = int_to_ptr.vmem [resolvable:$false] %s8360_s23 }
  0xbb   : > { %s8362_s8 = scalar_lea.vmem %s8361_s23, 32 }
 0x11c   : > { %v362_v16 = vpop.permute.xlu1 %361  ;;  %v358_v17 = vpop.permute.xlu0 %357 }
 0x11d   : > { %372 = vst.msk [vmem:[#allocation2 + $0x12] sm:$0xff] %vm369_vm1, %v362_v16  ;;  %370 = vst.msk [vmem:[#allocation2 + $0x2] sm:$0xff] %vm369_vm1, %v358_v17  ;;  %v7561_v16 = vld [vmem:[#allocation4 + $0x12c] ss:$16 sps:$4 sm:$0xff]   ;;  %v7559_v17 = vld [vmem:[#allocation4 + $0x128] ss:$16 sps:$4 sm:$0xff]  }
 0x120   : > { %v364_v18 = vpop.permute.xlu1 %363  ;;  %v360_v19 = vpop.permute.xlu0 %359 }
 0x121   : > { %374 = vst.msk [vmem:[#allocation2 + $0x1a] sm:$0xf] %vm373_vm2, %v364_v18  ;;  %vm4217_vm2 = vcmask 1045504  }
 0x122   : > { %371 = vst.msk [vmem:[#allocation2 + $0xa] sm:$0xff] %vm369_vm1, %v360_v19  ;;  %vm3541_vm1 = vsmask.f32 6400 }
 0x124   : > { %v389_v20 = vld [vmem:[#allocation2 + $0x1] sm:$0xff]  ;;  %v710_v50 = vld [vmem:[#allocation2 + $0x12] sm:$0xff] }
 0x125   : > { %v375_v23 = vld [vmem:[#allocation2] sm:$0xff] }
 0x126   : > { %v708_v41 = vld [vmem:[#allocation2 + $0x2] sm:$0xff] }
 0x128   : > { %v392_v34 = vld [vmem:[#allocation2 + $0x19] sm:$0xf] }
 0x129   : > { %v390_v22 = vld [vmem:[#allocation2 + $0x9] sm:$0xff]  ;;  %v391_v33 = vld [vmem:[#allocation2 + $0x11] sm:$0xff]  ;;  %v711_v51 = vld [vmem:[#allocation2 + $0x1a] sm:$0xf] }
 0x12a   : > { %v376_v24 = vld [vmem:[#allocation2 + $0x8] sm:$0xff]  ;;  %v393_v25 = vpack.c.bf16 %v390_v22, %v389_v20  ;;  %v377_v35 = vld [vmem:[#allocation2 + $0x10] sm:$0xff]  ;;  %v378_v37 = vld [vmem:[#allocation2 + $0x18] sm:$0xf]  ;;  %v394_v38 = vpack.c.bf16 %v392_v34, %v391_v33  ;;  %v713_v53 = vpack.c.bf16 %v711_v51, %v710_v50 }
 0x12b   : > { %v8685_v26 = vpack.c.bf16 %v376_v24, %v375_v23  ;;  %v380_v39 = vpack.c.bf16 %v378_v37, %v377_v35  ;;  %v709_v40 = vld [vmem:[#allocation2 + $0xa] sm:$0xff]  ;;  %v893_v0 = vld [vmem:[#allocation2 + $0x13] sm:$0xff]  ;;  %v894_v2 = vld [vmem:[#allocation2 + $0x1b] sm:$0xf] }
 0x12c   : > { %6335 = vmatmul.mubr.msk.bf16.vlgmr.msra.gmra.mrb[0].mxu1 %vm344_vm0, %v393_v25  ;;  %v712_v46 = vpack.c.bf16 %v709_v40, %v708_v41  ;;  %v891_v54 = vld [vmem:[#allocation2 + $0x3] sm:$0xff]  ;;  %v892_v55 = vld [vmem:[#allocation2 + $0xb] sm:$0xff]  ;;  %v896_v3 = vpack.c.bf16 %v894_v2, %v893_v0  ;;  %v1076_v11 = vld [vmem:[#allocation2 + $0x14] sm:$0xff] }
 0x12d   : > { %6347 = vmatmul.mubr.msk.bf16.vlgmr.msra.gmra.mrb[0].mxu0 %vm344_vm0, %v8685_v26  ;;  %504 = vmatpush1.bf16.msra.mxu1 %v7514_v21  ;;  %v895_v60 = vpack.c.bf16 %v892_v55, %v891_v54  ;;  %v1074_v4 = vld [vmem:[#allocation2 + $0x4] sm:$0xff]  ;;  %v1075_v5 = vld [vmem:[#allocation2 + $0xc] sm:$0xff]  ;;  %v1077_v12 = vld [vmem:[#allocation2 + $0x1c] sm:$0xf] }
 0x12e   : > { %492 = vmatprep.mubr.bf16.mxu1 %v8440_v1  ;;  %644 = vmatprep.mubr.bf16.mxu0 %v8440_v1  ;;  %v1078_v8 = vpack.c.bf16 %v1075_v5, %v1074_v4  ;;  %v1079_v13 = vpack.c.bf16 %v1077_v12, %v1076_v11 }
 0x12f   : > { %770 = vmatpush1.bf16.msra.mxu0 %v7517_v27  ;;  %505 = vmatprep.subr.bf16.mxu1 %v7522_v28 }
 0x130   : > { %771 = vmatprep.subr.bf16.mxu0 %v7525_v29 }
 0x131   : > { %506 = vmatpush1.bf16.msra.mxu1 %v7520_v30 }
 0x132   : > { %655 = vmatprep.subr.bf16.mxu1 %v7528_v32 }
 0x133   : > { %772 = vmatpush1.bf16.msra.mxu0 %v7523_v31 }
 0x134   : > { %952 = vmatprep.subr.bf16.mxu0 %v7531_v36  ;;  %6336 = vmatmul.mubr.msk.bf16.gmra.mrb[4].mxu1 %vm344_vm0, %v394_v38 }
 0x135   : > { %6348 = vmatmul.mubr.msk.bf16.gmra.mrb[4].mxu0 %vm344_vm0, %v380_v39  ;;  %535 = vmatprep.mubr.bf16.mxu1 %v8440_v1 }
 0x136   : > { %801 = vmatprep.mubr.bf16.mxu0 %v8440_v1 }
 0x13c   : > { %6337 = vmatmul.mubr.msk.bf16.vlgmr.msra.gmra.mrb[8].mxu1 %vm344_vm0, %v393_v25 }
 0x13d   : > { %6359 = vmatmul.mubr.msk.bf16.vlgmr.msra.gmra.mrb[0].mxu0 %vm344_vm0, %v712_v46  ;;  %656 = vmatpush1.bf16.msra.mxu1 %v7526_v42  ;;  %v1259_v42 = vlaneseq }
 0x13e   : > { %545 = vmatprep.mubr.bf16.mxu1 %v8440_v1  ;;  %811 = vmatprep.mubr.bf16.mxu0 %v8440_v1 }
 0x13f   : > { %953 = vmatpush1.bf16.msra.mxu0 %v7529_v43  ;;  %657 = vmatprep.subr.bf16.mxu1 %v7534_v44  ;;  %v8731_v43 = vshrl.u32 %v1259_v42, 7 }
 0x140   : > { %954 = vmatprep.subr.bf16.mxu0 %v7537_v45  ;;  %v1257_v45 = vld [vmem:[#allocation7] sm:$0xf] }
 0x141   : > { %658 = vmatpush1.bf16.msra.mxu1 %v7532_v47  ;;  %v1261_v44 = vsub.s32 0, %v8731_v43  ;;  %v1269_v47 = vsub.s32 2, %v8731_v43 }
 0x142   : > { %822 = vmatprep.subr.bf16.mxu1 %v7540_v49 }
 0x143   : > { %955 = vmatpush1.bf16.msra.mxu0 %v7535_v48  ;;  %v1273_v48 = vsub.s32 3, %v8731_v43  ;;  %v1262_v49 = vrot.slane %v1257_v45, %v1261_v44  ;;  %v1270_v51 = vrot.slane %v1257_v45, %v1269_v47 }
 0x144   : > { %1135 = vmatprep.subr.bf16.mxu0 %v7543_v52  ;;  %6338 = vmatmul.mubr.msk.bf16.gmra.mrb[12].mxu1 %vm344_vm0, %v394_v38 }
 0x145   : > { %6360 = vmatmul.mubr.msk.bf16.gmra.mrb[4].mxu0 %vm344_vm0, %v713_v53  ;;  %687 = vmatprep.mubr.bf16.mxu1 %v8440_v1  ;;  %v1274_v52 = vrot.slane %v1257_v45, %v1273_v48 }
 0x146   : > { %984 = vmatprep.mubr.bf16.mxu0 %v8440_v1 }
 0x14c   : > { %6349 = vmatmul.mubr.msk.bf16.vlgmr.msra.gmra.mrb[8].mxu1 %vm344_vm0, %v8685_v26 }
 0x14d   : > { %6371 = vmatmul.mubr.msk.bf16.vlgmr.msra.gmra.mrb[0].mxu0 %vm344_vm0, %v895_v60  ;;  %823 = vmatpush1.bf16.msra.mxu1 %v7538_v56 }
 0x14e   : > { %697 = vmatprep.mubr.bf16.mxu1 %v8440_v1  ;;  %994 = vmatprep.mubr.bf16.mxu0 %v8440_v1 }
 0x14f   : > { %1136 = vmatpush1.bf16.msra.mxu0 %v7541_v57  ;;  %824 = vmatprep.subr.bf16.mxu1 %v7546_v58 }
 0x150   : > { %1137 = vmatprep.subr.bf16.mxu0 %v7549_v59 }
 0x151   : > { %825 = vmatpush1.bf16.msra.mxu1 %v7544_v61 }
 0x152   : > { %1005 = vmatprep.subr.bf16.mxu1 %v7552_v63 }
 0x153   : > { %1138 = vmatpush1.bf16.msra.mxu0 %v7547_v62 }
 0x154   : > { %6350 = vmatmul.mubr.msk.bf16.gmra.mrb[12].mxu1 %vm344_vm0, %v380_v39 }
 0x155   : > { %6372 = vmatmul.mubr.msk.bf16.gmra.mrb[4].mxu0 %vm344_vm0, %v896_v3  ;;  %854 = vmatprep.mubr.bf16.mxu1 %v8440_v1 }
 0x156   : > { %1167 = vmatprep.mubr.bf16.mxu0 %v8440_v1 }
 0x15c   : > { %6361 = vmatmul.mubr.msk.bf16.vlgmr.msra.gmra.mrb[8].mxu1 %vm344_vm0, %v712_v46  ;;  %v1265_v46 = vsub.s32 1, %v8731_v43 }
 0x15d   : > { %6383 = vmatmul.mubr.msk.bf16.vlgmr.msra.gmra.mrb[0].mxu0 %vm344_vm0, %v1078_v8  ;;  %1006 = vmatpush1.bf16.msra.mxu1 %v7550_v6 }
 0x15e   : > { %864 = vmatprep.mubr.bf16.mxu1 %v8440_v1  ;;  %1177 = vmatprep.mubr.bf16.mxu0 %v8440_v1  ;;  %v1266_v50 = vrot.slane %v1257_v45, %v1265_v46 }
 0x15f   : > { %1007 = vmatprep.subr.bf16.mxu1 %v7555_v7 }
 0x161   : > { %1008 = vmatpush1.bf16.msra.mxu1 %v7553_v9 }
 0x162   : > { %1188 = vmatprep.subr.bf16.mxu1 %v7558_v10 }
 0x164   : > { %6362 = vmatmul.mubr.msk.bf16.gmra.mrb[12].mxu1 %vm344_vm0, %v713_v53 }
 0x165   : > { %6384 = vmatmul.mubr.msk.bf16.gmra.mrb[4].mxu0 %vm344_vm0, %v1079_v13  ;;  %1037 = vmatprep.mubr.bf16.mxu1 %v8440_v1 }
 0x166   : > { %1418 = vmatprep.mubr.f32.mxu0 %v8720_v14 }
 0x16c   : > { %6373 = vmatmul.mubr.msk.bf16.vlgmr.msra.gmra.mrb[8].mxu1 %vm344_vm0, %v895_v60 }
 0x16d   : > { %1189 = vmatpush1.bf16.msra.mxu1 %v7556_v15  ;;  %1047 = vmatprep.mubr.bf16.mxu1 %v8440_v1 }
 0x16e   : > { %1190 = vmatprep.subr.bf16.mxu1 %v7561_v16 }
 0x171   : > { %1191 = vmatpush1.bf16.msra.mxu1 %v7559_v17 }
 0x174   : > { %6374 = vmatmul.mubr.msk.bf16.gmra.mrb[12].mxu1 %vm344_vm0, %v896_v3 }
 0x175   : > { %1220 = vmatprep.mubr.bf16.mxu1 %v8440_v1 }
 0x17c   : > { %6385 = vmatmul.mubr.msk.bf16.vlgmr.msra.gmra.mrb[8].mxu1 %vm344_vm0, %v1078_v8 }
 0x17d   : > { %1230 = vmatprep.mubr.bf16.mxu1 %v8440_v1 }
 0x184   : > { %6386 = vmatmul.mubr.msk.bf16.gmra.mrb[12].mxu1 %vm344_vm0, %v1079_v13 }
 0x185   : > { %1501 = vmatprep.mubr.f32.mxu1 %v8720_v14 }
 0x1ff   : > { %v484_v18 = vpop.f32.mrb[0].mxu1 }
 0x200   : > { %v486_v19 = vpop.f32.mrb[1].mxu1 }
 0x201   : > { %v488_v20 = vpop.f32.mrb[2].mxu1 }
 0x202   : > { %v490_v21 = vpop.f32.mrb[3].mxu1 }
 0x207   : > { %v494_v22 = vpop.f32.mrb[4].mxu1 }
 0x208   : > { %v496_v23 = vpop.f32.mrb[5].mxu1 }
 0x209   : > { %v498_v24 = vpop.f32.mrb[6].mxu1 }
 0x20a   : > { %v500_v25 = vpop.f32.mrb[7].mxu1 }
 0x230   : > { %v1169_v26 = vpop.f32.mrb[0].mxu0 }
 0x231   : > { %v7269_v27 = vadd.f32 %v1169_v26, %v484_v18  ;;  %v1171_v28 = vpop.f32.mrb[1].mxu0 }
 0x232   : > { %v7270_v29 = vadd.f32 %v1171_v28, %v486_v19  ;;  %v1173_v30 = vpop.f32.mrb[2].mxu0 }
 0x233   : > { %v7271_v31 = vadd.f32 %v1173_v30, %v488_v20  ;;  %v1175_v32 = vpop.f32.mrb[3].mxu0  ;;  %v1279_v53 = vadd.f32 %v7269_v27, %v1262_v49  ;;  %v1321_v27 = vadd.s32 8, %v8731_v43 }
 0x234   : > { %v7272_v33 = vadd.f32 %v1175_v32, %v490_v21  ;;  %v1280_v54 = vadd.f32 %v7270_v29, %v1266_v50 }
 0x235   : > { %v1283_v56 = vadd.f32 %v7271_v31, %v1262_v49  ;;  %v1295_v62 = vmax.f32 %v1279_v53, 0.0 }
 0x236   : > { %v1284_v59 = vadd.f32 %v7272_v33, %v1266_v50  ;;  %v1296_v3 = vmax.f32 %v1280_v54, 0.0 }
 0x237   : > { %v1299_v6 = vmax.f32 %v1283_v56, 0.0 }
 0x238   : > { %v1179_v34 = vpop.f32.mrb[4].mxu0  ;;  %v1300_v9 = vmax.f32 %v1284_v59, 0.0  ;;  %v7564_v59 = vld [vmem:[#allocation9 + $0x244] ss:$16 sps:$4 sm:$0xff]  }
 0x239   : > { %v7273_v35 = vadd.f32 %v1179_v34, %v494_v22  ;;  %v1181_v36 = vpop.f32.mrb[5].mxu0  ;;  %v1324_v22 = vmul.u32 2, %v8731_v43 }
 0x23a   : > { %v7274_v37 = vadd.f32 %v1181_v36, %v496_v23  ;;  %v1183_v38 = vpop.f32.mrb[6].mxu0 }
 0x23b   : > { %v7275_v39 = vadd.f32 %v1183_v38, %v498_v24  ;;  %v1185_v40 = vpop.f32.mrb[7].mxu0  ;;  %v1287_v12 = vadd.f32 %v7273_v35, %v1262_v49  ;;  %v1323_v35 = vand.u32 127, %v1259_v42 }
 0x23c   : > { %v7276_v41 = vadd.f32 %v1185_v40, %v500_v25  ;;  %v1288_v15 = vadd.f32 %v7274_v37, %v1266_v50 }
 0x23d   : > { %v1291_v18 = vadd.f32 %v7275_v39, %v1262_v49  ;;  %v1303_v28 = vmax.f32 %v1287_v12, 0.0  ;;  %v1332_v39 = vadd.s32 1, %v1324_v22  ;;  %v1325_v49 = vmul.u32 2, %v1321_v27  ;;  %v7591_v12 = vld [vmem:[#allocation9 + $0x2cc] ss:$16 sps:$4 sm:$0xff]  }
 0x23e   : > { %v1292_v23 = vadd.f32 %v7276_v41, %v1266_v50  ;;  %v1304_v32 = vmax.f32 %v1288_v15, 0.0  ;;  %vm1326_vm6 = vcmp.eq.s32.totalorder %v1323_v35, %v1324_v22  ;;  %v7589_v15 = vld [vmem:[#allocation9 + $0x2c8] ss:$16 sps:$4 sm:$0xff]   ;;  %v7598_v22 = vld [vmem:[#allocation9 + $0x300] ss:$16 sps:$4 sm:$0xff]  }
 0x23f   : > { %v1307_v36 = vmax.f32 %v1291_v18, 0.0  ;;  %vm1334_vm7 = vcmp.eq.s32.totalorder %v1323_v35, %v1332_v39  ;;  %v1333_v42 = vadd.s32 1, %v1325_v49  ;;  %v8750_v54 = vsel %vm1326_vm6, 1.0, %v8720_v14  ;;  %v7592_v18 = vld [vmem:[#allocation9 + $0x2e0] ss:$16 sps:$4 sm:$0xff]  }
 0x240   : > { %v1308_v40 = vmax.f32 %v1292_v23, 0.0  ;;  %vm1327_vm9 = vcmp.eq.s32.totalorder %v1323_v35, %v1325_v49  ;;  %v7601_v23 = vld [vmem:[#allocation9 + $0x308] ss:$16 sps:$4 sm:$0xff]   ;;  %v7627_v39 = vld [vmem:[#allocation9 + $0x38c] ss:$16 sps:$4 sm:$0xff]  }
 0x241   : > { %vm1335_vm10 = vcmp.eq.s32.totalorder %v1323_v35, %v1333_v42  ;;  %v6388_v56 = vsel %vm1327_vm9, 1.0, %v8720_v14  ;;  %v7607_v27 = vld [vmem:[#allocation9 + $0x328] ss:$16 sps:$4 sm:$0xff]  }
 0x242   : > { %v7619_v35 = vld [vmem:[#allocation9 + $0x368] ss:$16 sps:$4 sm:$0xff]  }
 0x243   : > { %v7631_v49 = vld [vmem:[#allocation9 + $0x3a8] ss:$16 sps:$4 sm:$0xff]  }
 0x244   : > { %v7637_v42 = vld [vmem:[#allocation9 + $0x3c8] ss:$16 sps:$4 sm:$0xff]  }
 0x24f   : > { %v1222_v55 = vpop.f32.mrb[8].mxu1 }
 0x250   : > { %v1281_v57 = vadd.f32 %v1270_v51, %v1222_v55  ;;  %v1224_v58 = vpop.f32.mrb[9].mxu1  ;;  %v8753_v55 = vsel %vm1334_vm7, 1.0, %v8720_v14 }
 0x251   : > { %v1282_v60 = vadd.f32 %v1274_v52, %v1224_v58  ;;  %v1226_v61 = vpop.f32.mrb[10].mxu1  ;;  %v7562_v58 = vld [vmem:[#allocation9 + $0x240] ss:$16 sps:$4 sm:$0xff]  }
 0x252   : > { %v1297_v63 = vmax.f32 %v1281_v57, 0.0  ;;  %v1285_v0 = vadd.f32 %v1270_v51, %v1226_v61  ;;  %v1228_v2 = vpop.f32.mrb[11].mxu1  ;;  %v6390_v57 = vsel %vm1335_vm10, 1.0, %v8720_v14  ;;  %v7567_v61 = vld [vmem:[#allocation9 + $0x24c] ss:$16 sps:$4 sm:$0xff]  }
 0x253   : > { %v1298_v4 = vmax.f32 %v1282_v60, 0.0  ;;  %v1286_v5 = vadd.f32 %v1274_v52, %v1228_v2  ;;  %v7565_v60 = vld [vmem:[#allocation9 + $0x248] ss:$16 sps:$4 sm:$0xff]  }
 0x254   : > { %v1311_v7 = vmax.f32 %v1295_v62, %v1297_v63  ;;  %v1301_v8 = vmax.f32 %v1285_v0, 0.0  ;;  %v7570_v62 = vld [vmem:[#allocation9 + $0x264] ss:$16 sps:$4 sm:$0xff]   ;;  %v7573_v63 = vld [vmem:[#allocation9 + $0x26c] ss:$16 sps:$4 sm:$0xff]  }
 0x255   : > { %v1312_v10 = vmax.f32 %v1296_v3, %v1298_v4  ;;  %v1302_v11 = vmax.f32 %v1286_v5, 0.0  ;;  %v7568_v0 = vld [vmem:[#allocation9 + $0x260] ss:$16 sps:$4 sm:$0xff]   ;;  %v7571_v2 = vld [vmem:[#allocation9 + $0x268] ss:$16 sps:$4 sm:$0xff]  }
 0x256   : > { %v1313_v13 = vmax.f32 %v1299_v6, %v1301_v8  ;;  %v7576_v3 = vld [vmem:[#allocation9 + $0x284] ss:$16 sps:$4 sm:$0xff]   ;;  %v7579_v4 = vld [vmem:[#allocation9 + $0x28c] ss:$16 sps:$4 sm:$0xff]   ;;  %v7574_v5 = vld [vmem:[#allocation9 + $0x280] ss:$16 sps:$4 sm:$0xff]  }
 0x257   : > { %v1314_v16 = vmax.f32 %v1300_v9, %v1302_v11  ;;  %v1232_v17 = vpop.f32.mrb[12].mxu1  ;;  %v7577_v6 = vld [vmem:[#allocation9 + $0x288] ss:$16 sps:$4 sm:$0xff]   ;;  %v7585_v8 = vld [vmem:[#allocation9 + $0x2ac] ss:$16 sps:$4 sm:$0xff]  }
 0x258   : > { %v7239_v19 = vpack.c.bf16 %v1313_v13, %v1311_v7  ;;  %v1289_v20 = vadd.f32 %v1270_v51, %v1232_v17  ;;  %v1234_v21 = vpop.f32.mrb[13].mxu1  ;;  %v7582_v7 = vld [vmem:[#allocation9 + $0x2a4] ss:$16 sps:$4 sm:$0xff]   ;;  %v7580_v9 = vld [vmem:[#allocation9 + $0x2a0] ss:$16 sps:$4 sm:$0xff]  }
 0x259   : > { %v1290_v24 = vadd.f32 %v1274_v52, %v1234_v21  ;;  %v1236_v25 = vpop.f32.mrb[14].mxu1  ;;  %v7237_v26 = vpack.c.bf16 %v1314_v16, %v1312_v10  ;;  %v7583_v10 = vld [vmem:[#allocation9 + $0x2a8] ss:$16 sps:$4 sm:$0xff]   ;;  %v7588_v11 = vld [vmem:[#allocation9 + $0x2c4] ss:$16 sps:$4 sm:$0xff]  }
 0x25a   : > { %v1305_v29 = vmax.f32 %v1289_v20, 0.0  ;;  %v1293_v30 = vadd.f32 %v1270_v51, %v1236_v25  ;;  %v1238_v31 = vpop.f32.mrb[15].mxu1  ;;  %v7586_v13 = vld [vmem:[#allocation9 + $0x2c0] ss:$16 sps:$4 sm:$0xff]   ;;  %v7594_v16 = vld [vmem:[#allocation9 + $0x2e4] ss:$16 sps:$4 sm:$0xff]  }
 0x25b   : > { %v1306_v33 = vmax.f32 %v1290_v24, 0.0  ;;  %v1294_v34 = vadd.f32 %v1274_v52, %v1238_v31  ;;  %7238 = vmatprep.subr.bf16.mxu0 %v7237_v26  ;;  %7248 = vmatprep.subr.bf16.mxu1 %v7237_v26  ;;  %v7597_v17 = vld [vmem:[#allocation9 + $0x2ec] ss:$16 sps:$4 sm:$0xff]   ;;  %v7600_v20 = vld [vmem:[#allocation9 + $0x304] ss:$16 sps:$4 sm:$0xff]  }
 0x25c   : > { %v1315_v37 = vmax.f32 %v1303_v28, %v1305_v29  ;;  %v1309_v38 = vmax.f32 %v1293_v30, 0.0  ;;  %7240 = vmatpush1.bf16.msra.mxu0 %v7239_v19  ;;  %7250 = vmatpush1.bf16.msra.mxu1 %v7239_v19  ;;  %v7595_v19 = vld [vmem:[#allocation9 + $0x2e8] ss:$16 sps:$4 sm:$0xff]   ;;  %v7603_v21 = vld [vmem:[#allocation9 + $0x30c] ss:$16 sps:$4 sm:$0xff]  }
 0x25d   : > { %v1316_v41 = vmax.f32 %v1304_v32, %v1306_v33  ;;  %v1310_v45 = vmax.f32 %v1294_v34, 0.0  ;;  %v7606_v24 = vld [vmem:[#allocation9 + $0x324] ss:$16 sps:$4 sm:$0xff]   ;;  %v7609_v25 = vld [vmem:[#allocation9 + $0x32c] ss:$16 sps:$4 sm:$0xff]  }
 0x25e   : > { %v1317_v50 = vmax.f32 %v1307_v36, %v1309_v38  ;;  %v7604_v26 = vld [vmem:[#allocation9 + $0x320] ss:$16 sps:$4 sm:$0xff]   ;;  %v7612_v28 = vld [vmem:[#allocation9 + $0x344] ss:$16 sps:$4 sm:$0xff]   ;;  %v7615_v29 = vld [vmem:[#allocation9 + $0x34c] ss:$16 sps:$4 sm:$0xff]  }
 0x25f   : > { %v1318_v53 = vmax.f32 %v1308_v40, %v1310_v45  ;;  %v7610_v30 = vld [vmem:[#allocation9 + $0x340] ss:$16 sps:$4 sm:$0xff]   ;;  %v7613_v31 = vld [vmem:[#allocation9 + $0x348] ss:$16 sps:$4 sm:$0xff]   ;;  %v7618_v32 = vld [vmem:[#allocation9 + $0x364] ss:$16 sps:$4 sm:$0xff]  }
 0x260   : > { %v7244_v51 = vpack.c.bf16 %v1317_v50, %v1315_v37  ;;  %v7621_v33 = vld [vmem:[#allocation9 + $0x36c] ss:$16 sps:$4 sm:$0xff]   ;;  %v7616_v34 = vld [vmem:[#allocation9 + $0x360] ss:$16 sps:$4 sm:$0xff]   ;;  %v7624_v37 = vld [vmem:[#allocation9 + $0x384] ss:$16 sps:$4 sm:$0xff]  }
 0x261   : > { %v7241_v52 = vpack.c.bf16 %v1318_v53, %v1316_v41  ;;  %v7622_v36 = vld [vmem:[#allocation9 + $0x380] ss:$16 sps:$4 sm:$0xff]   ;;  %v7625_v38 = vld [vmem:[#allocation9 + $0x388] ss:$16 sps:$4 sm:$0xff]   ;;  %v7630_v40 = vld [vmem:[#allocation9 + $0x3a4] ss:$16 sps:$4 sm:$0xff]  }
 0x262   : > { %v7628_v41 = vld [vmem:[#allocation9 + $0x3a0] ss:$16 sps:$4 sm:$0xff]   ;;  %v7633_v45 = vld [vmem:[#allocation9 + $0x3ac] ss:$16 sps:$4 sm:$0xff]   ;;  %v7636_v53 = vld [vmem:[#allocation9 + $0x3c4] ss:$16 sps:$4 sm:$0xff]  }
 0x263   : > { %7243 = vmatprep.subr.msk.bf16.mxu0 %vm7242_vm5, %v7241_v52  ;;  %7253 = vmatprep.subr.msk.bf16.mxu1 %vm7242_vm5, %v7241_v52  ;;  %v7634_v50 = vld [vmem:[#allocation9 + $0x3c0] ss:$16 sps:$4 sm:$0xff]  }
 0x264   : > { %7246 = vmatpush1.bf16.msk.msra.mxu0 %vm7242_vm5, %v7244_v51  ;;  %7256 = vmatpush1.bf16.msk.msra.mxu1 %vm7242_vm5, %v7244_v51 }
 0x265   : > { %2113 = vmatprep.subr.bf16.mxu0 %v7564_v59  ;;  %2199 = vmatprep.subr.bf16.mxu1 %v7567_v61 }
 0x267   : > { %6393 = vmatmul.mubr.msk.f32.vlgmr.msra.gmra.mrb[8].mxu0 %vm1340_vm8, %v8750_v54  ;;  %6397 = vmatmul.mubr.msk.f32.vlgmr.msra.gmra.mrb[16].mxu1 %vm1340_vm8, %v8753_v55 }
 0x268   : > { %1424 = vmatprep.mubr.f32.mxu0 %v8720_v14  ;;  %1507 = vmatprep.mubr.f32.mxu1 %v8720_v14 }
 0x269   : > { %2114 = vmatpush1.bf16.msra.mxu0 %v7562_v58  ;;  %2200 = vmatpush1.bf16.msra.mxu1 %v7565_v60  ;;  %v7642_v60 = vld [vmem:[#allocation9 + $0x3e4] ss:$16 sps:$4 sm:$0xff]  }
 0x26a   : > { %2115 = vmatprep.subr.bf16.mxu0 %v7570_v62  ;;  %2201 = vmatprep.subr.bf16.mxu1 %v7573_v63  ;;  %v7645_v62 = vld [vmem:[#allocation9 + $0x3ec] ss:$16 sps:$4 sm:$0xff]  }
 0x26b   : > { %6394 = vmatmul.mubr.msk.f32.gmra.mrb[10].mxu0 %vm1340_vm8, %v6388_v56  ;;  %6398 = vmatmul.mubr.msk.f32.gmra.mrb[18].mxu1 %vm1340_vm8, %v6390_v57  ;;  %v7639_v56 = vld [vmem:[#allocation9 + $0x3cc] ss:$16 sps:$4 sm:$0xff]  }
 0x26d   : > { %2116 = vmatpush1.bf16.msra.mxu0 %v7568_v0  ;;  %2202 = vmatpush1.bf16.msra.mxu1 %v7571_v2  ;;  %v7640_v0 = vld [vmem:[#allocation9 + $0x3e0] ss:$16 sps:$4 sm:$0xff]   ;;  %v7643_v2 = vld [vmem:[#allocation9 + $0x3e8] ss:$16 sps:$4 sm:$0xff]  }
 0x26e   : > { %2117 = vmatprep.subr.bf16.mxu0 %v7576_v3  ;;  %2203 = vmatprep.subr.bf16.mxu1 %v7579_v4 }
 0x271   : > { %2118 = vmatpush1.bf16.msra.mxu0 %v7574_v5  ;;  %2204 = vmatpush1.bf16.msra.mxu1 %v7577_v6  ;;  %v7648_v6 = vld [vmem:[#allocation9 + $0x404] ss:$16 sps:$4 sm:$0xff]  }
 0x272   : > { %2119 = vmatprep.subr.bf16.mxu0 %v7582_v7  ;;  %2205 = vmatprep.subr.bf16.mxu1 %v7585_v8 }
 0x275   : > { %2120 = vmatpush1.bf16.msra.mxu0 %v7580_v9  ;;  %2206 = vmatpush1.bf16.msra.mxu1 %v7583_v10  ;;  %v7651_v10 = vld [vmem:[#allocation9 + $0x40c] ss:$16 sps:$4 sm:$0xff]  }
 0x276   : > { %2121 = vmatprep.subr.bf16.mxu0 %v7588_v11  ;;  %2207 = vmatprep.subr.bf16.mxu1 %v7591_v12 }
 0x279   : > { %2122 = vmatpush1.bf16.msra.mxu0 %v7586_v13  ;;  %2208 = vmatpush1.bf16.msra.mxu1 %v7589_v15  ;;  %v7646_v13 = vld [vmem:[#allocation9 + $0x400] ss:$16 sps:$4 sm:$0xff]  }
 0x27a   : > { %2123 = vmatprep.subr.bf16.mxu0 %v7594_v16  ;;  %2209 = vmatprep.subr.bf16.mxu1 %v7597_v17  ;;  %v7649_v16 = vld [vmem:[#allocation9 + $0x408] ss:$16 sps:$4 sm:$0xff]   ;;  %v7654_v17 = vld [vmem:[#allocation9 + $0x424] ss:$16 sps:$4 sm:$0xff]  }
 0x27d   : > { %2124 = vmatpush1.bf16.msra.mxu0 %v7592_v18  ;;  %2210 = vmatpush1.bf16.msra.mxu1 %v7595_v19  ;;  %v7657_v19 = vld [vmem:[#allocation9 + $0x42c] ss:$16 sps:$4 sm:$0xff]  }
 0x27e   : > { %2125 = vmatprep.subr.bf16.mxu0 %v7600_v20  ;;  %2211 = vmatprep.subr.bf16.mxu1 %v7603_v21  ;;  %v7652_v21 = vld [vmem:[#allocation9 + $0x420] ss:$16 sps:$4 sm:$0xff]  }
 0x281   : > { %2126 = vmatpush1.bf16.msra.mxu0 %v7598_v22  ;;  %2212 = vmatpush1.bf16.msra.mxu1 %v7601_v23  ;;  %v7655_v22 = vld [vmem:[#allocation9 + $0x428] ss:$16 sps:$4 sm:$0xff]   ;;  %v7660_v23 = vld [vmem:[#allocation9 + $0x444] ss:$16 sps:$4 sm:$0xff]  }
 0x282   : > { %2127 = vmatprep.subr.bf16.mxu0 %v7606_v24  ;;  %2213 = vmatprep.subr.bf16.mxu1 %v7609_v25  ;;  %v7663_v24 = vld [vmem:[#allocation9 + $0x44c] ss:$16 sps:$4 sm:$0xff]  }
 0x285   : > { %2128 = vmatpush1.bf16.msra.mxu0 %v7604_v26  ;;  %2214 = vmatpush1.bf16.msra.mxu1 %v7607_v27 }
 0x286   : > { %2129 = vmatprep.subr.bf16.mxu0 %v7612_v28  ;;  %2215 = vmatprep.subr.bf16.mxu1 %v7615_v29 }
 0x289   : > { %2130 = vmatpush1.bf16.msra.mxu0 %v7610_v30  ;;  %2216 = vmatpush1.bf16.msra.mxu1 %v7613_v31 }
 0x28a   : > { %2131 = vmatprep.subr.bf16.mxu0 %v7618_v32  ;;  %2217 = vmatprep.subr.bf16.mxu1 %v7621_v33 }
 0x28d   : > { %2132 = vmatpush1.bf16.msra.mxu0 %v7616_v34  ;;  %2218 = vmatpush1.bf16.msra.mxu1 %v7619_v35 }
 0x28e   : > { %2133 = vmatprep.subr.bf16.mxu0 %v7624_v37  ;;  %2219 = vmatprep.subr.bf16.mxu1 %v7627_v39 }
 0x291   : > { %2134 = vmatpush1.bf16.msra.mxu0 %v7622_v36  ;;  %2220 = vmatpush1.bf16.msra.mxu1 %v7625_v38  ;;  %v3461_v36 = vld [vmem:[#allocation3 + $0x40] sm:$0x1] }
 0x292   : > { %2135 = vmatprep.subr.bf16.mxu0 %v7630_v40  ;;  %2221 = vmatprep.subr.bf16.mxu1 %v7633_v45  ;;  %v3467_v40 = vpack.c.bf16 %v3461_v36, %v3461_v36  ;;  %v7696_v36 = vld [vmem:[#allocation9 + $0x84] ss:$16 sps:$4 sm:$0xff]  }
 0x295   : > { %2136 = vmatpush1.bf16.msra.mxu0 %v7628_v41  ;;  %2222 = vmatpush1.bf16.msra.mxu1 %v7631_v49 }
 0x296   : > { %2137 = vmatprep.subr.bf16.mxu0 %v7636_v53  ;;  %2223 = vmatprep.subr.bf16.mxu1 %v7639_v56 }
 0x299   : > { %2138 = vmatpush1.bf16.msra.mxu0 %v7634_v50  ;;  %2224 = vmatpush1.bf16.msra.mxu1 %v7637_v42 }
 0x29a   : > { %2139 = vmatprep.subr.bf16.mxu0 %v7642_v60  ;;  %2225 = vmatprep.subr.bf16.mxu1 %v7645_v62  ;;  %v3577_v60 = vshll.u32 %v3467_v40, 16  ;;  %v7666_v62 = vld [vmem:[#allocation9 + $0x464] ss:$16 sps:$4 sm:$0xff]  }
 0x29b   : > { %v7702_v40 = vld [vmem:[#allocation9 + $0xa4] ss:$16 sps:$4 sm:$0xff]  }
 0x29d   : > { %2140 = vmatpush1.bf16.msra.mxu0 %v7640_v0  ;;  %2226 = vmatpush1.bf16.msra.mxu1 %v7643_v2 }
 0x29e   : > { %2141 = vmatprep.subr.bf16.mxu0 %v7648_v6  ;;  %2227 = vmatprep.subr.bf16.mxu1 %v7651_v10  ;;  %v7675_v10 = vld [vmem:[#allocation9 + $0xc] ss:$16 sps:$4 sm:$0xff]  }
 0x2a1   : > { %2142 = vmatpush1.bf16.msra.mxu0 %v7646_v13  ;;  %2228 = vmatpush1.bf16.msra.mxu1 %v7649_v16 }
 0x2a2   : > { %2143 = vmatprep.subr.bf16.mxu0 %v7654_v17  ;;  %2229 = vmatprep.subr.bf16.mxu1 %v7657_v19  ;;  %v7670_v17 = vld [vmem:[#allocation9] ss:$16 sps:$4 sm:$0xff]  }
 0x2a5   : > { %2144 = vmatpush1.bf16.msra.mxu0 %v7652_v21  ;;  %2230 = vmatpush1.bf16.msra.mxu1 %v7655_v22  ;;  %v7678_v22 = vld [vmem:[#allocation9 + $0x24] ss:$16 sps:$4 sm:$0xff]  }
 0x2a6   : > { %2156 = vmatprep.subr.bf16.mxu0 %v7660_v23  ;;  %2242 = vmatprep.subr.bf16.mxu1 %v7663_v24  ;;  %v7681_v23 = vld [vmem:[#allocation9 + $0x2c] ss:$16 sps:$4 sm:$0xff]  }
 0x33a   : > { %v1420_v51 = vpop.f32.mrb[8].mxu0  ;;  %v1503_v52 = vpop.f32.mrb[16].mxu1 }
 0x33b   : > { %v1514_v57 = vmax.f32 %v1420_v51, %v1503_v52  ;;  %v1422_v58 = vpop.f32.mrb[9].mxu0  ;;  %v1505_v59 = vpop.f32.mrb[17].mxu1  ;;  %v7658_v52 = vld [vmem:[#allocation9 + $0x440] ss:$16 sps:$4 sm:$0xff]  }
 0x33c   : > { %v1515_v61 = vmax.f32 %v1422_v58, %v1505_v59 }
 0x33d   : > { %v1533_v63 = vrot.slane %v1514_v57, 6  ;;  %v7661_v57 = vld [vmem:[#allocation9 + $0x448] ss:$16 sps:$4 sm:$0xff]  }
 0x33e   : > { %v1534_v3 = vrot.slane %v1515_v61, 6  ;;  %v1426_v4 = vpop.f32.mrb[10].mxu0  ;;  %v1509_v5 = vpop.f32.mrb[18].mxu1 }
 0x33f   : > { %v1516_v7 = vmax.f32 %v1426_v4, %v1509_v5  ;;  %v1511_v8 = vpop.f32.mrb[19].mxu1  ;;  %1539 = vrot.lane.b32.xlu0 %v1533_v63, %s8443_s2  ;;  %v1428_v9 = vpop.f32.mrb[11].mxu0  ;;  %v7664_v4 = vld [vmem:[#allocation9 + $0x460] ss:$16 sps:$4 sm:$0xff]   ;;  %v7667_v5 = vld [vmem:[#allocation9 + $0x468] ss:$16 sps:$4 sm:$0xff]  }
 0x340   : > { %v1517_v11 = vmax.f32 %v1428_v9, %v1511_v8  ;;  %1541 = vrot.lane.b32.xlu1 %v1534_v3, %s8443_s2  ;;  %v3579_v8 = vrot.slane %v3577_v60, 2  ;;  %v7672_v9 = vld [vmem:[#allocation9 + $0x4] ss:$16 sps:$4 sm:$0xff]  }
 0x341   : > { %v1535_v12 = vrot.slane %v1516_v7, 6  ;;  %v7720_v60 = vld [vmem:[#allocation9 + $0x104] ss:$16 sps:$4 sm:$0xff]  }
 0x342   : > { %v1537_v15 = vrot.slane %v1517_v11, 6 }
 0x343   : > { %v1536_v18 = vsel %vm1532_vm12, %v1533_v63, %v1535_v12  ;;  %v7669_v63 = vld [vmem:[#allocation9 + $0x46c] ss:$16 sps:$4 sm:$0xff]  }
 0x344   : > { %1543 = vrot.lane.b32.xlu0 %v1536_v18, %s8443_s2  ;;  %v1538_v20 = vsel %vm1532_vm12, %v1534_v3, %v1537_v15  ;;  %v7673_v18 = vld [vmem:[#allocation9 + $0x8] ss:$16 sps:$4 sm:$0xff]  }
 0x345   : > { %1545 = vrot.lane.b32.xlu1 %v1538_v20, %s8443_s2  ;;  %s6206_s2 = sshll.u32 %s337_s20, 4  ;;  %s9193_s2 = int_to_ptr.vmem [resolvable:$true] %s6206_s2 }
 0x346   : > { %s8356_s22 = scalar_lea.vmem %s9193_s2, 16  ;;  %p8363_p8 = scmp.lt.s32.totalorder %s9193_s2, %s8361_s23 }
 0x347   : > { %p8357_p2 = scmp.ne.s32.totalorder %s9193_s2, %s8356_s22  ;;  %p8364_p11 = scmp.lt.s32.totalorder %s8362_s8, %s8356_s22 }
 0x349   : > { %p8358_p4 = pnand %p8357_p2, %p9266_p3  ;;  %p8365_p13 = por %p8364_p11, %p8363_p8 }
 0x34b   : > { %p8359_p7 = pneg %p8358_p4 }
 0x34d   : > { %p8366_p1 = pnand %p8365_p13, %p8359_p7 }
 0x3b1   : > { %v1540_v25 = vpop.permute.xlu0 %1539 }
 0x3b2   : > { %1556 = vst.msk [vmem:[#allocation3] sm:$0xfc] %vm1555_vm13, %v1540_v25  ;;  %v1542_v26 = vpop.permute.xlu1 %1541 }
 0x3b3   : > { %v1547_v27 = vsel %vm344_vm0, %v1540_v25, %v1542_v26  ;;  %1559 = vst.msk [vmem:[#allocation3 + $0x10] sm:$0xfc] %vm1558_vm14, %v1542_v26  ;;  %v7676_v25 = vld [vmem:[#allocation9 + $0x20] ss:$16 sps:$4 sm:$0xff]   ;;  %v7679_v26 = vld [vmem:[#allocation9 + $0x28] ss:$16 sps:$4 sm:$0xff]  }
 0x3b4   : > { %1557 = vst [vmem:[#allocation3 + $0x8] sm:$0xfc] %v1547_v27  ;;  %v7684_v27 = vld [vmem:[#allocation9 + $0x44] ss:$16 sps:$4 sm:$0xff]  }
 0x3b6   : > { %v1544_v28 = vpop.permute.xlu0 %1543 }
 0x3b7   : > { %1561 = vst.msk [vmem:[#allocation3 + $0x18] sm:$0xff] %vm1560_vm15, %v1544_v28  ;;  %v1546_v29 = vpop.permute.xlu1 %1545 }
 0x3b8   : > { %v8764_v30 = vsel %vm344_vm0, %v1544_v28, %v1546_v29  ;;  %1563 = vst.msk [vmem:[#allocation3 + $0x28] sm:$0xff] %vm344_vm0, %v1546_v29  ;;  %v7687_v28 = vld [vmem:[#allocation9 + $0x4c] ss:$16 sps:$4 sm:$0xff]   ;;  %v7682_v29 = vld [vmem:[#allocation9 + $0x40] ss:$16 sps:$4 sm:$0xff]  }
 0x3b9   : > { %1562 = vst [vmem:[#allocation3 + $0x20] sm:$0xff] %v8764_v30  ;;  %v1645_v31 = vld [vmem:[#allocation3] sm:$0xfe] }
 0x3ba   : > { %v3455_v42 = vld [vmem:[#allocation3 + $0x10] sm:$0xf8] }
 0x3bb   : > { %v1646_v34 = vld [vmem:[#allocation3 + $0x8] sm:$0xfe]  ;;  %v1647_v58 = vld [vmem:[#allocation3 + $0x10] sm:$0xfe] }
 0x3bc   : > { %v1565_v21 = vld [vmem:[#allocation3 + $0x8] sm:$0xff] }
 0x3be   : > { %v1648_v32 = vld [vmem:[#allocation3 + $0x18] sm:$0x7f] }
 0x3bf   : > { %v1651_v33 = vpack.c.bf16 %v1648_v32, %v1645_v31  ;;  %v8768_v45 = vld [vmem:[#allocation3 + $0x28] sm:$0xff]  ;;  %v7685_v31 = vld [vmem:[#allocation9 + $0x48] ss:$16 sps:$4 sm:$0xff]   ;;  %v7690_v32 = vld [vmem:[#allocation9 + $0x64] ss:$16 sps:$4 sm:$0xff]  }
 0x3c0   : > { %v1649_v35 = vld [vmem:[#allocation3 + $0x20] sm:$0x7f]  ;;  %v1650_v53 = vld [vmem:[#allocation3 + $0x28] sm:$0x7f]  ;;  %v3464_v59 = vpack.c.bf16 %v8768_v45, %v3455_v42 }
 0x3c1   : > { %v1652_v37 = vpack.c.bf16 %v1649_v35, %v1646_v34  ;;  %v1730_v38 = vshll.u32 %v1651_v33, 16  ;;  %v1728_v51 = vshrl.u32 %v1651_v33, 16  ;;  %v1653_v0 = vpack.c.bf16 %v1650_v53, %v1647_v58  ;;  %v1568_v19 = vld [vmem:[#allocation3 + $0x20] sm:$0x3f]  ;;  %v7693_v33 = vld [vmem:[#allocation9 + $0x6c] ss:$16 sps:$4 sm:$0xff]  }
 0x3c2   : > { %v3569_v2 = vshrl.u32 %v3464_v59, 16  ;;  %v3572_v3 = vshll.u32 %v3464_v59, 16  ;;  %v1571_v24 = vpack.c.bf16 %v1568_v19, %v1565_v21  ;;  %v7688_v34 = vld [vmem:[#allocation9 + $0x60] ss:$16 sps:$4 sm:$0xff]   ;;  %v7691_v35 = vld [vmem:[#allocation9 + $0x68] ss:$16 sps:$4 sm:$0xff]  }
 0x3c3   : > { %v1737_v39 = vshll.u32 %v1652_v37, 16  ;;  %v1732_v41 = vrot.slane %v1730_v38, 1  ;;  %v1735_v49 = vshrl.u32 %v1652_v37, 16  ;;  %v1744_v11 = vshll.u32 %v1653_v0, 16  ;;  %v7699_v37 = vld [vmem:[#allocation9 + $0x8c] ss:$16 sps:$4 sm:$0xff]  }
 0x3c4   : > { %v3571_v6 = vrot.slane %v3569_v2, 1  ;;  %v3574_v7 = vrot.slane %v3572_v3, 2  ;;  %v1742_v16 = vshrl.u32 %v1653_v0, 16  ;;  %v7694_v38 = vld [vmem:[#allocation9 + $0x80] ss:$16 sps:$4 sm:$0xff]  }
 0x3c5   : > { %v1739_v50 = vrot.slane %v1737_v39, 1  ;;  %v1733_v61 = vor.u32 %v1732_v41, %v1728_v51  ;;  %v1746_v15 = vrot.slane %v1744_v11, 1  ;;  %v7697_v39 = vld [vmem:[#allocation9 + $0x88] ss:$16 sps:$4 sm:$0xff]   ;;  %v7705_v41 = vld [vmem:[#allocation9 + $0xac] ss:$16 sps:$4 sm:$0xff]  }
 0x3c6   : > { %v3575_v12 = vor.u32 %v3574_v7, %v3571_v6  ;;  %v7708_v53 = vld [vmem:[#allocation9 + $0xc4] ss:$16 sps:$4 sm:$0xff]   ;;  %v7711_v51 = vld [vmem:[#allocation9 + $0xcc] ss:$16 sps:$4 sm:$0xff]   ;;  %v7709_v42 = vld [vmem:[#allocation9 + $0xc8] ss:$16 sps:$4 sm:$0xff]  }
 0x3c7   : > { %v1740_v56 = vor.u32 %v1739_v50, %v1735_v49  ;;  %v1747_v20 = vor.u32 %v1746_v15, %v1742_v16  ;;  %v7700_v49 = vld [vmem:[#allocation9 + $0xa0] ss:$16 sps:$4 sm:$0xff]   ;;  %v7703_v50 = vld [vmem:[#allocation9 + $0xa8] ss:$16 sps:$4 sm:$0xff]   ;;  %v7726_v0 = vld [vmem:[#allocation9 + $0x124] ss:$16 sps:$4 sm:$0xff]  }
 0x3c8   : > { %v8774_v13 = vsel %vm3541_vm1, %v3575_v12, %v3579_v8  ;;  %v7712_v58 = vld [vmem:[#allocation9 + $0xe0] ss:$16 sps:$4 sm:$0xff]   ;;  %v7715_v59 = vld [vmem:[#allocation9 + $0xe8] ss:$16 sps:$4 sm:$0xff]   ;;  %v7729_v2 = vld [vmem:[#allocation9 + $0x12c] ss:$16 sps:$4 sm:$0xff]  }
 0x3c9   : > { %2145 = vmatprep.mubr.bf16.mxu0 %v1740_v56  ;;  %2231 = vmatprep.mubr.bf16.mxu1 %v1740_v56  ;;  %v7714_v56 = vld [vmem:[#allocation9 + $0xe4] ss:$16 sps:$4 sm:$0xff]   ;;  %v7724_v3 = vld [vmem:[#allocation9 + $0x120] ss:$16 sps:$4 sm:$0xff]   ;;  %v7735_v6 = vld [vmem:[#allocation9 + $0x14c] ss:$16 sps:$4 sm:$0xff]  }
 0x3ca   : > { %2146 = vmatmul.mubr.bf16.vlgmr.msra.gmra.mrb[12].mxu0 %v1733_v61  ;;  %2232 = vmatmul.mubr.bf16.vlgmr.msra.gmra.mrb[20].mxu1 %v1733_v61  ;;  %v7723_v61 = vld [vmem:[#allocation9 + $0x10c] ss:$16 sps:$4 sm:$0xff]   ;;  %v7730_v7 = vld [vmem:[#allocation9 + $0x140] ss:$16 sps:$4 sm:$0xff]   ;;  %v7733_v8 = vld [vmem:[#allocation9 + $0x148] ss:$16 sps:$4 sm:$0xff]  }
 0x3cb   : > { %2157 = vmatpush1.bf16.msra.mxu0 %v7658_v52  ;;  %2243 = vmatpush1.bf16.msra.mxu1 %v7661_v57  ;;  %v7706_v52 = vld [vmem:[#allocation9 + $0xc0] ss:$16 sps:$4 sm:$0xff]   ;;  %v7717_v57 = vld [vmem:[#allocation9 + $0xec] ss:$16 sps:$4 sm:$0xff]   ;;  %v7739_v12 = vld [vmem:[#allocation9 + $0x168] ss:$16 sps:$4 sm:$0xff]  }
 0x3cc   : > { %2158 = vmatprep.subr.bf16.mxu0 %v7666_v62  ;;  %2244 = vmatprep.subr.bf16.mxu1 %v7669_v63  ;;  %v7718_v62 = vld [vmem:[#allocation9 + $0x100] ss:$16 sps:$4 sm:$0xff]   ;;  %v7721_v63 = vld [vmem:[#allocation9 + $0x108] ss:$16 sps:$4 sm:$0xff]   ;;  %v7744_v15 = vld [vmem:[#allocation9 + $0x184] ss:$16 sps:$4 sm:$0xff]  }
 0x3cd   : > { %2188 = vmatprep.mubr.bf16.mxu0 %v8440_v1  ;;  %2274 = vmatprep.mubr.bf16.mxu1 %v8440_v1  ;;  %v7736_v11 = vld [vmem:[#allocation9 + $0x160] ss:$16 sps:$4 sm:$0xff]   ;;  %v7747_v16 = vld [vmem:[#allocation9 + $0x18c] ss:$16 sps:$4 sm:$0xff]   ;;  %v7750_v19 = vld [vmem:[#allocation9 + $0x1a4] ss:$16 sps:$4 sm:$0xff]  }
 0x3ce   : > { %v7748_v21 = vld [vmem:[#allocation9 + $0x1a0] ss:$16 sps:$4 sm:$0xff]  }
 0x3cf   : > { %2159 = vmatpush1.bf16.msra.mxu0 %v7664_v4  ;;  %2245 = vmatpush1.bf16.msra.mxu1 %v7667_v5  ;;  %v7727_v4 = vld [vmem:[#allocation9 + $0x128] ss:$16 sps:$4 sm:$0xff]   ;;  %v7732_v5 = vld [vmem:[#allocation9 + $0x144] ss:$16 sps:$4 sm:$0xff]  }
 0x3d0   : > { %2648 = vmatprep.subr.bf16.mxu0 %v7672_v9  ;;  %2734 = vmatprep.subr.bf16.mxu1 %v7675_v10  ;;  %v7738_v9 = vld [vmem:[#allocation9 + $0x164] ss:$16 sps:$4 sm:$0xff]   ;;  %v7741_v10 = vld [vmem:[#allocation9 + $0x16c] ss:$16 sps:$4 sm:$0xff]  }
 0x3d6   : > { %6471 = vmatmul.mubr.msk.bf16.vlgmr.msra.gmra.mrb[12].mxu0 %vm344_vm0, %v1747_v20  ;;  %6472 = vmatmul.mubr.msk.bf16.vlgmr.msra.gmra.mrb[20].mxu1 %vm344_vm0, %v1747_v20  ;;  %v7753_v20 = vld [vmem:[#allocation9 + $0x1ac] ss:$16 sps:$4 sm:$0xff]  }
 0x3d7   : > { %2649 = vmatpush1.bf16.msra.mxu0 %v7670_v17  ;;  %2735 = vmatpush1.bf16.msra.mxu1 %v7673_v18  ;;  %v7742_v17 = vld [vmem:[#allocation9 + $0x180] ss:$16 sps:$4 sm:$0xff]   ;;  %v7745_v18 = vld [vmem:[#allocation9 + $0x188] ss:$16 sps:$4 sm:$0xff]  }
 0x3d8   : > { %2680 = vmatprep.mubr.bf16.mxu0 %v1571_v24  ;;  %2766 = vmatprep.mubr.bf16.mxu1 %v1571_v24  ;;  %v7759_v24 = vld [vmem:[#allocation9 + $0x1cc] ss:$16 sps:$4 sm:$0xff]  }
 0x3d9   : > { %2650 = vmatprep.subr.bf16.mxu0 %v7678_v22  ;;  %2736 = vmatprep.subr.bf16.mxu1 %v7681_v23  ;;  %v7751_v22 = vld [vmem:[#allocation9 + $0x1a8] ss:$16 sps:$4 sm:$0xff]   ;;  %v7756_v23 = vld [vmem:[#allocation9 + $0x1c4] ss:$16 sps:$4 sm:$0xff]  }
 0x3db   : > { %2651 = vmatpush1.bf16.msra.mxu0 %v7676_v25  ;;  %2737 = vmatpush1.bf16.msra.mxu1 %v7679_v26  ;;  %v7754_v25 = vld [vmem:[#allocation9 + $0x1c0] ss:$16 sps:$4 sm:$0xff]   ;;  %v7757_v26 = vld [vmem:[#allocation9 + $0x1c8] ss:$16 sps:$4 sm:$0xff]  }
 0x3dc   : > { %2652 = vmatprep.subr.bf16.mxu0 %v7684_v27  ;;  %2738 = vmatprep.subr.bf16.mxu1 %v7687_v28  ;;  %v7762_v27 = vld [vmem:[#allocation9 + $0x1e4] ss:$16 sps:$4 sm:$0xff]   ;;  %v7765_v28 = vld [vmem:[#allocation9 + $0x1ec] ss:$16 sps:$4 sm:$0xff]  }
 0x3df   : > { %2653 = vmatpush1.bf16.msra.mxu0 %v7682_v29  ;;  %2739 = vmatpush1.bf16.msra.mxu1 %v7685_v31  ;;  %v7760_v29 = vld [vmem:[#allocation9 + $0x1e0] ss:$16 sps:$4 sm:$0xff]   ;;  %v7763_v31 = vld [vmem:[#allocation9 + $0x1e8] ss:$16 sps:$4 sm:$0xff]  }
 0x3e0   : > { %2654 = vmatprep.subr.bf16.mxu0 %v7690_v32  ;;  %2740 = vmatprep.subr.bf16.mxu1 %v7693_v33  ;;  %v7768_v32 = vld [vmem:[#allocation9 + $0x204] ss:$16 sps:$4 sm:$0xff]   ;;  %v7771_v33 = vld [vmem:[#allocation9 + $0x20c] ss:$16 sps:$4 sm:$0xff]  }
 0x3e3   : > { %2655 = vmatpush1.bf16.msra.mxu0 %v7688_v34  ;;  %2741 = vmatpush1.bf16.msra.mxu1 %v7691_v35  ;;  %v1567_v34 = vld [vmem:[#allocation3 + $0x18] sm:$0x3f]  ;;  %v1564_v35 = vld [vmem:[#allocation3] sm:$0xff] }
 0x3e4   : > { %2656 = vmatprep.subr.bf16.mxu0 %v7696_v36  ;;  %2742 = vmatprep.subr.bf16.mxu1 %v7699_v37  ;;  %v7766_v36 = vld [vmem:[#allocation9 + $0x200] ss:$16 sps:$4 sm:$0xff]   ;;  %v7769_v37 = vld [vmem:[#allocation9 + $0x208] ss:$16 sps:$4 sm:$0xff]  }
 0x3e7   : > { %2657 = vmatpush1.bf16.msra.mxu0 %v7694_v38  ;;  %2743 = vmatpush1.bf16.msra.mxu1 %v7697_v39  ;;  %v1570_v38 = vpack.c.bf16 %v1567_v34, %v1564_v35  ;;  %v7774_v39 = vld [vmem:[#allocation9 + $0x224] ss:$16 sps:$4 sm:$0xff]   ;;  %v7832_v34 = vld [vmem:[#allocation9 + $0x5a0] ss:$16 sps:$4 sm:$0xff]   ;;  %v7835_v35 = vld [vmem:[#allocation9 + $0x5a8] ss:$16 sps:$4 sm:$0xff]  }
 0x3e8   : > { %2658 = vmatprep.subr.bf16.mxu0 %v7702_v40  ;;  %2744 = vmatprep.subr.bf16.mxu1 %v7705_v41  ;;  %v7777_v40 = vld [vmem:[#allocation9 + $0x22c] ss:$16 sps:$4 sm:$0xff]   ;;  %v7772_v41 = vld [vmem:[#allocation9 + $0x220] ss:$16 sps:$4 sm:$0xff]  }
 0x3eb   : > { %2659 = vmatpush1.bf16.msra.mxu0 %v7700_v49  ;;  %2745 = vmatpush1.bf16.msra.mxu1 %v7703_v50  ;;  %v7775_v49 = vld [vmem:[#allocation9 + $0x228] ss:$16 sps:$4 sm:$0xff]   ;;  %v7780_v50 = vld [vmem:[#allocation9 + $0x484] ss:$16 sps:$4 sm:$0xff]  }
 0x3ec   : > { %2660 = vmatprep.subr.bf16.mxu0 %v7708_v53  ;;  %2746 = vmatprep.subr.bf16.mxu1 %v7711_v51  ;;  %v7783_v53 = vld [vmem:[#allocation9 + $0x48c] ss:$16 sps:$4 sm:$0xff]  }
 0x3ed   : > { %v2821_v51 = vld [vmem:[#allocation3 + $0x8] sm:$0xfc] }
 0x3ef   : > { %2661 = vmatpush1.bf16.msra.mxu0 %v7706_v52  ;;  %2747 = vmatpush1.bf16.msra.mxu1 %v7709_v42  ;;  %v1569_v52 = vld [vmem:[#allocation3 + $0x28] sm:$0x3f]  ;;  %v2827_v42 = vpack.c.bf16 %v8764_v30, %v2821_v51 }
 0x3f0   : > { %2662 = vmatprep.subr.bf16.mxu0 %v7714_v56  ;;  %2748 = vmatprep.subr.bf16.mxu1 %v7717_v57  ;;  %v7778_v56 = vld [vmem:[#allocation9 + $0x480] ss:$16 sps:$4 sm:$0xff]   ;;  %v7781_v57 = vld [vmem:[#allocation9 + $0x488] ss:$16 sps:$4 sm:$0xff]   ;;  %v7855_v51 = vld [vmem:[#allocation9 + $0x60c] ss:$16 sps:$4 sm:$0xff]  }
 0x3f1   : > { %v7790_v30 = vld [vmem:[#allocation9 + $0x4c0] ss:$16 sps:$4 sm:$0xff]  }
 0x3f3   : > { %2663 = vmatpush1.bf16.msra.mxu0 %v7712_v58  ;;  %2749 = vmatpush1.bf16.msra.mxu1 %v7715_v59  ;;  %v1566_v58 = vld [vmem:[#allocation3 + $0x10] sm:$0xff] }
 0x3f4   : > { %2664 = vmatprep.subr.bf16.mxu0 %v7720_v60  ;;  %2750 = vmatprep.subr.bf16.mxu1 %v7723_v61  ;;  %v1572_v59 = vpack.c.bf16 %v1569_v52, %v1566_v58  ;;  %v7786_v60 = vld [vmem:[#allocation9 + $0x4a4] ss:$16 sps:$4 sm:$0xff]   ;;  %v7789_v61 = vld [vmem:[#allocation9 + $0x4ac] ss:$16 sps:$4 sm:$0xff]   ;;  %v7850_v52 = vld [vmem:[#allocation9 + $0x600] ss:$16 sps:$4 sm:$0xff]  }
 0x3f5   : > { %v7856_v58 = vld [vmem:[#allocation9 + $0x620] ss:$16 sps:$4 sm:$0xff]  }
 0x3f7   : > { %2665 = vmatpush1.bf16.msra.mxu0 %v7718_v62  ;;  %2751 = vmatpush1.bf16.msra.mxu1 %v7721_v63  ;;  %v2906_v62 = vrot.slane %v2827_v42, 1  ;;  %v7784_v63 = vld [vmem:[#allocation9 + $0x4a0] ss:$16 sps:$4 sm:$0xff]   ;;  %v7853_v42 = vld [vmem:[#allocation9 + $0x608] ss:$16 sps:$4 sm:$0xff]  }
 0x3f8   : > { %2666 = vmatprep.subr.bf16.mxu0 %v7726_v0  ;;  %2752 = vmatprep.subr.bf16.mxu1 %v7729_v2  ;;  %v7787_v0 = vld [vmem:[#allocation9 + $0x4a8] ss:$16 sps:$4 sm:$0xff]   ;;  %v7792_v2 = vld [vmem:[#allocation9 + $0x4c4] ss:$16 sps:$4 sm:$0xff]  }
 0x3fb   : > { %2667 = vmatpush1.bf16.msra.mxu0 %v7724_v3  ;;  %2753 = vmatpush1.bf16.msra.mxu1 %v7727_v4  ;;  %v7795_v3 = vld [vmem:[#allocation9 + $0x4cc] ss:$16 sps:$4 sm:$0xff]   ;;  %v7793_v4 = vld [vmem:[#allocation9 + $0x4c8] ss:$16 sps:$4 sm:$0xff]  }
 0x3fc   : > { %2668 = vmatprep.subr.bf16.mxu0 %v7732_v5  ;;  %2754 = vmatprep.subr.bf16.mxu1 %v7735_v6  ;;  %v7798_v5 = vld [vmem:[#allocation9 + $0x4e4] ss:$16 sps:$4 sm:$0xff]   ;;  %v7801_v6 = vld [vmem:[#allocation9 + $0x4ec] ss:$16 sps:$4 sm:$0xff]  }
 0x3ff   : > { %2669 = vmatpush1.bf16.msra.mxu0 %v7730_v7  ;;  %2755 = vmatpush1.bf16.msra.mxu1 %v7733_v8  ;;  %v7796_v7 = vld [vmem:[#allocation9 + $0x4e0] ss:$16 sps:$4 sm:$0xff]   ;;  %v7799_v8 = vld [vmem:[#allocation9 + $0x4e8] ss:$16 sps:$4 sm:$0xff]  }
 0x400   : > { %2670 = vmatprep.subr.bf16.mxu0 %v7738_v9  ;;  %2756 = vmatprep.subr.bf16.mxu1 %v7741_v10  ;;  %v7804_v9 = vld [vmem:[#allocation9 + $0x504] ss:$16 sps:$4 sm:$0xff]   ;;  %v7807_v10 = vld [vmem:[#allocation9 + $0x50c] ss:$16 sps:$4 sm:$0xff]  }
 0x403   : > { %2671 = vmatpush1.bf16.msra.mxu0 %v7736_v11  ;;  %2757 = vmatpush1.bf16.msra.mxu1 %v7739_v12  ;;  %v7802_v11 = vld [vmem:[#allocation9 + $0x500] ss:$16 sps:$4 sm:$0xff]   ;;  %v7805_v12 = vld [vmem:[#allocation9 + $0x508] ss:$16 sps:$4 sm:$0xff]  }
 0x404   : > { %2672 = vmatprep.subr.bf16.mxu0 %v7744_v15  ;;  %2758 = vmatprep.subr.bf16.mxu1 %v7747_v16  ;;  %v7810_v15 = vld [vmem:[#allocation9 + $0x524] ss:$16 sps:$4 sm:$0xff]   ;;  %v7813_v16 = vld [vmem:[#allocation9 + $0x52c] ss:$16 sps:$4 sm:$0xff]  }
 0x407   : > { %2673 = vmatpush1.bf16.msra.mxu0 %v7742_v17  ;;  %2759 = vmatpush1.bf16.msra.mxu1 %v7745_v18  ;;  %v7808_v17 = vld [vmem:[#allocation9 + $0x520] ss:$16 sps:$4 sm:$0xff]   ;;  %v7811_v18 = vld [vmem:[#allocation9 + $0x528] ss:$16 sps:$4 sm:$0xff]  }
 0x408   : > { %2674 = vmatprep.subr.bf16.mxu0 %v7750_v19  ;;  %2760 = vmatprep.subr.bf16.mxu1 %v7753_v20  ;;  %v7816_v19 = vld [vmem:[#allocation9 + $0x544] ss:$16 sps:$4 sm:$0xff]   ;;  %v7819_v20 = vld [vmem:[#allocation9 + $0x54c] ss:$16 sps:$4 sm:$0xff]  }
 0x40b   : > { %2675 = vmatpush1.bf16.msra.mxu0 %v7748_v21  ;;  %2761 = vmatpush1.bf16.msra.mxu1 %v7751_v22  ;;  %v7814_v21 = vld [vmem:[#allocation9 + $0x540] ss:$16 sps:$4 sm:$0xff]   ;;  %v7817_v22 = vld [vmem:[#allocation9 + $0x548] ss:$16 sps:$4 sm:$0xff]  }
 0x40c   : > { %2676 = vmatprep.subr.bf16.mxu0 %v7756_v23  ;;  %2762 = vmatprep.subr.bf16.mxu1 %v7759_v24  ;;  %v7822_v23 = vld [vmem:[#allocation9 + $0x564] ss:$16 sps:$4 sm:$0xff]   ;;  %v7825_v24 = vld [vmem:[#allocation9 + $0x56c] ss:$16 sps:$4 sm:$0xff]  }
 0x40f   : > { %2677 = vmatpush1.bf16.msra.mxu0 %v7754_v25  ;;  %2763 = vmatpush1.bf16.msra.mxu1 %v7757_v26  ;;  %v7820_v25 = vld [vmem:[#allocation9 + $0x560] ss:$16 sps:$4 sm:$0xff]   ;;  %v7823_v26 = vld [vmem:[#allocation9 + $0x568] ss:$16 sps:$4 sm:$0xff]  }
 0x410   : > { %2678 = vmatprep.subr.bf16.mxu0 %v7762_v27  ;;  %2764 = vmatprep.subr.bf16.mxu1 %v7765_v28  ;;  %v7828_v27 = vld [vmem:[#allocation9 + $0x584] ss:$16 sps:$4 sm:$0xff]   ;;  %v7831_v28 = vld [vmem:[#allocation9 + $0x58c] ss:$16 sps:$4 sm:$0xff]  }
 0x413   : > { %2679 = vmatpush1.bf16.msra.mxu0 %v7760_v29  ;;  %2765 = vmatpush1.bf16.msra.mxu1 %v7763_v31  ;;  %v7826_v29 = vld [vmem:[#allocation9 + $0x580] ss:$16 sps:$4 sm:$0xff]   ;;  %v7829_v31 = vld [vmem:[#allocation9 + $0x588] ss:$16 sps:$4 sm:$0xff]  }
 0x414   : > { %2691 = vmatprep.subr.bf16.mxu0 %v7768_v32  ;;  %2777 = vmatprep.subr.bf16.mxu1 %v7771_v33  ;;  %v7834_v32 = vld [vmem:[#allocation9 + $0x5a4] ss:$16 sps:$4 sm:$0xff]   ;;  %v7837_v33 = vld [vmem:[#allocation9 + $0x5ac] ss:$16 sps:$4 sm:$0xff]  }
 0x416   : > { %2681 = vmatmul.mubr.bf16.vlgmr.msra.gmra.mrb[12].mxu0 %v1570_v38  ;;  %2767 = vmatmul.mubr.bf16.vlgmr.msra.gmra.mrb[20].mxu1 %v1570_v38  ;;  %v7838_v38 = vld [vmem:[#allocation9 + $0x5c0] ss:$16 sps:$4 sm:$0xff]  }
 0x417   : > { %2692 = vmatpush1.bf16.msra.mxu0 %v7766_v36  ;;  %2778 = vmatpush1.bf16.msra.mxu1 %v7769_v37  ;;  %v7840_v36 = vld [vmem:[#allocation9 + $0x5c4] ss:$16 sps:$4 sm:$0xff]   ;;  %v7843_v37 = vld [vmem:[#allocation9 + $0x5cc] ss:$16 sps:$4 sm:$0xff]  }
 0x418   : > { %2693 = vmatprep.subr.bf16.mxu0 %v7774_v39  ;;  %2779 = vmatprep.subr.bf16.mxu1 %v7777_v40  ;;  %v7841_v39 = vld [vmem:[#allocation9 + $0x5c8] ss:$16 sps:$4 sm:$0xff]   ;;  %v7846_v40 = vld [vmem:[#allocation9 + $0x5e4] ss:$16 sps:$4 sm:$0xff]  }
 0x419   : > { %2723 = vmatprep.mubr.bf16.mxu0 %v8440_v1  ;;  %2809 = vmatprep.mubr.bf16.mxu1 %v8440_v1 }
 0x41b   : > { %2694 = vmatpush1.bf16.msra.mxu0 %v7772_v41  ;;  %2780 = vmatpush1.bf16.msra.mxu1 %v7775_v49  ;;  %v7849_v41 = vld [vmem:[#allocation9 + $0x5ec] ss:$16 sps:$4 sm:$0xff]   ;;  %v7844_v49 = vld [vmem:[#allocation9 + $0x5e0] ss:$16 sps:$4 sm:$0xff]  }
 0x41c   : > { %3273 = vmatprep.subr.bf16.mxu0 %v7780_v50  ;;  %3359 = vmatprep.subr.bf16.mxu1 %v7783_v53  ;;  %v7847_v50 = vld [vmem:[#allocation9 + $0x5e8] ss:$16 sps:$4 sm:$0xff]   ;;  %v7852_v53 = vld [vmem:[#allocation9 + $0x604] ss:$16 sps:$4 sm:$0xff]  }
 0x422   : > { %6545 = vmatmul.mubr.msk.bf16.vlgmr.msra.gmra.mrb[12].mxu0 %vm344_vm0, %v1572_v59  ;;  %6546 = vmatmul.mubr.msk.bf16.vlgmr.msra.gmra.mrb[20].mxu1 %vm344_vm0, %v1572_v59  ;;  %v7859_v59 = vld [vmem:[#allocation9 + $0x628] ss:$16 sps:$4 sm:$0xff]  }
 0x423   : > { %3274 = vmatpush1.bf16.msra.mxu0 %v7778_v56  ;;  %3360 = vmatpush1.bf16.msra.mxu1 %v7781_v57  ;;  %v7858_v56 = vld [vmem:[#allocation9 + $0x624] ss:$16 sps:$4 sm:$0xff]   ;;  %v7861_v57 = vld [vmem:[#allocation9 + $0x62c] ss:$16 sps:$4 sm:$0xff]  }
 0x424   : > { %3305 = vmatprep.mubr.bf16.mxu0 %v2906_v62  ;;  %3391 = vmatprep.mubr.bf16.mxu1 %v2906_v62  ;;  %v7862_v62 = vld [vmem:[#allocation9 + $0x640] ss:$16 sps:$4 sm:$0xff]  }
 0x425   : > { %3275 = vmatprep.subr.bf16.mxu0 %v7786_v60  ;;  %3361 = vmatprep.subr.bf16.mxu1 %v7789_v61  ;;  %v7864_v60 = vld [vmem:[#allocation9 + $0x644] ss:$16 sps:$4 sm:$0xff]   ;;  %v7867_v61 = vld [vmem:[#allocation9 + $0x64c] ss:$16 sps:$4 sm:$0xff]  }
 0x427   : > { %3276 = vmatpush1.bf16.msra.mxu0 %v7784_v63  ;;  %3362 = vmatpush1.bf16.msra.mxu1 %v7787_v0  ;;  %v7865_v63 = vld [vmem:[#allocation9 + $0x648] ss:$16 sps:$4 sm:$0xff]   ;;  %v7870_v0 = vld [vmem:[#allocation9 + $0x664] ss:$16 sps:$4 sm:$0xff]  }
 0x428   : > { %3277 = vmatprep.subr.bf16.mxu0 %v7792_v2  ;;  %3363 = vmatprep.subr.bf16.mxu1 %v7795_v3  ;;  %v7873_v2 = vld [vmem:[#allocation9 + $0x66c] ss:$16 sps:$4 sm:$0xff]  }
 0x429   : > { %v8783_v3 = vld [vmem:[#allocation3 + $0x18] sm:$0xff] }
 0x42b   : > { %3278 = vmatpush1.bf16.msra.mxu0 %v7790_v30  ;;  %3364 = vmatpush1.bf16.msra.mxu1 %v7793_v4  ;;  %v7868_v30 = vld [vmem:[#allocation9 + $0x660] ss:$16 sps:$4 sm:$0xff]   ;;  %v7871_v4 = vld [vmem:[#allocation9 + $0x668] ss:$16 sps:$4 sm:$0xff]  }
 0x42c   : > { %3279 = vmatprep.subr.bf16.mxu0 %v7798_v5  ;;  %3365 = vmatprep.subr.bf16.mxu1 %v7801_v6  ;;  %v2820_v5 = vld [vmem:[#allocation3] sm:$0xfc] }
 0x42d   : > { %v2826_v6 = vpack.c.bf16 %v8783_v3, %v2820_v5  ;;  %v7922_v5 = vld [vmem:[#allocation9 + $0x780] ss:$16 sps:$4 sm:$0xff]  }
 0x42f   : > { %3280 = vmatpush1.bf16.msra.mxu0 %v7796_v7  ;;  %3366 = vmatpush1.bf16.msra.mxu1 %v7799_v8  ;;  %v7876_v7 = vld [vmem:[#allocation9 + $0x684] ss:$16 sps:$4 sm:$0xff]   ;;  %v7879_v8 = vld [vmem:[#allocation9 + $0x68c] ss:$16 sps:$4 sm:$0xff]  }
 0x430   : > { %3281 = vmatprep.subr.bf16.mxu0 %v7804_v9  ;;  %3367 = vmatprep.subr.bf16.mxu1 %v7807_v10  ;;  %v8786_v9 = vld [vmem:[#allocation3 + $0x20] sm:$0xff]  ;;  %v3454_v10 = vld [vmem:[#allocation3 + $0x8] sm:$0xf8] }
 0x433   : > { %3282 = vmatpush1.bf16.msra.mxu0 %v7802_v11  ;;  %3368 = vmatpush1.bf16.msra.mxu1 %v7805_v12  ;;  %v7874_v11 = vld [vmem:[#allocation9 + $0x680] ss:$16 sps:$4 sm:$0xff]   ;;  %v7877_v12 = vld [vmem:[#allocation9 + $0x688] ss:$16 sps:$4 sm:$0xff]  }
 0x434   : > { %3283 = vmatprep.subr.bf16.mxu0 %v7810_v15  ;;  %3369 = vmatprep.subr.bf16.mxu1 %v7813_v16  ;;  %v3460_v15 = vld [vmem:[#allocation3 + $0x38] sm:$0x1]  ;;  %v3463_v16 = vpack.c.bf16 %v8786_v9, %v3454_v10  ;;  %v7928_v10 = vld [vmem:[#allocation9 + $0x7a0] ss:$16 sps:$4 sm:$0xff]  }
 0x437   : > { %3284 = vmatpush1.bf16.msra.mxu0 %v7808_v17  ;;  %3370 = vmatpush1.bf16.msra.mxu1 %v7811_v18  ;;  %v2905_v17 = vrot.slane %v2826_v6, 1  ;;  %v7882_v18 = vld [vmem:[#allocation9 + $0x6a4] ss:$16 sps:$4 sm:$0xff]   ;;  %v7925_v6 = vld [vmem:[#allocation9 + $0x788] ss:$16 sps:$4 sm:$0xff]  }
 0x438   : > { %3285 = vmatprep.subr.bf16.mxu0 %v7816_v19  ;;  %3371 = vmatprep.subr.bf16.mxu1 %v7819_v20  ;;  %v7885_v19 = vld [vmem:[#allocation9 + $0x6ac] ss:$16 sps:$4 sm:$0xff]   ;;  %v7880_v20 = vld [vmem:[#allocation9 + $0x6a0] ss:$16 sps:$4 sm:$0xff]  }
 0x43b   : > { %3286 = vmatpush1.bf16.msra.mxu0 %v7814_v21  ;;  %3372 = vmatpush1.bf16.msra.mxu1 %v7817_v22  ;;  %v7883_v21 = vld [vmem:[#allocation9 + $0x6a8] ss:$16 sps:$4 sm:$0xff]   ;;  %v3466_v22 = vpack.c.bf16 %v3460_v15, %v3460_v15  ;;  %v7939_v15 = vld [vmem:[#allocation9 + $0x7cc] ss:$16 sps:$4 sm:$0xff]  }
 0x43c   : > { %3287 = vmatprep.subr.bf16.mxu0 %v7822_v23  ;;  %3373 = vmatprep.subr.bf16.mxu1 %v7825_v24  ;;  %v3556_v23 = vshrl.u32 %v3463_v16, 16  ;;  %v3559_v24 = vshll.u32 %v3463_v16, 16  ;;  %v7934_v16 = vld [vmem:[#allocation9 + $0x7c0] ss:$16 sps:$4 sm:$0xff]  }
 0x43f   : > { %3288 = vmatpush1.bf16.msra.mxu0 %v7820_v25  ;;  %3374 = vmatpush1.bf16.msra.mxu1 %v7823_v26  ;;  %v7888_v25 = vld [vmem:[#allocation9 + $0x6c4] ss:$16 sps:$4 sm:$0xff]   ;;  %v7891_v26 = vld [vmem:[#allocation9 + $0x6cc] ss:$16 sps:$4 sm:$0xff]  }
 0x440   : > { %3289 = vmatprep.subr.bf16.mxu0 %v7828_v27  ;;  %3375 = vmatprep.subr.bf16.mxu1 %v7831_v28  ;;  %v2822_v27 = vld [vmem:[#allocation3 + $0x10] sm:$0xfc]  ;;  %v3558_v28 = vrot.slane %v3556_v23, 1  ;;  %v7951_v23 = vld [vmem:[#allocation9 + $0x80c] ss:$16 sps:$4 sm:$0xff]  }
 0x443   : > { %3290 = vmatpush1.bf16.msra.mxu0 %v7826_v29  ;;  %3376 = vmatpush1.bf16.msra.mxu1 %v7829_v31  ;;  %v3561_v29 = vrot.slane %v3559_v24, 2  ;;  %v3564_v31 = vshll.u32 %v3466_v22, 16  ;;  %v7948_v22 = vld [vmem:[#allocation9 + $0x804] ss:$16 sps:$4 sm:$0xff]   ;;  %v7946_v24 = vld [vmem:[#allocation9 + $0x800] ss:$16 sps:$4 sm:$0xff]  }
 0x444   : > { %3291 = vmatprep.subr.bf16.mxu0 %v7834_v32  ;;  %3377 = vmatprep.subr.bf16.mxu1 %v7837_v33  ;;  %v2828_v32 = vpack.c.bf16 %v8768_v45, %v2822_v27  ;;  %v7886_v33 = vld [vmem:[#allocation9 + $0x6c0] ss:$16 sps:$4 sm:$0xff]   ;;  %v7900_v45 = vld [vmem:[#allocation9 + $0x704] ss:$16 sps:$4 sm:$0xff]   ;;  %v7957_v27 = vld [vmem:[#allocation9 + $0x82c] ss:$16 sps:$4 sm:$0xff]  }
 0x447   : > { %3292 = vmatpush1.bf16.msra.mxu0 %v7832_v34  ;;  %3378 = vmatpush1.bf16.msra.mxu1 %v7835_v35  ;;  %v7889_v34 = vld [vmem:[#allocation9 + $0x6c8] ss:$16 sps:$4 sm:$0xff]   ;;  %v3562_v35 = vor.u32 %v3561_v29, %v3558_v28  ;;  %v7952_v28 = vld [vmem:[#allocation9 + $0x820] ss:$16 sps:$4 sm:$0xff]  }
 0x448   : > { %3293 = vmatprep.subr.bf16.mxu0 %v7840_v36  ;;  %3379 = vmatprep.subr.bf16.mxu1 %v7843_v37  ;;  %v3566_v36 = vrot.slane %v3564_v31, 2  ;;  %v2907_v37 = vrot.slane %v2828_v32, 1  ;;  %v7955_v29 = vld [vmem:[#allocation9 + $0x828] ss:$16 sps:$4 sm:$0xff]   ;;  %v7960_v31 = vld [vmem:[#allocation9 + $0x844] ss:$16 sps:$4 sm:$0xff]  }
 0x449   : > { %v7963_v32 = vld [vmem:[#allocation9 + $0x84c] ss:$16 sps:$4 sm:$0xff]  }
 0x44b   : > { %3294 = vmatpush1.bf16.msra.mxu0 %v7838_v38  ;;  %3380 = vmatpush1.bf16.msra.mxu1 %v7841_v39  ;;  %v7894_v38 = vld [vmem:[#allocation9 + $0x6e4] ss:$16 sps:$4 sm:$0xff]   ;;  %v7897_v39 = vld [vmem:[#allocation9 + $0x6ec] ss:$16 sps:$4 sm:$0xff]  }
 0x44c   : > { %3295 = vmatprep.subr.bf16.mxu0 %v7846_v40  ;;  %3381 = vmatprep.subr.bf16.mxu1 %v7849_v41  ;;  %v3567_v40 = vsel %vm3541_vm1, %v3562_v35, %v3566_v36  ;;  %v7892_v41 = vld [vmem:[#allocation9 + $0x6e0] ss:$16 sps:$4 sm:$0xff]   ;;  %v7966_v35 = vld [vmem:[#allocation9 + $0x864] ss:$16 sps:$4 sm:$0xff]   ;;  %v7969_v36 = vld [vmem:[#allocation9 + $0x86c] ss:$16 sps:$4 sm:$0xff]  }
 0x44f   : > { %3296 = vmatpush1.bf16.msra.mxu0 %v7844_v49  ;;  %3382 = vmatpush1.bf16.msra.mxu1 %v7847_v50  ;;  %v7895_v49 = vld [vmem:[#allocation9 + $0x6e8] ss:$16 sps:$4 sm:$0xff]   ;;  %v7903_v50 = vld [vmem:[#allocation9 + $0x70c] ss:$16 sps:$4 sm:$0xff]  }
 0x450   : > { %3297 = vmatprep.subr.bf16.mxu0 %v7852_v53  ;;  %3383 = vmatprep.subr.bf16.mxu1 %v7855_v51  ;;  %v7898_v53 = vld [vmem:[#allocation9 + $0x700] ss:$16 sps:$4 sm:$0xff]   ;;  %v7901_v51 = vld [vmem:[#allocation9 + $0x708] ss:$16 sps:$4 sm:$0xff]  }
 0x453   : > { %3298 = vmatpush1.bf16.msra.mxu0 %v7850_v52  ;;  %3384 = vmatpush1.bf16.msra.mxu1 %v7853_v42  ;;  %v7906_v52 = vld [vmem:[#allocation9 + $0x724] ss:$16 sps:$4 sm:$0xff]   ;;  %v7909_v42 = vld [vmem:[#allocation9 + $0x72c] ss:$16 sps:$4 sm:$0xff]  }
 0x454   : > { %3299 = vmatprep.subr.bf16.mxu0 %v7858_v56  ;;  %3385 = vmatprep.subr.bf16.mxu1 %v7861_v57  ;;  %v7904_v56 = vld [vmem:[#allocation9 + $0x720] ss:$16 sps:$4 sm:$0xff]   ;;  %v7907_v57 = vld [vmem:[#allocation9 + $0x728] ss:$16 sps:$4 sm:$0xff]  }
 0x457   : > { %3300 = vmatpush1.bf16.msra.mxu0 %v7856_v58  ;;  %3386 = vmatpush1.bf16.msra.mxu1 %v7859_v59  ;;  %v7912_v58 = vld [vmem:[#allocation9 + $0x744] ss:$16 sps:$4 sm:$0xff]   ;;  %v7915_v59 = vld [vmem:[#allocation9 + $0x74c] ss:$16 sps:$4 sm:$0xff]  }
 0x458   : > { %3301 = vmatprep.subr.bf16.mxu0 %v7864_v60  ;;  %3387 = vmatprep.subr.bf16.mxu1 %v7867_v61  ;;  %v7910_v60 = vld [vmem:[#allocation9 + $0x740] ss:$16 sps:$4 sm:$0xff]   ;;  %v7913_v61 = vld [vmem:[#allocation9 + $0x748] ss:$16 sps:$4 sm:$0xff]  }
 0x45b   : > { %3302 = vmatpush1.bf16.msra.mxu0 %v7862_v62  ;;  %3388 = vmatpush1.bf16.msra.mxu1 %v7865_v63  ;;  %v7918_v62 = vld [vmem:[#allocation9 + $0x764] ss:$16 sps:$4 sm:$0xff]   ;;  %v7921_v63 = vld [vmem:[#allocation9 + $0x76c] ss:$16 sps:$4 sm:$0xff]  }
 0x45c   : > { %3303 = vmatprep.subr.bf16.mxu0 %v7870_v0  ;;  %3389 = vmatprep.subr.bf16.mxu1 %v7873_v2  ;;  %v7916_v0 = vld [vmem:[#allocation9 + $0x760] ss:$16 sps:$4 sm:$0xff]   ;;  %v7919_v2 = vld [vmem:[#allocation9 + $0x768] ss:$16 sps:$4 sm:$0xff]  }
 0x45f   : > { %3304 = vmatpush1.bf16.msra.mxu0 %v7868_v30  ;;  %3390 = vmatpush1.bf16.msra.mxu1 %v7871_v4  ;;  %v7924_v30 = vld [vmem:[#allocation9 + $0x784] ss:$16 sps:$4 sm:$0xff]   ;;  %v7927_v4 = vld [vmem:[#allocation9 + $0x78c] ss:$16 sps:$4 sm:$0xff]  }
 0x460   : > { %3316 = vmatprep.subr.bf16.mxu0 %v7876_v7  ;;  %3402 = vmatprep.subr.bf16.mxu1 %v7879_v8  ;;  %v7930_v7 = vld [vmem:[#allocation9 + $0x7a4] ss:$16 sps:$4 sm:$0xff]   ;;  %v7933_v8 = vld [vmem:[#allocation9 + $0x7ac] ss:$16 sps:$4 sm:$0xff]  }
 0x462   : > { %3306 = vmatmul.mubr.bf16.vlgmr.msra.gmra.mrb[12].mxu0 %v2905_v17  ;;  %3392 = vmatmul.mubr.bf16.vlgmr.msra.gmra.mrb[20].mxu1 %v2905_v17  ;;  %v7937_v17 = vld [vmem:[#allocation9 + $0x7c8] ss:$16 sps:$4 sm:$0xff]  }
 0x463   : > { %3317 = vmatpush1.bf16.msra.mxu0 %v7874_v11  ;;  %3403 = vmatpush1.bf16.msra.mxu1 %v7877_v12  ;;  %v7931_v11 = vld [vmem:[#allocation9 + $0x7a8] ss:$16 sps:$4 sm:$0xff]   ;;  %v7936_v12 = vld [vmem:[#allocation9 + $0x7c4] ss:$16 sps:$4 sm:$0xff]  }
 0x464   : > { %3318 = vmatprep.subr.bf16.mxu0 %v7882_v18  ;;  %3404 = vmatprep.subr.bf16.mxu1 %v7885_v19  ;;  %v7942_v18 = vld [vmem:[#allocation9 + $0x7e4] ss:$16 sps:$4 sm:$0xff]   ;;  %v7945_v19 = vld [vmem:[#allocation9 + $0x7ec] ss:$16 sps:$4 sm:$0xff]  }
 0x465   : > { %3348 = vmatprep.mubr.bf16.mxu0 %v8440_v1  ;;  %3434 = vmatprep.mubr.bf16.mxu1 %v8440_v1 }
 0x467   : > { %3319 = vmatpush1.bf16.msra.mxu0 %v7880_v20  ;;  %3405 = vmatpush1.bf16.msra.mxu1 %v7883_v21  ;;  %v7940_v20 = vld [vmem:[#allocation9 + $0x7e0] ss:$16 sps:$4 sm:$0xff]   ;;  %v7943_v21 = vld [vmem:[#allocation9 + $0x7e8] ss:$16 sps:$4 sm:$0xff]  }
 0x468   : > { %3946 = vmatprep.subr.bf16.mxu0 %v7888_v25  ;;  %4032 = vmatprep.subr.bf16.mxu1 %v7891_v26  ;;  %v7949_v25 = vld [vmem:[#allocation9 + $0x808] ss:$16 sps:$4 sm:$0xff]   ;;  %v7954_v26 = vld [vmem:[#allocation9 + $0x824] ss:$16 sps:$4 sm:$0xff]  }
 0x46e   : > { %6619 = vmatmul.mubr.msk.bf16.vlgmr.msra.gmra.mrb[12].mxu0 %vm344_vm0, %v2907_v37  ;;  %6620 = vmatmul.mubr.msk.bf16.vlgmr.msra.gmra.mrb[20].mxu1 %vm344_vm0, %v2907_v37  ;;  %v3453_v37 = vld [vmem:[#allocation3] sm:$0xf8] }
 0x46f   : > { %3947 = vmatpush1.bf16.msra.mxu0 %v7886_v33  ;;  %4033 = vmatpush1.bf16.msra.mxu1 %v7889_v34  ;;  %v7958_v33 = vld [vmem:[#allocation9 + $0x840] ss:$16 sps:$4 sm:$0xff]   ;;  %v7961_v34 = vld [vmem:[#allocation9 + $0x848] ss:$16 sps:$4 sm:$0xff]  }
 0x470   : > { %3978 = vmatprep.mubr.bf16.mxu0 %v3567_v40  ;;  %4064 = vmatprep.mubr.bf16.mxu1 %v3567_v40  ;;  %v7964_v40 = vld [vmem:[#allocation9 + $0x860] ss:$16 sps:$4 sm:$0xff]  }
 0x471   : > { %3948 = vmatprep.subr.bf16.mxu0 %v7894_v38  ;;  %4034 = vmatprep.subr.bf16.mxu1 %v7897_v39  ;;  %v3462_v38 = vpack.c.bf16 %v8783_v3, %v3453_v37  ;;  %v3459_v39 = vld [vmem:[#allocation3 + $0x30] sm:$0x1]  ;;  %v8023_v37 = vld [vmem:[#allocation9 + $0x98c] ss:$16 sps:$4 sm:$0xff]  }
 0x473   : > { %3949 = vmatpush1.bf16.msra.mxu0 %v7892_v41  ;;  %4035 = vmatpush1.bf16.msra.mxu1 %v7895_v49  ;;  %v7967_v41 = vld [vmem:[#allocation9 + $0x868] ss:$16 sps:$4 sm:$0xff]   ;;  %v7972_v49 = vld [vmem:[#allocation9 + $0x884] ss:$16 sps:$4 sm:$0xff]  }
 0x474   : > { %3950 = vmatprep.subr.bf16.mxu0 %v7900_v45  ;;  %4036 = vmatprep.subr.bf16.mxu1 %v7903_v50  ;;  %v7975_v45 = vld [vmem:[#allocation9 + $0x88c] ss:$16 sps:$4 sm:$0xff]   ;;  %v3465_v50 = vpack.c.bf16 %v3459_v39, %v3459_v39  ;;  %v8021_v39 = vld [vmem:[#allocation9 + $0x988] ss:$16 sps:$4 sm:$0xff]  }
 0x477   : > { %3951 = vmatpush1.bf16.msra.mxu0 %v7898_v53  ;;  %4037 = vmatpush1.bf16.msra.mxu1 %v7901_v51  ;;  %v3543_v53 = vshrl.u32 %v3462_v38, 16  ;;  %v3546_v51 = vshll.u32 %v3462_v38, 16  ;;  %v8018_v38 = vld [vmem:[#allocation9 + $0x980] ss:$16 sps:$4 sm:$0xff]  }
 0x478   : > { %3952 = vmatprep.subr.bf16.mxu0 %v7906_v52  ;;  %4038 = vmatprep.subr.bf16.mxu1 %v7909_v42  ;;  %v7970_v52 = vld [vmem:[#allocation9 + $0x880] ss:$16 sps:$4 sm:$0xff]   ;;  %v7973_v42 = vld [vmem:[#allocation9 + $0x888] ss:$16 sps:$4 sm:$0xff]  }
 0x47b   : > { %3953 = vmatpush1.bf16.msra.mxu0 %v7904_v56  ;;  %4039 = vmatpush1.bf16.msra.mxu1 %v7907_v57  ;;  %v7978_v56 = vld [vmem:[#allocation9 + $0x8a4] ss:$16 sps:$4 sm:$0xff]   ;;  %v7981_v57 = vld [vmem:[#allocation9 + $0x8ac] ss:$16 sps:$4 sm:$0xff]  }
 0x47c   : > { %3954 = vmatprep.subr.bf16.mxu0 %v7912_v58  ;;  %4040 = vmatprep.subr.bf16.mxu1 %v7915_v59  ;;  %v3545_v58 = vrot.slane %v3543_v53, 1  ;;  %v3548_v59 = vrot.slane %v3546_v51, 2  ;;  %v8035_v53 = vld [vmem:[#allocation9 + $0x9cc] ss:$16 sps:$4 sm:$0xff]   ;;  %v8030_v51 = vld [vmem:[#allocation9 + $0x9c0] ss:$16 sps:$4 sm:$0xff]  }
 0x47f   : > { %3955 = vmatpush1.bf16.msra.mxu0 %v7910_v60  ;;  %4041 = vmatpush1.bf16.msra.mxu1 %v7913_v61  ;;  %v3551_v60 = vshll.u32 %v3465_v50, 16  ;;  %v7976_v61 = vld [vmem:[#allocation9 + $0x8a0] ss:$16 sps:$4 sm:$0xff]   ;;  %v8032_v50 = vld [vmem:[#allocation9 + $0x9c4] ss:$16 sps:$4 sm:$0xff]  }
 0x480   : > { %3956 = vmatprep.subr.bf16.mxu0 %v7918_v62  ;;  %4042 = vmatprep.subr.bf16.mxu1 %v7921_v63  ;;  %v7979_v62 = vld [vmem:[#allocation9 + $0x8a8] ss:$16 sps:$4 sm:$0xff]   ;;  %v7984_v63 = vld [vmem:[#allocation9 + $0x8c4] ss:$16 sps:$4 sm:$0xff]  }
 0x483   : > { %3957 = vmatpush1.bf16.msra.mxu0 %v7916_v0  ;;  %4043 = vmatpush1.bf16.msra.mxu1 %v7919_v2  ;;  %v7987_v0 = vld [vmem:[#allocation9 + $0x8cc] ss:$16 sps:$4 sm:$0xff]   ;;  %v3549_v2 = vor.u32 %v3548_v59, %v3545_v58  ;;  %v8039_v58 = vld [vmem:[#allocation9 + $0x9e8] ss:$16 sps:$4 sm:$0xff]   ;;  %v8044_v59 = vld [vmem:[#allocation9 + $0xa04] ss:$16 sps:$4 sm:$0xff]  }
 0x484   : > { %3958 = vmatprep.subr.bf16.mxu0 %v7924_v30  ;;  %4044 = vmatprep.subr.bf16.mxu1 %v7927_v4  ;;  %v3553_v30 = vrot.slane %v3551_v60, 2  ;;  %v7982_v4 = vld [vmem:[#allocation9 + $0x8c0] ss:$16 sps:$4 sm:$0xff]   ;;  %v8047_v60 = vld [vmem:[#allocation9 + $0xa0c] ss:$16 sps:$4 sm:$0xff]  }
 0x487   : > { %3959 = vmatpush1.bf16.msra.mxu0 %v7922_v5  ;;  %4045 = vmatpush1.bf16.msra.mxu1 %v7925_v6  ;;  %v7985_v5 = vld [vmem:[#allocation9 + $0x8c8] ss:$16 sps:$4 sm:$0xff]   ;;  %v7990_v6 = vld [vmem:[#allocation9 + $0x8e4] ss:$16 sps:$4 sm:$0xff]  }
 0x488   : > { %3960 = vmatprep.subr.bf16.mxu0 %v7930_v7  ;;  %4046 = vmatprep.subr.bf16.mxu1 %v7933_v8  ;;  %v7993_v7 = vld [vmem:[#allocation9 + $0x8ec] ss:$16 sps:$4 sm:$0xff]   ;;  %v3554_v8 = vsel %vm3541_vm1, %v3549_v2, %v3553_v30  ;;  %v8048_v2 = vld [vmem:[#allocation9 + $0xa20] ss:$16 sps:$4 sm:$0xff]   ;;  %v8051_v30 = vld [vmem:[#allocation9 + $0xa28] ss:$16 sps:$4 sm:$0xff]  }
 0x48b   : > { %3961 = vmatpush1.bf16.msra.mxu0 %v7928_v10  ;;  %4047 = vmatpush1.bf16.msra.mxu1 %v7931_v11  ;;  %v7988_v10 = vld [vmem:[#allocation9 + $0x8e0] ss:$16 sps:$4 sm:$0xff]   ;;  %v7991_v11 = vld [vmem:[#allocation9 + $0x8e8] ss:$16 sps:$4 sm:$0xff]  }
 0x48c   : > { %3962 = vmatprep.subr.bf16.mxu0 %v7936_v12  ;;  %4048 = vmatprep.subr.bf16.mxu1 %v7939_v15  ;;  %v7996_v12 = vld [vmem:[#allocation9 + $0x904] ss:$16 sps:$4 sm:$0xff]   ;;  %v7999_v15 = vld [vmem:[#allocation9 + $0x90c] ss:$16 sps:$4 sm:$0xff]  }
 0x48f   : > { %3963 = vmatpush1.bf16.msra.mxu0 %v7934_v16  ;;  %4049 = vmatpush1.bf16.msra.mxu1 %v7937_v17  ;;  %v4130_v16 = vld [vmem:[#allocation3 + $0x38] sm:$0x3]  ;;  %v4127_v17 = vld [vmem:[#allocation3 + $0x8] sm:$0xf0] }
 0x490   : > { %3964 = vmatprep.subr.bf16.mxu0 %v7942_v18  ;;  %4050 = vmatprep.subr.bf16.mxu1 %v7945_v19  ;;  %v4133_v18 = vpack.c.bf16 %v8786_v9, %v4127_v17  ;;  %v4136_v19 = vpack.c.bf16 %v4130_v16, %v4130_v16  ;;  %v8071_v16 = vld [vmem:[#allocation9 + $0xa8c] ss:$16 sps:$4 sm:$0xff]   ;;  %v8066_v17 = vld [vmem:[#allocation9 + $0xa80] ss:$16 sps:$4 sm:$0xff]  }
 0x493   : > { %3965 = vmatpush1.bf16.msra.mxu0 %v7940_v20  ;;  %4051 = vmatpush1.bf16.msra.mxu1 %v7943_v21  ;;  %v7994_v20 = vld [vmem:[#allocation9 + $0x900] ss:$16 sps:$4 sm:$0xff]   ;;  %v7997_v21 = vld [vmem:[#allocation9 + $0x908] ss:$16 sps:$4 sm:$0xff]  }
 0x494   : > { %3966 = vmatprep.subr.bf16.mxu0 %v7948_v22  ;;  %4052 = vmatprep.subr.bf16.mxu1 %v7951_v23  ;;  %v4221_v22 = vrot.slane %v4133_v18, 2  ;;  %v4222_v23 = vrot.slane %v4136_v19, 2  ;;  %v8069_v18 = vld [vmem:[#allocation9 + $0xa88] ss:$16 sps:$4 sm:$0xff]   ;;  %v8074_v19 = vld [vmem:[#allocation9 + $0xaa4] ss:$16 sps:$4 sm:$0xff]  }
 0x496   : > { %v4223_v9 = vsel %vm4217_vm2, %v4221_v22, %v4222_v23  ;;  %v8075_v22 = vld [vmem:[#allocation9 + $0xaa8] ss:$16 sps:$4 sm:$0xff]   ;;  %v8080_v23 = vld [vmem:[#allocation9 + $0xac4] ss:$16 sps:$4 sm:$0xff]  }
 0x497   : > { %3967 = vmatpush1.bf16.msra.mxu0 %v7946_v24  ;;  %4053 = vmatpush1.bf16.msra.mxu1 %v7949_v25  ;;  %v8002_v24 = vld [vmem:[#allocation9 + $0x924] ss:$16 sps:$4 sm:$0xff]   ;;  %v8005_v25 = vld [vmem:[#allocation9 + $0x92c] ss:$16 sps:$4 sm:$0xff]  }
 0x498   : > { %3968 = vmatprep.subr.bf16.mxu0 %v7954_v26  ;;  %4054 = vmatprep.subr.bf16.mxu1 %v7957_v27  ;;  %v8000_v26 = vld [vmem:[#allocation9 + $0x920] ss:$16 sps:$4 sm:$0xff]   ;;  %v8003_v27 = vld [vmem:[#allocation9 + $0x928] ss:$16 sps:$4 sm:$0xff]  }
 0x49b   : > { %3969 = vmatpush1.bf16.msra.mxu0 %v7952_v28  ;;  %4055 = vmatpush1.bf16.msra.mxu1 %v7955_v29  ;;  %v8008_v28 = vld [vmem:[#allocation9 + $0x944] ss:$16 sps:$4 sm:$0xff]   ;;  %v8011_v29 = vld [vmem:[#allocation9 + $0x94c] ss:$16 sps:$4 sm:$0xff]  }
 0x49c   : > { %3970 = vmatprep.subr.bf16.mxu0 %v7960_v31  ;;  %4056 = vmatprep.subr.bf16.mxu1 %v7963_v32  ;;  %v8006_v31 = vld [vmem:[#allocation9 + $0x940] ss:$16 sps:$4 sm:$0xff]   ;;  %v8009_v32 = vld [vmem:[#allocation9 + $0x948] ss:$16 sps:$4 sm:$0xff]  }
 0x49f   : > { %3971 = vmatpush1.bf16.msra.mxu0 %v7958_v33  ;;  %4057 = vmatpush1.bf16.msra.mxu1 %v7961_v34  ;;  %v8017_v33 = vld [vmem:[#allocation9 + $0x96c] ss:$16 sps:$4 sm:$0xff]   ;;  %v8012_v34 = vld [vmem:[#allocation9 + $0x960] ss:$16 sps:$4 sm:$0xff]  }
 0x4a0   : > { %3972 = vmatprep.subr.bf16.mxu0 %v7966_v35  ;;  %4058 = vmatprep.subr.bf16.mxu1 %v7969_v36  ;;  %v8015_v35 = vld [vmem:[#allocation9 + $0x968] ss:$16 sps:$4 sm:$0xff]   ;;  %v8020_v36 = vld [vmem:[#allocation9 + $0x984] ss:$16 sps:$4 sm:$0xff]  }
 0x4a3   : > { %3973 = vmatpush1.bf16.msra.mxu0 %v7964_v40  ;;  %4059 = vmatpush1.bf16.msra.mxu1 %v7967_v41  ;;  %v8026_v40 = vld [vmem:[#allocation9 + $0x9a4] ss:$16 sps:$4 sm:$0xff]   ;;  %v8029_v41 = vld [vmem:[#allocation9 + $0x9ac] ss:$16 sps:$4 sm:$0xff]  }
 0x4a4   : > { %3974 = vmatprep.subr.bf16.mxu0 %v7972_v49  ;;  %4060 = vmatprep.subr.bf16.mxu1 %v7975_v45  ;;  %v8024_v49 = vld [vmem:[#allocation9 + $0x9a0] ss:$16 sps:$4 sm:$0xff]   ;;  %v8027_v45 = vld [vmem:[#allocation9 + $0x9a8] ss:$16 sps:$4 sm:$0xff]  }
 0x4a7   : > { %3975 = vmatpush1.bf16.msra.mxu0 %v7970_v52  ;;  %4061 = vmatpush1.bf16.msra.mxu1 %v7973_v42  ;;  %v8033_v52 = vld [vmem:[#allocation9 + $0x9c8] ss:$16 sps:$4 sm:$0xff]   ;;  %v8038_v42 = vld [vmem:[#allocation9 + $0x9e4] ss:$16 sps:$4 sm:$0xff]  }
 0x4a8   : > { %3976 = vmatprep.subr.bf16.mxu0 %v7978_v56  ;;  %4062 = vmatprep.subr.bf16.mxu1 %v7981_v57  ;;  %v8041_v56 = vld [vmem:[#allocation9 + $0x9ec] ss:$16 sps:$4 sm:$0xff]   ;;  %v8036_v57 = vld [vmem:[#allocation9 + $0x9e0] ss:$16 sps:$4 sm:$0xff]  }
 0x4ab   : > { %3977 = vmatpush1.bf16.msra.mxu0 %v7976_v61  ;;  %4063 = vmatpush1.bf16.msra.mxu1 %v7979_v62  ;;  %v8042_v61 = vld [vmem:[#allocation9 + $0xa00] ss:$16 sps:$4 sm:$0xff]   ;;  %v8045_v62 = vld [vmem:[#allocation9 + $0xa08] ss:$16 sps:$4 sm:$0xff]  }
 0x4ac   : > { %3989 = vmatprep.subr.bf16.mxu0 %v7984_v63  ;;  %4075 = vmatprep.subr.bf16.mxu1 %v7987_v0  ;;  %v8050_v63 = vld [vmem:[#allocation9 + $0xa24] ss:$16 sps:$4 sm:$0xff]   ;;  %v8053_v0 = vld [vmem:[#allocation9 + $0xa2c] ss:$16 sps:$4 sm:$0xff]  }
 0x4ae   : > { %3979 = vmatmul.mubr.bf16.vlgmr.msra.gmra.mrb[12].mxu0 %v3554_v8  ;;  %4065 = vmatmul.mubr.bf16.vlgmr.msra.gmra.mrb[20].mxu1 %v3554_v8  ;;  %v8062_v8 = vld [vmem:[#allocation9 + $0xa64] ss:$16 sps:$4 sm:$0xff]  }
 0x4af   : > { %3990 = vmatpush1.bf16.msra.mxu0 %v7982_v4  ;;  %4076 = vmatpush1.bf16.msra.mxu1 %v7985_v5  ;;  %v8056_v4 = vld [vmem:[#allocation9 + $0xa44] ss:$16 sps:$4 sm:$0xff]   ;;  %v8059_v5 = vld [vmem:[#allocation9 + $0xa4c] ss:$16 sps:$4 sm:$0xff]  }
 0x4b0   : > { %3991 = vmatprep.subr.bf16.mxu0 %v7990_v6  ;;  %4077 = vmatprep.subr.bf16.mxu1 %v7993_v7  ;;  %v8054_v6 = vld [vmem:[#allocation9 + $0xa40] ss:$16 sps:$4 sm:$0xff]   ;;  %v8057_v7 = vld [vmem:[#allocation9 + $0xa48] ss:$16 sps:$4 sm:$0xff]  }
 0x4b1   : > { %4021 = vmatprep.mubr.bf16.mxu0 %v8440_v1  ;;  %4107 = vmatprep.mubr.bf16.mxu1 %v8440_v1 }
 0x4b3   : > { %3992 = vmatpush1.bf16.msra.mxu0 %v7988_v10  ;;  %4078 = vmatpush1.bf16.msra.mxu1 %v7991_v11  ;;  %v8065_v10 = vld [vmem:[#allocation9 + $0xa6c] ss:$16 sps:$4 sm:$0xff]   ;;  %v8060_v11 = vld [vmem:[#allocation9 + $0xa60] ss:$16 sps:$4 sm:$0xff]  }
 0x4b4   : > { %4592 = vmatprep.subr.bf16.mxu0 %v7996_v12  ;;  %4678 = vmatprep.subr.bf16.mxu1 %v7999_v15  ;;  %v8063_v12 = vld [vmem:[#allocation9 + $0xa68] ss:$16 sps:$4 sm:$0xff]   ;;  %v8068_v15 = vld [vmem:[#allocation9 + $0xa84] ss:$16 sps:$4 sm:$0xff]  }
 0x4ba   : > { %6693 = vmatmul.mubr.msk.bf16.vlgmr.msra.gmra.mrb[12].mxu0 %vm344_vm0, %v8774_v13  ;;  %6694 = vmatmul.mubr.msk.bf16.vlgmr.msra.gmra.mrb[20].mxu1 %vm344_vm0, %v8774_v13  ;;  %v8014_v13 = vld [vmem:[#allocation9 + $0x964] ss:$16 sps:$4 sm:$0xff]  }
 0x4bb   : > { %4593 = vmatpush1.bf16.msra.mxu0 %v7994_v20  ;;  %4679 = vmatpush1.bf16.msra.mxu1 %v7997_v21  ;;  %v8077_v20 = vld [vmem:[#allocation9 + $0xaac] ss:$16 sps:$4 sm:$0xff]   ;;  %v8072_v21 = vld [vmem:[#allocation9 + $0xaa0] ss:$16 sps:$4 sm:$0xff]  }
 0x4bc   : > { %4624 = vmatprep.mubr.bf16.mxu0 %v4223_v9  ;;  %4710 = vmatprep.mubr.bf16.mxu1 %v4223_v9  ;;  %v8078_v9 = vld [vmem:[#allocation9 + $0xac0] ss:$16 sps:$4 sm:$0xff]  }
 0x4bd   : > { %4594 = vmatprep.subr.bf16.mxu0 %v8002_v24  ;;  %4680 = vmatprep.subr.bf16.mxu1 %v8005_v25  ;;  %v8083_v24 = vld [vmem:[#allocation9 + $0xacc] ss:$16 sps:$4 sm:$0xff]   ;;  %v4129_v25 = vld [vmem:[#allocation3 + $0x30] sm:$0x3] }
 0x4bf   : > { %4595 = vmatpush1.bf16.msra.mxu0 %v8000_v26  ;;  %4681 = vmatpush1.bf16.msra.mxu1 %v8003_v27  ;;  %v8081_v26 = vld [vmem:[#allocation9 + $0xac8] ss:$16 sps:$4 sm:$0xff]   ;;  %v8086_v27 = vld [vmem:[#allocation9 + $0xae4] ss:$16 sps:$4 sm:$0xff]  }
 0x4c0   : > { %4596 = vmatprep.subr.bf16.mxu0 %v8008_v28  ;;  %4682 = vmatprep.subr.bf16.mxu1 %v8011_v29  ;;  %v8089_v28 = vld [vmem:[#allocation9 + $0xaec] ss:$16 sps:$4 sm:$0xff]   ;;  %v4126_v29 = vld [vmem:[#allocation3] sm:$0xf0] }
 0x4c3   : > { %4597 = vmatpush1.bf16.msra.mxu0 %v8006_v31  ;;  %4683 = vmatpush1.bf16.msra.mxu1 %v8009_v32  ;;  %v4132_v31 = vpack.c.bf16 %v8783_v3, %v4126_v29  ;;  %v4135_v32 = vpack.c.bf16 %v4129_v25, %v4129_v25  ;;  %v8105_v29 = vld [vmem:[%s9238_s5 + $0x80] sm:$0xff]  }
 0x4c4   : > { %4598 = vmatprep.subr.bf16.mxu0 %v8014_v13  ;;  %4684 = vmatprep.subr.bf16.mxu1 %v8017_v33  ;;  %v8084_v13 = vld [vmem:[#allocation9 + $0xae0] ss:$16 sps:$4 sm:$0xff]   ;;  %v8087_v33 = vld [vmem:[#allocation9 + $0xae8] ss:$16 sps:$4 sm:$0xff]  }
 0x4c7   : > { %4599 = vmatpush1.bf16.msra.mxu0 %v8012_v34  ;;  %4685 = vmatpush1.bf16.msra.mxu1 %v8015_v35  ;;  %v8092_v34 = vld [vmem:[#allocation9 + $0xb04] ss:$16 sps:$4 sm:$0xff]   ;;  %v8095_v35 = vld [vmem:[#allocation9 + $0xb0c] ss:$16 sps:$4 sm:$0xff]  }
 0x4c8   : > { %4600 = vmatprep.subr.bf16.mxu0 %v8020_v36  ;;  %4686 = vmatprep.subr.bf16.mxu1 %v8023_v37  ;;  %v4218_v36 = vrot.slane %v4132_v31, 2  ;;  %v4219_v37 = vrot.slane %v4135_v32, 2  ;;  %v8106_v31 = vld [vmem:[%s9238_s5 + $0x48] sm:$0xff]  }
 0x4c9   : > { %v8108_v32 = vld [vmem:[%s9238_s5 + $0xc8] sm:$0xff]  }
 0x4ca   : > { %v4220_v3 = vsel %vm4217_vm2, %v4218_v36, %v4219_v37  ;;  %v8114_v36 = vld [vmem:[%s9238_s5 + $0x58] sm:$0xff]  }
 0x4cb   : > { %4601 = vmatpush1.bf16.msra.mxu0 %v8018_v38  ;;  %4687 = vmatpush1.bf16.msra.mxu1 %v8021_v39  ;;  %v8090_v38 = vld [vmem:[#allocation9 + $0xb00] ss:$16 sps:$4 sm:$0xff]   ;;  %v8093_v39 = vld [vmem:[#allocation9 + $0xb08] ss:$16 sps:$4 sm:$0xff]  }
 0x4cc   : > { %4602 = vmatprep.subr.bf16.mxu0 %v8026_v40  ;;  %4688 = vmatprep.subr.bf16.mxu1 %v8029_v41  ;;  %v8098_v40 = vld [vmem:[#allocation9 + $0xb24] ss:$16 sps:$4 sm:$0xff]   ;;  %v8101_v41 = vld [vmem:[#allocation9 + $0xb2c] ss:$16 sps:$4 sm:$0xff]  }
 0x4cd   : > { %v8116_v37 = vld [vmem:[%s9238_s5 + $0xd8] sm:$0xff]  }
 0x4cf   : > { %4603 = vmatpush1.bf16.msra.mxu0 %v8024_v49  ;;  %4689 = vmatpush1.bf16.msra.mxu1 %v8027_v45  ;;  %v4131_v49 = vld [vmem:[#allocation3 + $0x40] sm:$0x3]  ;;  %v8096_v45 = vld [vmem:[#allocation9 + $0xb20] ss:$16 sps:$4 sm:$0xff]  }
 0x4d0   : > { %4604 = vmatprep.subr.bf16.mxu0 %v8032_v50  ;;  %4690 = vmatprep.subr.bf16.mxu1 %v8035_v53  ;;  %v8099_v50 = vld [vmem:[#allocation9 + $0xb28] ss:$16 sps:$4 sm:$0xff]  }
 0x4d1   : > { %v4128_v53 = vld [vmem:[#allocation3 + $0x10] sm:$0xf0] }
 0x4d3   : > { %4605 = vmatpush1.bf16.msra.mxu0 %v8030_v51  ;;  %4691 = vmatpush1.bf16.msra.mxu1 %v8033_v52  ;;  %v8215_v51 = vld [vmem:[#allocation3 + $0x28] sm:$0xff] }
 0x4d4   : > { %4606 = vmatprep.subr.bf16.mxu0 %v8038_v42  ;;  %4692 = vmatprep.subr.bf16.mxu1 %v8041_v56  ;;  %v4134_v52 = vpack.c.bf16 %v8215_v51, %v4128_v53  ;;  %v4137_v42 = vpack.c.bf16 %v4131_v49, %v4131_v49  ;;  %v8121_v49 = vld [vmem:[%s9238_s5 + $0xa0] sm:$0xff]   ;;  %v8123_v53 = vld [vmem:[%s9238_s5 + $0x28] sm:$0xff]  }
 0x4d5   : > { %v8125_v51 = vld [vmem:[%s9238_s5 + $0xa8] sm:$0xff]  }
 0x4d6   : > { %v4224_v56 = vrot.slane %v4134_v52, 2  ;;  %v8126_v52 = vld [vmem:[%s9238_s5 + $0x70] sm:$0xff]  }
 0x4d7   : > { %4607 = vmatpush1.bf16.msra.mxu0 %v8036_v57  ;;  %4693 = vmatpush1.bf16.msra.mxu1 %v8039_v58  ;;  %v4225_v57 = vrot.slane %v4137_v42, 2  ;;  %v8127_v42 = vld [vmem:[%s9238_s5 + $0x30] sm:$0xff]  }
 0x4d8   : > { %4608 = vmatprep.subr.bf16.mxu0 %v8044_v59  ;;  %4694 = vmatprep.subr.bf16.mxu1 %v8047_v60  ;;  %v4772_v59 = vld [vmem:[#allocation10] sm:$0xf] }
 0x4d9   : > { %v4226_v58 = vsel %vm4217_vm2, %v4224_v56, %v4225_v57  ;;  %v4785_v60 = vrot.slane %v4772_v59, %v1269_v47  ;;  %v8128_v56 = vld [vmem:[%s9238_s5 + $0xf0] sm:$0xff]  }
 0x4da   : > { %v8129_v57 = vld [vmem:[%s9238_s5 + $0xb0] sm:$0xff]  }
 0x4db   : > { %4609 = vmatpush1.bf16.msra.mxu0 %v8042_v61  ;;  %4695 = vmatpush1.bf16.msra.mxu1 %v8045_v62  ;;  %v4781_v61 = vrot.slane %v4772_v59, %v1265_v46  ;;  %v4789_v62 = vrot.slane %v4772_v59, %v1273_v48 }
 0x4dc   : > { %4610 = vmatprep.subr.bf16.mxu0 %v8050_v63  ;;  %4696 = vmatprep.subr.bf16.mxu1 %v8053_v0 }
 0x4df   : > { %4611 = vmatpush1.bf16.msra.mxu0 %v8048_v2  ;;  %4697 = vmatpush1.bf16.msra.mxu1 %v8051_v30 }
 0x4e0   : > { %4612 = vmatprep.subr.bf16.mxu0 %v8056_v4  ;;  %4698 = vmatprep.subr.bf16.mxu1 %v8059_v5 }
 0x4e3   : > { %4613 = vmatpush1.bf16.msra.mxu0 %v8054_v6  ;;  %4699 = vmatpush1.bf16.msra.mxu1 %v8057_v7 }
 0x4e4   : > { %4614 = vmatprep.subr.bf16.mxu0 %v8062_v8  ;;  %4700 = vmatprep.subr.bf16.mxu1 %v8065_v10 }
 0x4e7   : > { %4615 = vmatpush1.bf16.msra.mxu0 %v8060_v11  ;;  %4701 = vmatpush1.bf16.msra.mxu1 %v8063_v12 }
 0x4e8   : > { %4616 = vmatprep.subr.bf16.mxu0 %v8068_v15  ;;  %4702 = vmatprep.subr.bf16.mxu1 %v8071_v16 }
 0x4eb   : > { %4617 = vmatpush1.bf16.msra.mxu0 %v8066_v17  ;;  %4703 = vmatpush1.bf16.msra.mxu1 %v8069_v18 }
 0x4ec   : > { %4618 = vmatprep.subr.bf16.mxu0 %v8074_v19  ;;  %4704 = vmatprep.subr.bf16.mxu1 %v8077_v20 }
 0x4ef   : > { %4619 = vmatpush1.bf16.msra.mxu0 %v8072_v21  ;;  %4705 = vmatpush1.bf16.msra.mxu1 %v8075_v22 }
 0x4f0   : > { %4620 = vmatprep.subr.bf16.mxu0 %v8080_v23  ;;  %4706 = vmatprep.subr.bf16.mxu1 %v8083_v24 }
 0x4f3   : > { %4621 = vmatpush1.bf16.msra.mxu0 %v8078_v9  ;;  %4707 = vmatpush1.bf16.msra.mxu1 %v8081_v26  ;;  %v8102_v26 = vld [vmem:[%s9238_s5 + $0x40] sm:$0xff]  }
 0x4f4   : > { %4622 = vmatprep.subr.bf16.mxu0 %v8086_v27  ;;  %4708 = vmatprep.subr.bf16.mxu1 %v8089_v28  ;;  %v8104_v27 = vld [vmem:[%s9238_s5 + $0xc0] sm:$0xff]  }
 0x4f5   : > { %v8103_v28 = vld [vmem:[%s9238_s5] sm:$0xff]  }
 0x4f7   : > { %4623 = vmatpush1.bf16.msra.mxu0 %v8084_v13  ;;  %4709 = vmatpush1.bf16.msra.mxu1 %v8087_v33  ;;  %v8107_v13 = vld [vmem:[%s9238_s5 + $0x8] sm:$0xff]  }
 0x4f8   : > { %4635 = vmatprep.subr.bf16.mxu0 %v8092_v34  ;;  %4721 = vmatprep.subr.bf16.mxu1 %v8095_v35  ;;  %v8109_v33 = vld [vmem:[%s9238_s5 + $0x88] sm:$0xff]   ;;  %v8110_v34 = vld [vmem:[%s9238_s5 + $0x50] sm:$0xff]  }
 0x4f9   : > { %v8113_v35 = vld [vmem:[%s9238_s5 + $0x90] sm:$0xff]  }
 0x4fa   : > { %4625 = vmatmul.mubr.bf16.vlgmr.msra.gmra.mrb[12].mxu0 %v4220_v3  ;;  %4711 = vmatmul.mubr.bf16.vlgmr.msra.gmra.mrb[20].mxu1 %v4220_v3  ;;  %v8119_v3 = vld [vmem:[%s9238_s5 + $0x20] sm:$0xff]  }
 0x4fb   : > { %4636 = vmatpush1.bf16.msra.mxu0 %v8090_v38  ;;  %4722 = vmatpush1.bf16.msra.mxu1 %v8093_v39  ;;  %v8115_v38 = vld [vmem:[%s9238_s5 + $0x18] sm:$0xff]  }
 0x4fc   : > { %4637 = vmatprep.subr.bf16.mxu0 %v8098_v40  ;;  %4723 = vmatprep.subr.bf16.mxu1 %v8101_v41  ;;  %v8117_v39 = vld [vmem:[%s9238_s5 + $0x98] sm:$0xff]   ;;  %v8118_v40 = vld [vmem:[%s9238_s5 + $0x60] sm:$0xff]  }
 0x4fd   : > { %4667 = vmatprep.mubr.bf16.mxu0 %v8440_v1  ;;  %4753 = vmatprep.mubr.bf16.mxu1 %v8440_v1  ;;  %v4777_v1 = vrot.slane %v4772_v59, %v1261_v44  ;;  %v8120_v41 = vld [vmem:[%s9238_s5 + $0xe0] sm:$0xff]   ;;  %v8131_v59 = vld [vmem:[%s9238_s5 + $0x38] sm:$0xff]  }
 0x4ff   : > { %4638 = vmatpush1.bf16.msra.mxu0 %v8096_v45  ;;  %4724 = vmatpush1.bf16.msra.mxu1 %v8099_v50  ;;  %v8122_v45 = vld [vmem:[%s9238_s5 + $0x68] sm:$0xff]  }
 0x500   : > { %v8124_v50 = vld [vmem:[%s9238_s5 + $0xe8] sm:$0xff]  }
 0x506   : > { %6767 = vmatmul.mubr.msk.bf16.vlgmr.msra.gmra.mrb[12].mxu0 %vm344_vm0, %v4226_v58  ;;  %6768 = vmatmul.mubr.msk.bf16.vlgmr.msra.gmra.mrb[20].mxu1 %vm344_vm0, %v4226_v58  ;;  %vm7258_vm0 = vmpackc.low %vm4217_vm2, %vm8442_vm4  ;;  %v8130_v58 = vld [vmem:[%s9238_s5 + $0x78] sm:$0xff]   ;;  %vm6191_vm4 = vcmask 73728  }
 0x507   : > { %4888 = vmatprep.mubr.f32.mxu0 %v8720_v14  ;;  %4961 = vmatprep.mubr.f32.mxu1 %v8720_v14 }
 0x5d9   : > { %v4669_v63 = vpop.f32.mrb[12].mxu0  ;;  %v4755_v0 = vpop.f32.mrb[20].mxu1 }
 0x5da   : > { %v4794_v2 = vadd.f32 %v4777_v1, %v4669_v63  ;;  %v4796_v30 = vadd.f32 %v4785_v60, %v4755_v0  ;;  %v4671_v4 = vpop.f32.mrb[13].mxu0  ;;  %v4757_v5 = vpop.f32.mrb[21].mxu1 }
 0x5db   : > { %v4795_v14 = vadd.f32 %v4781_v61, %v4671_v4  ;;  %v4797_v6 = vadd.f32 %v4789_v62, %v4757_v5  ;;  %v4673_v7 = vpop.f32.mrb[14].mxu0  ;;  %v4759_v8 = vpop.f32.mrb[22].mxu1 }
 0x5dc   : > { %v4802_v44 = vmax.f32 %v4794_v2, 0.0  ;;  %v4804_v10 = vmax.f32 %v4796_v30, 0.0  ;;  %v4798_v11 = vadd.f32 %v4777_v1, %v4673_v7  ;;  %v4800_v47 = vadd.f32 %v4785_v60, %v4759_v8  ;;  %v4675_v12 = vpop.f32.mrb[15].mxu0  ;;  %v4761_v15 = vpop.f32.mrb[23].mxu1  ;;  %v8132_v1 = vld [vmem:[%s9238_s5 + $0xf8] sm:$0xff]   ;;  %v8135_v7 = vld [vmem:[%s9238_s5 + $0x180] sm:$0xff]  }
 0x5dd   : > { %v4803_v46 = vmax.f32 %v4795_v14, 0.0  ;;  %v4805_v16 = vmax.f32 %v4797_v6, 0.0  ;;  %v4799_v43 = vadd.f32 %v4781_v61, %v4675_v12  ;;  %v4801_v48 = vadd.f32 %v4789_v62, %v4761_v15  ;;  %v8133_v60 = vld [vmem:[%s9238_s5 + $0xb8] sm:$0xff]   ;;  %v8134_v61 = vld [vmem:[%s9238_s5 + $0x1c0] sm:$0xff]   ;;  %v8138_v8 = vld [vmem:[%s9238_s5 + $0x1c8] sm:$0xff]  }
 0x5de   : > { %v4810_v17 = vmax.f32 %v4802_v44, %v4804_v10  ;;  %v4806_v18 = vmax.f32 %v4798_v11, 0.0  ;;  %v4808_v19 = vmax.f32 %v4800_v47, 0.0  ;;  %v8136_v62 = vld [vmem:[%s9238_s5 + $0x140] sm:$0xff]   ;;  %v8140_v47 = vld [vmem:[%s9238_s5 + $0x148] sm:$0xff]  }
 0x5df   : > { %v4811_v20 = vmax.f32 %v4803_v46, %v4805_v16  ;;  %v4807_v21 = vmax.f32 %v4799_v43, 0.0  ;;  %v4809_v22 = vmax.f32 %v4801_v48, 0.0  ;;  %v8137_v10 = vld [vmem:[%s9238_s5 + $0x100] sm:$0xff]   ;;  %v8139_v12 = vld [vmem:[%s9238_s5 + $0x188] sm:$0xff]   ;;  %v8142_v16 = vld [vmem:[%s9238_s5 + $0x1d0] sm:$0xff]  }
 0x5e0   : > { %v4812_v23 = vmax.f32 %v4806_v18, %v4808_v19  ;;  %v8141_v43 = vld [vmem:[%s9238_s5 + $0x108] sm:$0xff]   ;;  %v8144_v48 = vld [vmem:[%s9238_s5 + $0x150] sm:$0xff]   ;;  %v8146_v18 = vld [vmem:[%s9238_s5 + $0x1d8] sm:$0xff]  }
 0x5e1   : > { %v4813_v24 = vmax.f32 %v4807_v21, %v4809_v22  ;;  %v8145_v19 = vld [vmem:[%s9238_s5 + $0x110] sm:$0xff]   ;;  %v8147_v21 = vld [vmem:[%s9238_s5 + $0x198] sm:$0xff]   ;;  %v8150_v22 = vld [vmem:[%s9238_s5 + $0x1e0] sm:$0xff]  }
 0x5e2   : > { %v7260_v25 = vpack.c.bf16 %v4812_v23, %v4810_v17  ;;  %v8143_v17 = vld [vmem:[%s9238_s5 + $0x190] sm:$0xff]   ;;  %v8149_v23 = vld [vmem:[%s9238_s5 + $0x118] sm:$0xff]  }
 0x5e3   : > { %v7257_v9 = vpack.c.bf16 %v4813_v24, %v4811_v20  ;;  %v8148_v20 = vld [vmem:[%s9238_s5 + $0x158] sm:$0xff]   ;;  %v8152_v24 = vld [vmem:[%s9238_s5 + $0x160] sm:$0xff]  }
 0x5e5   : > { %7259 = vmatprep.subr.msk.bf16.mxu0 %vm7258_vm0, %v7257_v9  ;;  %7265 = vmatprep.subr.msk.bf16.mxu1 %vm7258_vm0, %v7257_v9  ;;  %v8154_v9 = vld [vmem:[%s9238_s5 + $0x1e8] sm:$0xff]  }
 0x5e6   : > { %7262 = vmatpush1.bf16.msk.msra.mxu0 %vm7258_vm0, %v7260_v25  ;;  %7268 = vmatpush1.bf16.msk.msra.mxu1 %vm7258_vm0, %v7260_v25  ;;  %v8151_v25 = vld [vmem:[%s9238_s5 + $0x1a0] sm:$0xff]  }
 0x5e7   : > { %7105 = vmatprep.subr.bf16.mxu1 %v8102_v26  ;;  %7083 = vmatprep.subr.bf16.mxu0 %v8104_v27  ;;  %v8153_v26 = vld [vmem:[%s9238_s5 + $0x120] sm:$0xff]   ;;  %v8156_v27 = vld [vmem:[%s9238_s5 + $0x168] sm:$0xff]  }
 0x5e9   : > { %6771 = vmatmul.mubr.msk.f32.vlgmr.msra.gmra.mrb[16].mxu0 %vm4814_vm3, %v8750_v54  ;;  %6774 = vmatmul.mubr.msk.f32.vlgmr.msra.gmra.mrb[24].mxu1 %vm4814_vm3, %v8753_v55  ;;  %v8112_v54 = vld [vmem:[%s9238_s5 + $0xd0] sm:$0xff]  }
 0x5ea   : > { %7106 = vmatpush3.bf16.msra.mxu1 %v8103_v28  ;;  %7084 = vmatpush3.bf16.msra.mxu0 %v8105_v29  ;;  %v8111_v55 = vld [vmem:[%s9238_s5 + $0x10] sm:$0xff]   ;;  %v8155_v28 = vld [vmem:[%s9238_s5 + $0x1a8] sm:$0xff]  }
 0x5eb   : > { %7107 = vmatprep.subr.bf16.mxu1 %v8106_v31  ;;  %7085 = vmatprep.subr.bf16.mxu0 %v8108_v32  ;;  %v8158_v29 = vld [vmem:[%s9238_s5 + $0x1f0] sm:$0xff]   ;;  %v8157_v31 = vld [vmem:[%s9238_s5 + $0x128] sm:$0xff]  }
 0x5ec   : > { %v8160_v32 = vld [vmem:[%s9238_s5 + $0x170] sm:$0xff]  }
 0x5ee   : > { %7108 = vmatpush3.bf16.msra.mxu1 %v8107_v13  ;;  %7086 = vmatpush3.bf16.msra.mxu0 %v8109_v33  ;;  %v8159_v13 = vld [vmem:[%s9238_s5 + $0x1b0] sm:$0xff]   ;;  %v8162_v33 = vld [vmem:[%s9238_s5 + $0x1f8] sm:$0xff]  }
 0x5ef   : > { %7109 = vmatprep.subr.bf16.mxu1 %v8110_v34  ;;  %7087 = vmatprep.subr.bf16.mxu0 %v8112_v54  ;;  %v8161_v34 = vld [vmem:[%s9238_s5 + $0x130] sm:$0xff]   ;;  %v8164_v54 = vld [vmem:[%s9238_s5 + $0x178] sm:$0xff]  }
 0x5f2   : > { %7110 = vmatpush3.bf16.msra.mxu1 %v8111_v55  ;;  %7088 = vmatpush3.bf16.msra.mxu0 %v8113_v35  ;;  %v8163_v55 = vld [vmem:[%s9238_s5 + $0x1b8] sm:$0xff]   ;;  %v8166_v35 = vld [vmem:[%s9238_s5 + $0x2c0] sm:$0xff]  }
 0x5f3   : > { %7111 = vmatprep.subr.bf16.mxu1 %v8114_v36  ;;  %7089 = vmatprep.subr.bf16.mxu0 %v8116_v37  ;;  %v8165_v36 = vld [vmem:[%s9238_s5 + $0x138] sm:$0xff]   ;;  %v8168_v37 = vld [vmem:[%s9238_s5 + $0x240] sm:$0xff]  }
 0x5f6   : > { %7112 = vmatpush3.bf16.msra.mxu1 %v8115_v38  ;;  %7090 = vmatpush3.bf16.msra.mxu0 %v8117_v39  ;;  %v8167_v38 = vld [vmem:[%s9238_s5 + $0x280] sm:$0xff]  }
 0x5f7   : > { %7113 = vmatprep.subr.bf16.mxu1 %v8118_v40  ;;  %7091 = vmatprep.subr.bf16.mxu0 %v8120_v41  ;;  %v8170_v40 = vld [vmem:[%s9238_s5 + $0x2c8] sm:$0xff]  }
 0x5fa   : > { %7114 = vmatpush3.bf16.msra.mxu1 %v8119_v3  ;;  %7092 = vmatpush3.bf16.msra.mxu0 %v8121_v49  ;;  %v8169_v3 = vld [vmem:[%s9238_s5 + $0x200] sm:$0xff]  }
 0x5fb   : > { %7115 = vmatprep.subr.bf16.mxu1 %v8122_v45  ;;  %7093 = vmatprep.subr.bf16.mxu0 %v8124_v50  ;;  %v8172_v45 = vld [vmem:[%s9238_s5 + $0x248] sm:$0xff]  }
 0x5fe   : > { %7116 = vmatpush3.bf16.msra.mxu1 %v8123_v53  ;;  %7094 = vmatpush3.bf16.msra.mxu0 %v8125_v51  ;;  %v8171_v53 = vld [vmem:[%s9238_s5 + $0x288] sm:$0xff]   ;;  %v8174_v51 = vld [vmem:[%s9238_s5 + $0x2d0] sm:$0xff]  }
 0x5ff   : > { %7117 = vmatprep.subr.bf16.mxu1 %v8126_v52  ;;  %7095 = vmatprep.subr.bf16.mxu0 %v8128_v56  ;;  %v8173_v52 = vld [vmem:[%s9238_s5 + $0x208] sm:$0xff]   ;;  %v8175_v56 = vld [vmem:[%s9238_s5 + $0x290] sm:$0xff]  }
 0x602   : > { %7118 = vmatpush3.bf16.msra.mxu1 %v8127_v42  ;;  %7096 = vmatpush3.bf16.msra.mxu0 %v8129_v57  ;;  %v8176_v42 = vld [vmem:[%s9238_s5 + $0x250] sm:$0xff]   ;;  %v8178_v57 = vld [vmem:[%s9238_s5 + $0x2d8] sm:$0xff]  }
 0x603   : > { %7119 = vmatprep.subr.bf16.mxu1 %v8130_v58  ;;  %7097 = vmatprep.subr.bf16.mxu0 %v8132_v1  ;;  %v8177_v58 = vld [vmem:[%s9238_s5 + $0x210] sm:$0xff]   ;;  %v8179_v1 = vld [vmem:[%s9238_s5 + $0x298] sm:$0xff]  }
 0x606   : > { %7120 = vmatpush3.bf16.msra.mxu1 %v8131_v59  ;;  %7098 = vmatpush3.bf16.msra.mxu0 %v8133_v60  ;;  %v8180_v59 = vld [vmem:[%s9238_s5 + $0x258] sm:$0xff]   ;;  %v8182_v60 = vld [vmem:[%s9238_s5 + $0x2e0] sm:$0xff]  }
 0x607   : > { %7149 = vmatprep.subr.bf16.mxu1 %v8134_v61  ;;  %7127 = vmatprep.subr.bf16.mxu0 %v8136_v62  ;;  %v8181_v61 = vld [vmem:[%s9238_s5 + $0x218] sm:$0xff]   ;;  %v8184_v62 = vld [vmem:[%s9238_s5 + $0x260] sm:$0xff]  }
 0x6bc   : > { %v4890_v63 = vpop.f32.mrb[16].mxu0  ;;  %v4963_v0 = vpop.f32.mrb[24].mxu1 }
 0x6bd   : > { %v4968_v2 = vmax.f32 %v4890_v63, %v4963_v0  ;;  %v4892_v30 = vpop.f32.mrb[17].mxu0  ;;  %v4965_v4 = vpop.f32.mrb[25].mxu1  ;;  %v8183_v63 = vld [vmem:[%s9238_s5 + $0x2a0] sm:$0xff]   ;;  %v8186_v0 = vld [vmem:[%s9238_s5 + $0x2e8] sm:$0xff]  }
 0x6be   : > { %v4969_v5 = vmax.f32 %v4892_v30, %v4965_v4  ;;  %v8188_v30 = vld [vmem:[%s9238_s5 + $0x268] sm:$0xff]  }
 0x6bf   : > { %v8928_v14 = vpack.c.bf16 %v4968_v2, %v4968_v2  ;;  %v8185_v2 = vld [vmem:[%s9238_s5 + $0x220] sm:$0xff]   ;;  %v8187_v4 = vld [vmem:[%s9238_s5 + $0x2a8] sm:$0xff]  }
 0x6c0   : > { %v8930_v6 = vpack.c.bf16 %v4969_v5, %v4969_v5  ;;  %v8190_v5 = vld [vmem:[%s9238_s5 + $0x2f0] sm:$0xff]  }
 0x6c1   : > { %v8947_v11 = vshrl.u32 %v8928_v14, 16  ;;  %v5352_v49 = vrot.slane %v8928_v14, 1 }
 0x6c2   : > { %5309 = vmatprep.mubr.bf16.mxu1 %v8930_v6  ;;  %v8940_v44 = vshrl.u32 %v8930_v6, 16  ;;  %v5353_v15 = vrot.slane %v8930_v6, 1  ;;  %v5701_v50 = vrot.slane %v8930_v6, 2 }
 0x6c3   : > { %5310 = vmatmul.mubr.bf16.vlgmr.msra.gmra.mrb[28].mxu1 %v8928_v14  ;;  %v5526_v39 = vrot.slane %v8947_v11, 1 }
 0x6c4   : > { %7150 = vmatpush3.bf16.msra.mxu1 %v8135_v7  ;;  %5173 = vmatprep.mubr.bf16.mxu0 %v8940_v44  ;;  %v5527_v46 = vrot.slane %v8940_v44, 1  ;;  %v5875_v41 = vrot.slane %v8940_v44, 2  ;;  %v8189_v7 = vld [vmem:[%s9238_s5 + $0x228] sm:$0xff]   ;;  %v8191_v44 = vld [vmem:[%s9238_s5 + $0x2b0] sm:$0xff]  }
 0x6c5   : > { %5174 = vmatmul.mubr.bf16.vlgmr.msra.gmra.mrb[20].mxu0 %v8947_v11  ;;  %7151 = vmatprep.subr.bf16.mxu1 %v8138_v8  ;;  %v8192_v8 = vld [vmem:[%s9238_s5 + $0x270] sm:$0xff]  }
 0x6c6   : > { %7128 = vmatpush3.bf16.msra.mxu0 %v8137_v10  ;;  %5484 = vmatprep.mubr.bf16.mxu0 %v5353_v15  ;;  %v8194_v10 = vld [vmem:[%s9238_s5 + $0x2f8] sm:$0xff]  }
 0x6c7   : > { %7129 = vmatprep.subr.bf16.mxu0 %v8140_v47  ;;  %5658 = vmatprep.mubr.bf16.mxu1 %v5527_v46  ;;  %v8193_v47 = vld [vmem:[%s9238_s5 + $0x230] sm:$0xff]   ;;  %v8195_v15 = vld [vmem:[%s9238_s5 + $0x2b8] sm:$0xff]  }
 0x6c8   : > { %7152 = vmatpush3.bf16.msra.mxu1 %v8139_v12  ;;  %v8196_v12 = vld [vmem:[%s9238_s5 + $0x278] sm:$0xff]  }
 0x6c9   : > { %7153 = vmatprep.subr.bf16.mxu1 %v8142_v16  ;;  %v8197_v46 = vld [vmem:[%s9238_s5 + $0x238] sm:$0xff]   ;;  %v8198_v16 = vld [vmem:[%s9238_s5 + $0x340] sm:$0xff]  }
 0x6ca   : > { %7130 = vmatpush3.bf16.msra.mxu0 %v8141_v43  ;;  %v5874_v43 = vrot.slane %v8947_v11, 2  ;;  %v8201_v11 = vld [vmem:[%s9238_s5 + $0x308] sm:$0xff]  }
 0x6cb   : > { %7131 = vmatprep.subr.bf16.mxu0 %v8144_v48  ;;  %v8199_v48 = vld [vmem:[%s9238_s5 + $0x300] sm:$0xff]  }
 0x6cc   : > { %7154 = vmatpush3.bf16.msra.mxu1 %v8143_v17  ;;  %v5700_v17 = vrot.slane %v8928_v14, 2 }
 0x6cd   : > { %7155 = vmatprep.subr.bf16.mxu1 %v8146_v18  ;;  %v8200_v18 = vld [vmem:[%s9238_s5 + $0x348] sm:$0xff]  }
 0x6ce   : > { %7132 = vmatpush3.bf16.msra.mxu0 %v8145_v19  ;;  %v6049_v19 = vrot.slane %v8930_v6, 3  ;;  %v8204_v6 = vld [vmem:[%s9238_s5 + $0x358] sm:$0xff]  }
 0x6cf   : > { %7133 = vmatprep.subr.bf16.mxu0 %v8148_v20  ;;  %v8202_v20 = vld [vmem:[%s9238_s5 + $0x350] sm:$0xff]  }
 0x6d0   : > { %7156 = vmatpush3.bf16.msra.mxu1 %v8147_v21  ;;  %v8203_v21 = vld [vmem:[%s9238_s5 + $0x310] sm:$0xff]  }
 0x6d1   : > { %7157 = vmatprep.subr.bf16.mxu1 %v8150_v22  ;;  %v8205_v22 = vld [vmem:[%s9238_s5 + $0x318] sm:$0xff]  }
 0x6d2   : > { %7134 = vmatpush3.bf16.msra.mxu0 %v8149_v23  ;;  %v8206_v23 = vld [vmem:[%s9238_s5 + $0x360] sm:$0xff]  }
 0x6d3   : > { %7135 = vmatprep.subr.bf16.mxu0 %v8152_v24  ;;  %v8207_v24 = vld [vmem:[%s9238_s5 + $0x320] sm:$0xff]  }
 0x6d4   : > { %7158 = vmatpush3.bf16.msra.mxu1 %v8151_v25  ;;  %v8208_v25 = vld [vmem:[%s9238_s5 + $0x368] sm:$0xff]  }
 0x6d5   : > { %7159 = vmatprep.subr.bf16.mxu1 %v8154_v9  ;;  %v8209_v9 = vld [vmem:[%s9238_s5 + $0x328] sm:$0xff]  }
 0x6d6   : > { %7136 = vmatpush3.bf16.msra.mxu0 %v8153_v26  ;;  %v8210_v26 = vld [vmem:[%s9238_s5 + $0x370] sm:$0xff]  }
 0x6d7   : > { %7137 = vmatprep.subr.bf16.mxu0 %v8156_v27  ;;  %v8211_v27 = vld [vmem:[%s9238_s5 + $0x330] sm:$0xff]  }
 0x6d8   : > { %7160 = vmatpush3.bf16.msra.mxu1 %v8155_v28  ;;  %v8212_v28 = vld [vmem:[%s9238_s5 + $0x378] sm:$0xff]  }
 0x6d9   : > { %7161 = vmatprep.subr.bf16.mxu1 %v8158_v29  ;;  %v8213_v29 = vld [vmem:[%s9238_s5 + $0x338] sm:$0xff]  }
 0x6da   : > { %7138 = vmatpush3.bf16.msra.mxu0 %v8157_v31  ;;  %v6048_v31 = vrot.slane %v8928_v14, 3 }
 0x6db   : > { %7139 = vmatprep.subr.bf16.mxu0 %v8160_v32 }
 0x6dc   : > { %7162 = vmatpush3.bf16.msra.mxu1 %v8159_v13 }
 0x6dd   : > { %7163 = vmatprep.subr.bf16.mxu1 %v8162_v33 }
 0x6de   : > { %7140 = vmatpush3.bf16.msra.mxu0 %v8161_v34 }
 0x6df   : > { %7141 = vmatprep.subr.bf16.mxu0 %v8164_v54 }
 0x6e0   : > { %7164 = vmatpush3.bf16.msra.mxu1 %v8163_v55 }
 0x6e1   : > { %7193 = vmatprep.subr.bf16.mxu1 %v8166_v35 }
 0x6e2   : > { %7142 = vmatpush3.bf16.msra.mxu0 %v8165_v36 }
 0x6e3   : > { %5659 = vmatmul.mubr.bf16.vlgmr.msra.gmra.mrb[32].mxu1 %v5526_v39  ;;  %7171 = vmatprep.subr.bf16.mxu0 %v8168_v37 }
 0x6e4   : > { %7194 = vmatpush3.bf16.msra.mxu1 %v8167_v38  ;;  %6006 = vmatprep.mubr.bf16.mxu1 %v5875_v41 }
 0x6e5   : > { %5485 = vmatmul.mubr.bf16.vlgmr.msra.gmra.mrb[24].mxu0 %v5352_v49  ;;  %7195 = vmatprep.subr.bf16.mxu1 %v8170_v40 }
 0x6e6   : > { %7172 = vmatpush3.bf16.msra.mxu0 %v8169_v3  ;;  %5832 = vmatprep.mubr.bf16.mxu0 %v5701_v50 }
 0x6e7   : > { %7173 = vmatprep.subr.bf16.mxu0 %v8172_v45 }
 0x6e8   : > { %7196 = vmatpush3.bf16.msra.mxu1 %v8171_v53 }
 0x6e9   : > { %7197 = vmatprep.subr.bf16.mxu1 %v8174_v51 }
 0x6ea   : > { %7174 = vmatpush3.bf16.msra.mxu0 %v8173_v52 }
 0x6eb   : > { %7175 = vmatprep.subr.bf16.mxu0 %v8176_v42 }
 0x6ec   : > { %7198 = vmatpush3.bf16.msra.mxu1 %v8175_v56 }
 0x6ed   : > { %7199 = vmatprep.subr.bf16.mxu1 %v8178_v57 }
 0x6ee   : > { %7176 = vmatpush3.bf16.msra.mxu0 %v8177_v58 }
 0x6ef   : > { %7177 = vmatprep.subr.bf16.mxu0 %v8180_v59 }
 0x6f0   : > { %7200 = vmatpush3.bf16.msra.mxu1 %v8179_v1 }
 0x6f1   : > { %7201 = vmatprep.subr.bf16.mxu1 %v8182_v60 }
 0x6f2   : > { %7178 = vmatpush3.bf16.msra.mxu0 %v8181_v61 }
 0x6f3   : > { %7179 = vmatprep.subr.bf16.mxu0 %v8184_v62 }
 0x6f4   : > { %7202 = vmatpush3.bf16.msra.mxu1 %v8183_v63 }
 0x6f5   : > { %7203 = vmatprep.subr.bf16.mxu1 %v8186_v0 }
 0x6f6   : > { %7180 = vmatpush3.bf16.msra.mxu0 %v8185_v2 }
 0x6f7   : > { %7181 = vmatprep.subr.bf16.mxu0 %v8188_v30 }
 0x6f8   : > { %7204 = vmatpush3.bf16.msra.mxu1 %v8187_v4 }
 0x6f9   : > { %7205 = vmatprep.subr.bf16.mxu1 %v8190_v5 }
 0x6fa   : > { %7182 = vmatpush3.bf16.msra.mxu0 %v8189_v7 }
 0x6fb   : > { %7183 = vmatprep.subr.bf16.mxu0 %v8192_v8 }
 0x6fc   : > { %7206 = vmatpush3.bf16.msra.mxu1 %v8191_v44 }
 0x6fd   : > { %7207 = vmatprep.subr.bf16.mxu1 %v8194_v10  ;;  %v6189_v10 = vld [vmem:[#allocation12] sm:$0x1] }
 0x6fe   : > { %7184 = vmatpush3.bf16.msra.mxu0 %v8193_v47 }
 0x6ff   : > { %7185 = vmatprep.subr.bf16.mxu0 %v8196_v12 }
 0x700   : > { %7208 = vmatpush3.bf16.msra.mxu1 %v8195_v15 }
 0x702   : > { %7186 = vmatpush3.bf16.msra.mxu0 %v8197_v46 }
 0x703   : > { %6007 = vmatmul.mubr.bf16.vlgmr.msra.gmra.mrb[36].mxu1 %v5874_v43  ;;  %7215 = vmatprep.subr.bf16.mxu0 %v8198_v16 }
 0x705   : > { %5833 = vmatmul.mubr.bf16.vlgmr.msra.gmra.mrb[28].mxu0 %v5700_v17 }
 0x706   : > { %7216 = vmatpush3.bf16.msra.mxu0 %v8199_v48  ;;  %6180 = vmatprep.mubr.bf16.mxu0 %v6049_v19 }
 0x707   : > { %7217 = vmatprep.subr.bf16.mxu0 %v8200_v18 }
 0x70a   : > { %7218 = vmatpush3.bf16.msra.mxu0 %v8201_v11 }
 0x70b   : > { %7219 = vmatprep.subr.bf16.mxu0 %v8202_v20 }
 0x70e   : > { %7220 = vmatpush3.bf16.msra.mxu0 %v8203_v21 }
 0x70f   : > { %7221 = vmatprep.subr.bf16.mxu0 %v8204_v6 }
 0x712   : > { %7222 = vmatpush3.bf16.msra.mxu0 %v8205_v22 }
 0x713   : > { %7223 = vmatprep.subr.bf16.mxu0 %v8206_v23 }
 0x716   : > { %7224 = vmatpush3.bf16.msra.mxu0 %v8207_v24 }
 0x717   : > { %7225 = vmatprep.subr.bf16.mxu0 %v8208_v25 }
 0x71a   : > { %7226 = vmatpush3.bf16.msra.mxu0 %v8209_v9 }
 0x71b   : > { %7227 = vmatprep.subr.bf16.mxu0 %v8210_v26 }
 0x71e   : > { %7228 = vmatpush3.bf16.msra.mxu0 %v8211_v27 }
 0x71f   : > { %7229 = vmatprep.subr.bf16.mxu0 %v8212_v28 }
 0x722   : > { %7230 = vmatpush3.bf16.msra.mxu0 %v8213_v29 }
 0x725   : > { %6181 = vmatmul.mubr.bf16.vlgmr.msra.gmra.mrb[32].mxu0 %v6048_v31 }
 0x796   : > { %v7121_v32 = vpop.f32.mrb[28].mxu1 }
 0x797   : > { %v7122_v13 = vpop.f32.mrb[29].mxu1 }
 0x798   : > { %v7123_v33 = vadd.f32 %v7122_v13, %v7121_v32  ;;  %v7099_v34 = vpop.f32.mrb[20].mxu0  ;;  %v7124_v54 = vpop.f32.mrb[30].mxu1 }
 0x799   : > { %v7100_v55 = vpop.f32.mrb[21].mxu0  ;;  %v7125_v35 = vpop.f32.mrb[31].mxu1 }
 0x79a   : > { %v7101_v36 = vadd.f32 %v7100_v55, %v7099_v34  ;;  %v7102_v37 = vpop.f32.mrb[22].mxu0 }
 0x79b   : > { %v7103_v38 = vpop.f32.mrb[23].mxu0 }
 0x79c   : > { %v5312_v39 = vadd.f32 %v7123_v33, %v7101_v36 }
 0x7b6   : > { %v7165_v40 = vpop.f32.mrb[32].mxu1 }
 0x7b7   : > { %v7166_v41 = vpop.f32.mrb[33].mxu1 }
 0x7b8   : > { %v7167_v3 = vadd.f32 %v7166_v41, %v7165_v40  ;;  %v7143_v49 = vpop.f32.mrb[24].mxu0  ;;  %v7168_v45 = vpop.f32.mrb[34].mxu1 }
 0x7b9   : > { %v7144_v50 = vpop.f32.mrb[25].mxu0  ;;  %v7169_v53 = vpop.f32.mrb[35].mxu1 }
 0x7ba   : > { %v7145_v14 = vadd.f32 %v7144_v50, %v7143_v49  ;;  %v7146_v51 = vpop.f32.mrb[26].mxu0 }
 0x7bb   : > { %v7147_v52 = vpop.f32.mrb[27].mxu0 }
 0x7bc   : > { %v5492_v42 = vadd.f32 %v7145_v14, %v5312_v39 }
 0x7be   : > { %v5666_v56 = vadd.f32 %v7167_v3, %v5492_v42 }
 0x7d6   : > { %v7209_v57 = vpop.f32.mrb[36].mxu1 }
 0x7d7   : > { %v7210_v58 = vpop.f32.mrb[37].mxu1 }
 0x7d8   : > { %v7211_v59 = vadd.f32 %v7210_v58, %v7209_v57  ;;  %v7187_v1 = vpop.f32.mrb[28].mxu0  ;;  %v7212_v60 = vpop.f32.mrb[38].mxu1 }
 0x7d9   : > { %v7188_v61 = vpop.f32.mrb[29].mxu0  ;;  %v7213_v62 = vpop.f32.mrb[39].mxu1 }
 0x7da   : > { %v7189_v63 = vadd.f32 %v7188_v61, %v7187_v1  ;;  %v7190_v0 = vpop.f32.mrb[30].mxu0 }
 0x7db   : > { %v7191_v2 = vpop.f32.mrb[31].mxu0 }
 0x7dc   : > { %v5840_v30 = vadd.f32 %v7189_v63, %v5666_v56 }
 0x7de   : > { %v6014_v4 = vadd.f32 %v7211_v59, %v5840_v30 }
 0x7f8   : > { %v7231_v5 = vpop.f32.mrb[32].mxu0 }
 0x7f9   : > { %v7232_v7 = vpop.f32.mrb[33].mxu0 }
 0x7fa   : > { %v7233_v8 = vadd.f32 %v7232_v7, %v7231_v5  ;;  %v7234_v44 = vpop.f32.mrb[34].mxu0 }
 0x7fb   : > { %v7235_v47 = vpop.f32.mrb[35].mxu0 }
 0x7fc   : > { %v6188_v12 = vadd.f32 %v7233_v8, %v6014_v4 }
 0x7fe   : > { %v6190_v15 = vadd.f32 %v6189_v10, %v6188_v12 }
 0x800   : > { %6192 = vst.msk [vmem:[%s337_s20] sm:$0x1] %vm6191_vm4, %v6190_v15 }
 0x801   : > { %8369 = shalt.err (!%p8366_p1)
}
 0x802   : > { %s8370_s16 = scalar_lea.hbm %s9191_s30, 16  ;;  %s8374_s10 = scalar_lea.hbm %s9240_s7, 32 }
 0x803   : > { %p8371_p0 = scmp.ne.s32.totalorder %s9191_s30, %s8370_s16  ;;  %p8375_p9 = scmp.lt.u32.totalorder %s9191_s30, %s9240_s7 }
 0x804   : > { %p8376_p12 = scmp.lt.u32.totalorder %s8374_s10, %s8370_s16  ;;  %p8378_p2 = scmp.lt.u32.totalorder %s8370_s16, %s9191_s30 }
 0x805   : > { %p8372_p6 = pnand %p8371_p0, %p9266_p3 }
 0x806   : > { %p8377_p10 = por %p8376_p12, %p8375_p9 }
 0x807   : > { %p8373_p5 = pneg %p8372_p6 }
 0x808   : > { %p8379_p4 = por %p8378_p2, %p8377_p10 }
 0x80a   : > { %p8380_p7 = pnand %p8379_p4, %p8373_p5 }
 0x80c   : > { %8383 = shalt.err (!%p8380_p7)
}
 0x80d   : > { %7425 = dma.vmem_to_hbm [thread:$0]  (%p9266_p3), %s9193_s2, 16, %s9191_s30, %s6194_s21  }
 0x80e PF: > { %p7457_p8 = scmp.ge.s32.totalorder %s8430_s27, 2  ;;  %s6218_s18 = sand.u32 1, %s8418_s24  }
 0x80f   : > { %p9267_p11 = scmp.ne.s32.totalorder %s9253_s12, 0  ;;  %s6219_s9 = scalar_lea.sflag [#allocation6], %s6218_s18 }
 0x811   : > { %p7444_p13 = pnand %p7457_p8, %p9267_p11 }
 0x813   : > { %8413 = dma.done.wait (!%p7444_p13), %s6219_s9, 16  }
 0x814   : > { %8415 = vsyncadd (!%p7444_p13), %s6219_s9, 4294967280  ;;  %s9268_s27 = sld [smem:[#allocation19_spill]]  ;;  %s9269_s14 = sld [smem:[#allocation18_spill]] }
 0x815   : > { %s9270_s26 = sld [smem:[#allocation20_spill]]  ;;  %s9271_s24 = smov %s8422_s25 }
 0x81a   : > { %p20_p1 = scmp.ge.s32.totalorder %s9268_s27, 4   ;;  %s9272_s25 = smov %s9269_s14 }
 0x81c   :  { %22 = sbr.rel (!%p20_p1) target bundleno = 9 (0x9), region = 118 }
 0x823   :  { %6223 = vsyncpa [#allocation5], 1 }
 0x824   :  { %6225 = vsyncpa [#allocation5 + $0x1], 1 }
 0x825   :  { %6226 = vsyncpa [#allocation8], 1 }
 0x826   :  { %6227 = vsyncpa [#allocation11], 1 }
 0x827   :  { %6228 = vsyncpa [#allocation6], 1 }
 0x828   :  { %6230 = vsyncpa [#allocation6 + $0x1], 1 }

</bundles_post_ra>
